<compile_context>
chip_gen: v5e
topology: v5e:2x2
jax: 0.10.0
libtpu: 0.0.40
codegen_flags: <defaults>
</compile_context>

<pallas_src>
import jax
import jax.numpy as jnp
from jax.experimental import pallas as pl
from jax.experimental.pallas import tpu as pltpu


# ----------------------------------------------------------------------------
# Fused kernel: 2-layer bidirectional LSTM + FC + sigmoid, all in VMEM.
# ----------------------------------------------------------------------------
def _lstm_fused_kernel(x_ref, wx0_ref, wh0_ref, b0_ref,
                       wx1_ref, wh1_ref, b1_ref,
                       fcw_ref, fcb_ref, o_ref,
                       gx_scr, hseq_scr):
    TB = x_ref.shape[0]            # T * Bp  (time-major, batch padded to 8)
    Bp = o_ref.shape[0]
    T = TB // Bp
    H2 = hseq_scr.shape[-1]        # fused fwd+bwd hidden width (2H)
    H = H2 // 2
    G = 4 * H2                     # fused gate width (4 gates x 2 directions)

    # Lane mask over the fused gate axis (computed once, hoisted out of loops):
    # within each 2H gate block the first H lanes belong to the fwd direction.
    lane = jax.lax.broadcasted_iota(jnp.int32, (Bp, G), 1)
    fwd_mask = (lane % H2) < H

    def run_layer(wh_ref):
        # Recurrence over time; fwd processes t = s, bwd processes t = T-1-s.
        h = jnp.zeros((Bp, H2), jnp.float32)   # [h_f | h_b]
        c = jnp.zeros((Bp, H2), jnp.float32)   # [c_f | c_b]
        for s in range(T):                     # T is small & static: fully unrolled
            rf = s * Bp
            rb = (T - 1 - s) * Bp
            # Fwd gate columns come from time s, bwd gate columns from T-1-s.
            gx = jnp.where(fwd_mask,
                           gx_scr[rf:rf + Bp, :],
                           gx_scr[rb:rb + Bp, :])
            gates = gx + jnp.dot(h, wh_ref[...],
                                 preferred_element_type=jnp.float32)
            # Per-gate-block activations (no redundant full-width tanh+sigmoid):
            # [0:2*H2) = i,f -> sigmoid ; [2*H2:3*H2) = g -> tanh ; o -> sigmoid.
            sig_if = jax.nn.sigmoid(gates[:, 0:2 * H2])
            g_g = jnp.tanh(gates[:, 2 * H2:3 * H2])
            o_g = jax.nn.sigmoid(gates[:, 3 * H2:4 * H2])
            i_g = sig_if[:, 0:H2]
            f_g = sig_if[:, H2:2 * H2]
            c = f_g * c + i_g * g_g
            h = o_g * jnp.tanh(c)
            hseq_scr[rf:rf + Bp, 0:H] = h[:, 0:H]       # h_fwd at absolute time s
            hseq_scr[rb:rb + Bp, H:H2] = h[:, H:H2]     # h_bwd at absolute time T-1-s

    # ---- layer 0: batched input projection (all timesteps, both directions)
    gx_scr[...] = (jnp.dot(x_ref[...], wx0_ref[...],
                           preferred_element_type=jnp.float32) + b0_ref[...])
    run_layer(wh0_ref)

    # ---- layer 1: input is [h_f(t) | h_b(t)] of layer 0 (already time-ordered);
    # single (T*Bp, 2H) @ (2H, 8H) matmul thanks to the merged hidden buffer.
    gx_scr[...] = (jnp.dot(hseq_scr[...], wx1_ref[...],
                           preferred_element_type=jnp.float32) + b1_ref[...])
    run_layer(wh1_ref)

    # ---- fused FC(2H -> 1) + sigmoid on lstm_out[:, -1, :] = [h_f(T-1)|h_b(T-1)]
    last = (T - 1) * Bp
    logits = (jnp.sum(hseq_scr[last:last + Bp, :] * fcw_ref[...],
                      axis=-1, keepdims=True) + fcb_ref[...])
    o_ref[...] = jax.nn.sigmoid(logits)


# ----------------------------------------------------------------------------
# Wrapper: pad batch to 8 sublanes, go time-major once, call the fused kernel.
# ----------------------------------------------------------------------------
@jax.jit
def lstm_sequence_forward(x, fused_params):
    (wx0, wh0, b0), (wx1, wh1, b1), (fc_w, fc_b) = fused_params
    B, T, D = x.shape
    H = wh0.shape[0] // 2
    Bp = max(8, -(-B // 8) * 8)

    x_tb = jnp.transpose(x, (1, 0, 2))                      # (T, B, D) time-major
    x_tb = jnp.pad(x_tb, ((0, 0), (0, Bp - B), (0, 0)))     # zero-pad batch rows
    x_flat = x_tb.reshape(T * Bp, D)

    out = pl.pallas_call(
        _lstm_fused_kernel,
        out_shape=jax.ShapeDtypeStruct((Bp, 1), jnp.float32),
        scratch_shapes=[
            pltpu.VMEM((T * Bp, 8 * H), jnp.float32),  # fused gate pre-activations
            pltpu.VMEM((T * Bp, 2 * H), jnp.float32),  # [h_fwd | h_bwd] sequence
        ],
    )(x_flat, wx0, wh0, b0, wx1, wh1, b1, fc_w, fc_b)
    return out[:B]


# ----------------------------------------------------------------------------
# Parameter generation (PyTorch format) and fusion into the kernel layout.
# ----------------------------------------------------------------------------
def init_torch_params(key, input_size, hidden_size, num_layers):
    """PyTorch-format LSTM + FC params: uniform(-1/sqrt(H), 1/sqrt(H))."""
    H = hidden_size
    k = 1.0 / (H ** 0.5)
    layers = []
    for layer in range(num_layers):
        in_size = input_size if layer == 0 else 2 * H
        dirs = {}
        for direction in ("fwd", "bwd"):
            key, k1, k2, k3, k4 = jax.random.split(key, 5)
            dirs[direction] = dict(
                w_ih=jax.random.uniform(k1, (4 * H, in_size), jnp.float32, -k, k),
                w_hh=jax.random.uniform(k2, (4 * H, H), jnp.float32, -k, k),
                b_ih=jax.random.uniform(k3, (4 * H,), jnp.float32, -k, k),
                b_hh=jax.random.uniform(k4, (4 * H,), jnp.float32, -k, k),
            )
        layers.append(dirs)
    key, k1, k2 = jax.random.split(key, 3)
    kf = 1.0 / ((2 * H) ** 0.5)
    fc_w = jax.random.uniform(k1, (1, 2 * H), jnp.float32, -kf, kf)
    fc_b = jax.random.uniform(k2, (1,), jnp.float32, -kf, kf)
    return layers, fc_w, fc_b


def fuse_layer(dirs, hidden_size):
    """Pack fwd+bwd PyTorch weights into the fused gate layout
    [i_f i_b | f_f f_b | g_f g_b | o_f o_b] (each block H wide)."""
    H = hidden_size
    f, b = dirs["fwd"], dirs["bwd"]
    in_size = f["w_ih"].shape[1]

    def gate_blocks(w_t):                       # (in, 4H) -> (in, 4, H)
        return w_t.reshape(w_t.shape[0], 4, H)

    # Input projection: columns interleaved per gate: [.., g_fwd, g_bwd, ..]
    wx = jnp.stack([gate_blocks(f["w_ih"].T), gate_blocks(b["w_ih"].T)],
                   axis=2).reshape(in_size, 8 * H)

    # Recurrent projection: block diagonal so h_f only feeds fwd gate columns
    # and h_b only feeds bwd gate columns.
    zero = jnp.zeros((H, 4, H), jnp.float32)
    top = jnp.stack([gate_blocks(f["w_hh"].T), zero], axis=2).reshape(H, 8 * H)
    bot = jnp.stack([zero, gate_blocks(b["w_hh"].T)], axis=2).reshape(H, 8 * H)
    wh = jnp.concatenate([top, bot], axis=0)    # (2H, 8H)

    bias = jnp.stack([(f["b_ih"] + f["b_hh"]).reshape(4, H),
                      (b["b_ih"] + b["b_hh"]).reshape(4, H)],
                     axis=1).reshape(1, 8 * H)
    return wx, wh, bias


# ----------------------------------------------------------------------------
# Pure-JAX reference (PyTorch LSTM semantics) for a numerical sanity check.
# ----------------------------------------------------------------------------
def reference_forward(x, layers, fc_w, fc_b, hidden_size):
    H = hidden_size
    B, T, _ = x.shape

    def run_dir(seq, p, reverse):
        h = jnp.zeros((B, H), jnp.float32)
        c = jnp.zeros((B, H), jnp.float32)
        outs = [None] * T
        order = range(T - 1, -1, -1) if reverse else range(T)
        for t in order:
            g = (seq[:, t, :] @ p["w_ih"].T + h @ p["w_hh"].T
                 + p["b_ih"] + p["b_hh"])
            i = jax.nn.sigmoid(g[:, 0:H])
            f = jax.nn.sigmoid(g[:, H:2 * H])
            gg = jnp.tanh(g[:, 2 * H:3 * H])
            o = jax.nn.sigmoid(g[:, 3 * H:4 * H])
            c = f * c + i * gg
            h = o * jnp.tanh(c)
            outs[t] = h
        return jnp.stack(outs, axis=1)          # (B, T, H)

    seq = x
    for dirs in layers:
        out_f = run_dir(seq, dirs["fwd"], reverse=False)
        out_b = run_dir(seq, dirs["bwd"], reverse=True)
        seq = jnp.concatenate([out_f, out_b], axis=-1)
    last = seq[:, -1, :]
    return jax.nn.sigmoid(last @ fc_w.T + fc_b)


if __name__ == "__main__":
    # Small shapes consistent with the module's forward: (batch, seq, feature)
    B, T, INPUT_SIZE, HIDDEN_SIZE, NUM_LAYERS = 2, 8, 32, 32, 2

    key = jax.random.PRNGKey(0)
    key, xk = jax.random.split(key)
    x = jax.random.normal(xk, (B, T, INPUT_SIZE), jnp.float32)

    layers, fc_w, fc_b = init_torch_params(key, INPUT_SIZE, HIDDEN_SIZE, NUM_LAYERS)
    fused = (fuse_layer(layers[0], HIDDEN_SIZE),
             fuse_layer(layers[1], HIDDEN_SIZE),
             (fc_w, fc_b.reshape(1, 1)))

    out = jax.block_until_ready(lstm_sequence_forward(x, fused))

    assert out.shape == (B, 1), out.shape
    assert bool(jnp.all((out >= 0.0) & (out <= 1.0)))

    # Numerical sanity check vs. a pure-JAX/XLA implementation of the module
    # (loose tolerance: XLA default matmul precision may truncate to bf16).
    ref = reference_forward(x, layers, fc_w, fc_b, HIDDEN_SIZE)
    assert bool(jnp.allclose(out, jax.block_until_ready(ref), atol=2e-2, rtol=0.0))

    print("KERNEL_OK")
</pallas_src>

<mosaic_0001>
module attributes {stable_mosaic.version = 11 : i64} {
  func.func @_lstm_fused_kernel(%arg0: memref<64x32xf32, #tpu.memory_space<vmem>>, %arg1: memref<32x256xf32, #tpu.memory_space<vmem>>, %arg2: memref<64x256xf32, #tpu.memory_space<vmem>>, %arg3: memref<1x256xf32, #tpu.memory_space<vmem>>, %arg4: memref<64x256xf32, #tpu.memory_space<vmem>>, %arg5: memref<64x256xf32, #tpu.memory_space<vmem>>, %arg6: memref<1x256xf32, #tpu.memory_space<vmem>>, %arg7: memref<1x64xf32, #tpu.memory_space<vmem>>, %arg8: memref<1x1xf32, #tpu.memory_space<vmem>>, %arg9: memref<8x1xf32, #tpu.memory_space<vmem>>, %arg10: memref<64x256xf32, #tpu.memory_space<vmem>>, %arg11: memref<64x64xf32, #tpu.memory_space<vmem>>) attributes {dimension_semantics = [], scalar_prefetch = 0 : i64, scratch_operands = 2 : i64, tpu.core_type = #tpu.core_type<tc>} {
    %0 = tpu.iota {dimensions = array<i32: 1>} : vector<8x256xi32>
    %c64_i32 = arith.constant 64 : i32
    %c0_i32 = arith.constant 0 : i32
    %1 = arith.cmpi eq, %c64_i32, %c0_i32 : i32
    %c1_i32 = arith.constant 1 : i32
    %2 = arith.select %1, %c1_i32, %c64_i32 : i32
    %3 = vector.broadcast %2 : i32 to vector<8x256xi32>
    %4 = arith.remsi %0, %3 : vector<8x256xi32>
    %c0_i32_0 = arith.constant 0 : i32
    %5 = vector.broadcast %c0_i32_0 : i32 to vector<8x256xi32>
    %6 = arith.cmpi ne, %4, %5 : vector<8x256xi32>
    %c0_i32_1 = arith.constant 0 : i32
    %7 = vector.broadcast %c0_i32_1 : i32 to vector<8x256xi32>
    %8 = arith.cmpi slt, %4, %7 : vector<8x256xi32>
    %c0_i32_2 = arith.constant 0 : i32
    %9 = arith.cmpi slt, %2, %c0_i32_2 : i32
    %10 = vector.broadcast %9 : i1 to vector<8x256xi1>
    %11 = vector.broadcast %10 : vector<8x256xi1> to vector<8x256xi1>
    %12 = arith.xori %8, %11 : vector<8x256xi1>
    %13 = arith.andi %12, %6 : vector<8x256xi1>
    %14 = vector.broadcast %2 : i32 to vector<8x256xi32>
    %15 = arith.addi %4, %14 : vector<8x256xi32>
    %16 = arith.select %13, %15, %4 : vector<8x256xi1>, vector<8x256xi32>
    %c32_i32 = arith.constant 32 : i32
    %17 = vector.broadcast %c32_i32 : i32 to vector<8x256xi32>
    %18 = arith.cmpi slt, %16, %17 : vector<8x256xi32>
    %c0 = arith.constant 0 : index
    %c0_3 = arith.constant 0 : index
    %19 = vector.load %arg0[%c0, %c0_3] : memref<64x32xf32, #tpu.memory_space<vmem>>, vector<64x32xf32>
    %c0_4 = arith.constant 0 : index
    %c0_5 = arith.constant 0 : index
    %20 = vector.load %arg1[%c0_4, %c0_5] : memref<32x256xf32, #tpu.memory_space<vmem>>, vector<32x256xf32>
    %cst = arith.constant dense<0.000000e+00> : vector<64x256xf32>
    %21 = tpu.matmul %19, %20, %cst {dimension_numbers = #tpu.dot_dimension_numbers<[1], [0], [0], [1], [0, 0, 1, 1], [], []>} : vector<64x32xf32>, vector<32x256xf32>, vector<64x256xf32> -> vector<64x256xf32>
    %c0_6 = arith.constant 0 : index
    %c0_7 = arith.constant 0 : index
    %22 = vector.load %arg3[%c0_6, %c0_7] : memref<1x256xf32, #tpu.memory_space<vmem>>, vector<1x256xf32>
    %23 = vector.broadcast %22 : vector<1x256xf32> to vector<64x256xf32>
    %24 = arith.addf %21, %23 : vector<64x256xf32>
    %c0_8 = arith.constant 0 : index
    %c0_9 = arith.constant 0 : index
    %25 = vector.load %arg10[%c0_8, %c0_9] : memref<64x256xf32, #tpu.memory_space<vmem>>, vector<64x256xf32>
    tpu.vector_store %arg10[%c0_8, %c0_9], %24 {strides = array<i32>} : memref<64x256xf32, #tpu.memory_space<vmem>>, vector<64x256xf32>,
    %cst_10 = arith.constant 0.000000e+00 : f32
    %26 = vector.broadcast %cst_10 : f32 to vector<8x64xf32>
    %cst_11 = arith.constant 0.000000e+00 : f32
    %27 = vector.broadcast %cst_11 : f32 to vector<8x64xf32>
    %c0_12 = arith.constant 0 : index
    %c0_13 = arith.constant 0 : index
    %28 = vector.load %arg10[%c0_12, %c0_13] : memref<64x256xf32, #tpu.memory_space<vmem>>, vector<8x256xf32>
    %c56 = arith.constant 56 : index
    %c0_14 = arith.constant 0 : index
    %29 = vector.load %arg10[%c56, %c0_14] : memref<64x256xf32, #tpu.memory_space<vmem>>, vector<8x256xf32>
    %30 = arith.select %18, %28, %29 : vector<8x256xi1>, vector<8x256xf32>
    %c0_15 = arith.constant 0 : index
    %c0_16 = arith.constant 0 : index
    %31 = vector.load %arg2[%c0_15, %c0_16] : memref<64x256xf32, #tpu.memory_space<vmem>>, vector<64x256xf32>
    %cst_17 = arith.constant dense<0.000000e+00> : vector<8x256xf32>
    %32 = tpu.matmul %26, %31, %cst_17 {dimension_numbers = #tpu.dot_dimension_numbers<[1], [0], [0], [1], [0, 0, 1, 1], [], []>} : vector<8x64xf32>, vector<64x256xf32>, vector<8x256xf32> -> vector<8x256xf32>
    %33 = arith.addf %30, %32 : vector<8x256xf32>
    %34 = vector.extract_strided_slice %33 {offsets = [0, 0], sizes = [8, 128], strides = [1, 1]} : vector<8x256xf32> to vector<8x128xf32>
    %35 = arith.negf %34 : vector<8x128xf32>
    %36 = math.exp %35 : vector<8x128xf32>
    %cst_18 = arith.constant 1.000000e+00 : f32
    %37 = vector.broadcast %cst_18 : f32 to vector<8x128xf32>
    %38 = arith.addf %37, %36 : vector<8x128xf32>
    %39 = arith.divf %37, %38 : vector<8x128xf32>
    %40 = vector.extract_strided_slice %33 {offsets = [0, 128], sizes = [8, 64], strides = [1, 1]} : vector<8x256xf32> to vector<8x64xf32>
    %41 = math.tanh %40 : vector<8x64xf32>
    %42 = vector.extract_strided_slice %33 {offsets = [0, 192], sizes = [8, 64], strides = [1, 1]} : vector<8x256xf32> to vector<8x64xf32>
    %43 = arith.negf %42 : vector<8x64xf32>
    %44 = math.exp %43 : vector<8x64xf32>
    %cst_19 = arith.constant 1.000000e+00 : f32
    %45 = vector.broadcast %cst_19 : f32 to vector<8x64xf32>
    %46 = arith.addf %45, %44 : vector<8x64xf32>
    %47 = arith.divf %45, %46 : vector<8x64xf32>
    %48 = vector.extract_strided_slice %39 {offsets = [0, 0], sizes = [8, 64], strides = [1, 1]} : vector<8x128xf32> to vector<8x64xf32>
    %49 = vector.extract_strided_slice %39 {offsets = [0, 64], sizes = [8, 64], strides = [1, 1]} : vector<8x128xf32> to vector<8x64xf32>
    %50 = arith.mulf %49, %27 : vector<8x64xf32>
    %51 = arith.mulf %48, %41 : vector<8x64xf32>
    %52 = arith.addf %50, %51 : vector<8x64xf32>
    %53 = math.tanh %52 : vector<8x64xf32>
    %54 = arith.mulf %47, %53 : vector<8x64xf32>
    %55 = vector.extract_strided_slice %54 {offsets = [0, 0], sizes = [8, 32], strides = [1, 1]} : vector<8x64xf32> to vector<8x32xf32>
    %c0_20 = arith.constant 0 : index
    %c0_21 = arith.constant 0 : index
    %56 = vector.load %arg11[%c0_20, %c0_21] : memref<64x64xf32, #tpu.memory_space<vmem>>, vector<8x32xf32>
    tpu.vector_store %arg11[%c0_20, %c0_21], %55 {strides = array<i32>} : memref<64x64xf32, #tpu.memory_space<vmem>>, vector<8x32xf32>,
    %57 = vector.extract_strided_slice %54 {offsets = [0, 32], sizes = [8, 32], strides = [1, 1]} : vector<8x64xf32> to vector<8x32xf32>
    %c56_22 = arith.constant 56 : index
    %c32 = arith.constant 32 : index
    %58 = vector.load %arg11[%c56_22, %c32] : memref<64x64xf32, #tpu.memory_space<vmem>>, vector<8x32xf32>
    tpu.vector_store %arg11[%c56_22, %c32], %57 {strides = array<i32>} : memref<64x64xf32, #tpu.memory_space<vmem>>, vector<8x32xf32>,
    %c8 = arith.constant 8 : index
    %c0_23 = arith.constant 0 : index
    %59 = vector.load %arg10[%c8, %c0_23] : memref<64x256xf32, #tpu.memory_space<vmem>>, vector<8x256xf32>
    %c48 = arith.constant 48 : index
    %c0_24 = arith.constant 0 : index
    %60 = vector.load %arg10[%c48, %c0_24] : memref<64x256xf32, #tpu.memory_space<vmem>>, vector<8x256xf32>
    %61 = arith.select %18, %59, %60 : vector<8x256xi1>, vector<8x256xf32>
    %c0_25 = arith.constant 0 : index
    %c0_26 = arith.constant 0 : index
    %62 = vector.load %arg2[%c0_25, %c0_26] : memref<64x256xf32, #tpu.memory_space<vmem>>, vector<64x256xf32>
    %cst_27 = arith.constant dense<0.000000e+00> : vector<8x256xf32>
    %63 = tpu.matmul %54, %62, %cst_27 {dimension_numbers = #tpu.dot_dimension_numbers<[1], [0], [0], [1], [0, 0, 1, 1], [], []>} : vector<8x64xf32>, vector<64x256xf32>, vector<8x256xf32> -> vector<8x256xf32>
    %64 = arith.addf %61, %63 : vector<8x256xf32>
    %65 = vector.extract_strided_slice %64 {offsets = [0, 0], sizes = [8, 128], strides = [1, 1]} : vector<8x256xf32> to vector<8x128xf32>
    %66 = arith.negf %65 : vector<8x128xf32>
    %67 = math.exp %66 : vector<8x128xf32>
    %cst_28 = arith.constant 1.000000e+00 : f32
    %68 = vector.broadcast %cst_28 : f32 to vector<8x128xf32>
    %69 = arith.addf %68, %67 : vector<8x128xf32>
    %70 = arith.divf %68, %69 : vector<8x128xf32>
    %71 = vector.extract_strided_slice %64 {offsets = [0, 128], sizes = [8, 64], strides = [1, 1]} : vector<8x256xf32> to vector<8x64xf32>
    %72 = math.tanh %71 : vector<8x64xf32>
    %73 = vector.extract_strided_slice %64 {offsets = [0, 192], sizes = [8, 64], strides = [1, 1]} : vector<8x256xf32> to vector<8x64xf32>
    %74 = arith.negf %73 : vector<8x64xf32>
    %75 = math.exp %74 : vector<8x64xf32>
    %cst_29 = arith.constant 1.000000e+00 : f32
    %76 = vector.broadcast %cst_29 : f32 to vector<8x64xf32>
    %77 = arith.addf %76, %75 : vector<8x64xf32>
    %78 = arith.divf %76, %77 : vector<8x64xf32>
    %79 = vector.extract_strided_slice %70 {offsets = [0, 0], sizes = [8, 64], strides = [1, 1]} : vector<8x128xf32> to vector<8x64xf32>
    %80 = vector.extract_strided_slice %70 {offsets = [0, 64], sizes = [8, 64], strides = [1, 1]} : vector<8x128xf32> to vector<8x64xf32>
    %81 = arith.mulf %80, %52 : vector<8x64xf32>
    %82 = arith.mulf %79, %72 : vector<8x64xf32>
    %83 = arith.addf %81, %82 : vector<8x64xf32>
    %84 = math.tanh %83 : vector<8x64xf32>
    %85 = arith.mulf %78, %84 : vector<8x64xf32>
    %86 = vector.extract_strided_slice %85 {offsets = [0, 0], sizes = [8, 32], strides = [1, 1]} : vector<8x64xf32> to vector<8x32xf32>
    %c8_30 = arith.constant 8 : index
    %c0_31 = arith.constant 0 : index
    %87 = vector.load %arg11[%c8_30, %c0_31] : memref<64x64xf32, #tpu.memory_space<vmem>>, vector<8x32xf32>
    tpu.vector_store %arg11[%c8_30, %c0_31], %86 {strides = array<i32>} : memref<64x64xf32, #tpu.memory_space<vmem>>, vector<8x32xf32>,
    %88 = vector.extract_strided_slice %85 {offsets = [0, 32], sizes = [8, 32], strides = [1, 1]} : vector<8x64xf32> to vector<8x32xf32>
    %c48_32 = arith.constant 48 : index
    %c32_33 = arith.constant 32 : index
    %89 = vector.load %arg11[%c48_32, %c32_33] : memref<64x64xf32, #tpu.memory_space<vmem>>, vector<8x32xf32>
    tpu.vector_store %arg11[%c48_32, %c32_33], %88 {strides = array<i32>} : memref<64x64xf32, #tpu.memory_space<vmem>>, vector<8x32xf32>,
    %c16 = arith.constant 16 : index
    %c0_34 = arith.constant 0 : index
    %90 = vector.load %arg10[%c16, %c0_34] : memref<64x256xf32, #tpu.memory_space<vmem>>, vector<8x256xf32>
    %c40 = arith.constant 40 : index
    %c0_35 = arith.constant 0 : index
    %91 = vector.load %arg10[%c40, %c0_35] : memref<64x256xf32, #tpu.memory_space<vmem>>, vector<8x256xf32>
    %92 = arith.select %18, %90, %91 : vector<8x256xi1>, vector<8x256xf32>
    %c0_36 = arith.constant 0 : index
    %c0_37 = arith.constant 0 : index
    %93 = vector.load %arg2[%c0_36, %c0_37] : memref<64x256xf32, #tpu.memory_space<vmem>>, vector<64x256xf32>
    %cst_38 = arith.constant dense<0.000000e+00> : vector<8x256xf32>
    %94 = tpu.matmul %85, %93, %cst_38 {dimension_numbers = #tpu.dot_dimension_numbers<[1], [0], [0], [1], [0, 0, 1, 1], [], []>} : vector<8x64xf32>, vector<64x256xf32>, vector<8x256xf32> -> vector<8x256xf32>
    %95 = arith.addf %92, %94 : vector<8x256xf32>
    %96 = vector.extract_strided_slice %95 {offsets = [0, 0], sizes = [8, 128], strides = [1, 1]} : vector<8x256xf32> to vector<8x128xf32>
    %97 = arith.negf %96 : vector<8x128xf32>
    %98 = math.exp %97 : vector<8x128xf32>
    %cst_39 = arith.constant 1.000000e+00 : f32
    %99 = vector.broadcast %cst_39 : f32 to vector<8x128xf32>
    %100 = arith.addf %99, %98 : vector<8x128xf32>
    %101 = arith.divf %99, %100 : vector<8x128xf32>
    %102 = vector.extract_strided_slice %95 {offsets = [0, 128], sizes = [8, 64], strides = [1, 1]} : vector<8x256xf32> to vector<8x64xf32>
    %103 = math.tanh %102 : vector<8x64xf32>
    %104 = vector.extract_strided_slice %95 {offsets = [0, 192], sizes = [8, 64], strides = [1, 1]} : vector<8x256xf32> to vector<8x64xf32>
    %105 = arith.negf %104 : vector<8x64xf32>
    %106 = math.exp %105 : vector<8x64xf32>
    %cst_40 = arith.constant 1.000000e+00 : f32
    %107 = vector.broadcast %cst_40 : f32 to vector<8x64xf32>
    %108 = arith.addf %107, %106 : vector<8x64xf32>
    %109 = arith.divf %107, %108 : vector<8x64xf32>
    %110 = vector.extract_strided_slice %101 {offsets = [0, 0], sizes = [8, 64], strides = [1, 1]} : vector<8x128xf32> to vector<8x64xf32>
    %111 = vector.extract_strided_slice %101 {offsets = [0, 64], sizes = [8, 64], strides = [1, 1]} : vector<8x128xf32> to vector<8x64xf32>
    %112 = arith.mulf %111, %83 : vector<8x64xf32>
    %113 = arith.mulf %110, %103 : vector<8x64xf32>
    %114 = arith.addf %112, %113 : vector<8x64xf32>
    %115 = math.tanh %114 : vector<8x64xf32>
    %116 = arith.mulf %109, %115 : vector<8x64xf32>
    %117 = vector.extract_strided_slice %116 {offsets = [0, 0], sizes = [8, 32], strides = [1, 1]} : vector<8x64xf32> to vector<8x32xf32>
    %c16_41 = arith.constant 16 : index
    %c0_42 = arith.constant 0 : index
    %118 = vector.load %arg11[%c16_41, %c0_42] : memref<64x64xf32, #tpu.memory_space<vmem>>, vector<8x32xf32>
    tpu.vector_store %arg11[%c16_41, %c0_42], %117 {strides = array<i32>} : memref<64x64xf32, #tpu.memory_space<vmem>>, vector<8x32xf32>,
    %119 = vector.extract_strided_slice %116 {offsets = [0, 32], sizes = [8, 32], strides = [1, 1]} : vector<8x64xf32> to vector<8x32xf32>
    %c40_43 = arith.constant 40 : index
    %c32_44 = arith.constant 32 : index
    %120 = vector.load %arg11[%c40_43, %c32_44] : memref<64x64xf32, #tpu.memory_space<vmem>>, vector<8x32xf32>
    tpu.vector_store %arg11[%c40_43, %c32_44], %119 {strides = array<i32>} : memref<64x64xf32, #tpu.memory_space<vmem>>, vector<8x32xf32>,
    %c24 = arith.constant 24 : index
    %c0_45 = arith.constant 0 : index
    %121 = vector.load %arg10[%c24, %c0_45] : memref<64x256xf32, #tpu.memory_space<vmem>>, vector<8x256xf32>
    %c32_46 = arith.constant 32 : index
    %c0_47 = arith.constant 0 : index
    %122 = vector.load %arg10[%c32_46, %c0_47] : memref<64x256xf32, #tpu.memory_space<vmem>>, vector<8x256xf32>
    %123 = arith.select %18, %121, %122 : vector<8x256xi1>, vector<8x256xf32>
    %c0_48 = arith.constant 0 : index
    %c0_49 = arith.constant 0 : index
    %124 = vector.load %arg2[%c0_48, %c0_49] : memref<64x256xf32, #tpu.memory_space<vmem>>, vector<64x256xf32>
    %cst_50 = arith.constant dense<0.000000e+00> : vector<8x256xf32>
    %125 = tpu.matmul %116, %124, %cst_50 {dimension_numbers = #tpu.dot_dimension_numbers<[1], [0], [0], [1], [0, 0, 1, 1], [], []>} : vector<8x64xf32>, vector<64x256xf32>, vector<8x256xf32> -> vector<8x256xf32>
    %126 = arith.addf %123, %125 : vector<8x256xf32>
    %127 = vector.extract_strided_slice %126 {offsets = [0, 0], sizes = [8, 128], strides = [1, 1]} : vector<8x256xf32> to vector<8x128xf32>
    %128 = arith.negf %127 : vector<8x128xf32>
    %129 = math.exp %128 : vector<8x128xf32>
    %cst_51 = arith.constant 1.000000e+00 : f32
    %130 = vector.broadcast %cst_51 : f32 to vector<8x128xf32>
    %131 = arith.addf %130, %129 : vector<8x128xf32>
    %132 = arith.divf %130, %131 : vector<8x128xf32>
    %133 = vector.extract_strided_slice %126 {offsets = [0, 128], sizes = [8, 64], strides = [1, 1]} : vector<8x256xf32> to vector<8x64xf32>
    %134 = math.tanh %133 : vector<8x64xf32>
    %135 = vector.extract_strided_slice %126 {offsets = [0, 192], sizes = [8, 64], strides = [1, 1]} : vector<8x256xf32> to vector<8x64xf32>
    %136 = arith.negf %135 : vector<8x64xf32>
    %137 = math.exp %136 : vector<8x64xf32>
    %cst_52 = arith.constant 1.000000e+00 : f32
    %138 = vector.broadcast %cst_52 : f32 to vector<8x64xf32>
    %139 = arith.addf %138, %137 : vector<8x64xf32>
    %140 = arith.divf %138, %139 : vector<8x64xf32>
    %141 = vector.extract_strided_slice %132 {offsets = [0, 0], sizes = [8, 64], strides = [1, 1]} : vector<8x128xf32> to vector<8x64xf32>
    %142 = vector.extract_strided_slice %132 {offsets = [0, 64], sizes = [8, 64], strides = [1, 1]} : vector<8x128xf32> to vector<8x64xf32>
    %143 = arith.mulf %142, %114 : vector<8x64xf32>
    %144 = arith.mulf %141, %134 : vector<8x64xf32>
    %145 = arith.addf %143, %144 : vector<8x64xf32>
    %146 = math.tanh %145 : vector<8x64xf32>
    %147 = arith.mulf %140, %146 : vector<8x64xf32>
    %148 = vector.extract_strided_slice %147 {offsets = [0, 0], sizes = [8, 32], strides = [1, 1]} : vector<8x64xf32> to vector<8x32xf32>
    %c24_53 = arith.constant 24 : index
    %c0_54 = arith.constant 0 : index
    %149 = vector.load %arg11[%c24_53, %c0_54] : memref<64x64xf32, #tpu.memory_space<vmem>>, vector<8x32xf32>
    tpu.vector_store %arg11[%c24_53, %c0_54], %148 {strides = array<i32>} : memref<64x64xf32, #tpu.memory_space<vmem>>, vector<8x32xf32>,
    %150 = vector.extract_strided_slice %147 {offsets = [0, 32], sizes = [8, 32], strides = [1, 1]} : vector<8x64xf32> to vector<8x32xf32>
    %c32_55 = arith.constant 32 : index
    %c32_56 = arith.constant 32 : index
    %151 = vector.load %arg11[%c32_55, %c32_56] : memref<64x64xf32, #tpu.memory_space<vmem>>, vector<8x32xf32>
    tpu.vector_store %arg11[%c32_55, %c32_56], %150 {strides = array<i32>} : memref<64x64xf32, #tpu.memory_space<vmem>>, vector<8x32xf32>,
    %c32_57 = arith.constant 32 : index
    %c0_58 = arith.constant 0 : index
    %152 = vector.load %arg10[%c32_57, %c0_58] : memref<64x256xf32, #tpu.memory_space<vmem>>, vector<8x256xf32>
    %c24_59 = arith.constant 24 : index
    %c0_60 = arith.constant 0 : index
    %153 = vector.load %arg10[%c24_59, %c0_60] : memref<64x256xf32, #tpu.memory_space<vmem>>, vector<8x256xf32>
    %154 = arith.select %18, %152, %153 : vector<8x256xi1>, vector<8x256xf32>
    %c0_61 = arith.constant 0 : index
    %c0_62 = arith.constant 0 : index
    %155 = vector.load %arg2[%c0_61, %c0_62] : memref<64x256xf32, #tpu.memory_space<vmem>>, vector<64x256xf32>
    %cst_63 = arith.constant dense<0.000000e+00> : vector<8x256xf32>
    %156 = tpu.matmul %147, %155, %cst_63 {dimension_numbers = #tpu.dot_dimension_numbers<[1], [0], [0], [1], [0, 0, 1, 1], [], []>} : vector<8x64xf32>, vector<64x256xf32>, vector<8x256xf32> -> vector<8x256xf32>
    %157 = arith.addf %154, %156 : vector<8x256xf32>
    %158 = vector.extract_strided_slice %157 {offsets = [0, 0], sizes = [8, 128], strides = [1, 1]} : vector<8x256xf32> to vector<8x128xf32>
    %159 = arith.negf %158 : vector<8x128xf32>
    %160 = math.exp %159 : vector<8x128xf32>
    %cst_64 = arith.constant 1.000000e+00 : f32
    %161 = vector.broadcast %cst_64 : f32 to vector<8x128xf32>
    %162 = arith.addf %161, %160 : vector<8x128xf32>
    %163 = arith.divf %161, %162 : vector<8x128xf32>
    %164 = vector.extract_strided_slice %157 {offsets = [0, 128], sizes = [8, 64], strides = [1, 1]} : vector<8x256xf32> to vector<8x64xf32>
    %165 = math.tanh %164 : vector<8x64xf32>
    %166 = vector.extract_strided_slice %157 {offsets = [0, 192], sizes = [8, 64], strides = [1, 1]} : vector<8x256xf32> to vector<8x64xf32>
    %167 = arith.negf %166 : vector<8x64xf32>
    %168 = math.exp %167 : vector<8x64xf32>
    %cst_65 = arith.constant 1.000000e+00 : f32
    %169 = vector.broadcast %cst_65 : f32 to vector<8x64xf32>
    %170 = arith.addf %169, %168 : vector<8x64xf32>
    %171 = arith.divf %169, %170 : vector<8x64xf32>
    %172 = vector.extract_strided_slice %163 {offsets = [0, 0], sizes = [8, 64], strides = [1, 1]} : vector<8x128xf32> to vector<8x64xf32>
    %173 = vector.extract_strided_slice %163 {offsets = [0, 64], sizes = [8, 64], strides = [1, 1]} : vector<8x128xf32> to vector<8x64xf32>
    %174 = arith.mulf %173, %145 : vector<8x64xf32>
    %175 = arith.mulf %172, %165 : vector<8x64xf32>
    %176 = arith.addf %174, %175 : vector<8x64xf32>
    %177 = math.tanh %176 : vector<8x64xf32>
    %178 = arith.mulf %171, %177 : vector<8x64xf32>
    %179 = vector.extract_strided_slice %178 {offsets = [0, 0], sizes = [8, 32], strides = [1, 1]} : vector<8x64xf32> to vector<8x32xf32>
    %c32_66 = arith.constant 32 : index
    %c0_67 = arith.constant 0 : index
    %180 = vector.load %arg11[%c32_66, %c0_67] : memref<64x64xf32, #tpu.memory_space<vmem>>, vector<8x32xf32>
    tpu.vector_store %arg11[%c32_66, %c0_67], %179 {strides = array<i32>} : memref<64x64xf32, #tpu.memory_space<vmem>>, vector<8x32xf32>,
    %181 = vector.extract_strided_slice %178 {offsets = [0, 32], sizes = [8, 32], strides = [1, 1]} : vector<8x64xf32> to vector<8x32xf32>
    %c24_68 = arith.constant 24 : index
    %c32_69 = arith.constant 32 : index
    %182 = vector.load %arg11[%c24_68, %c32_69] : memref<64x64xf32, #tpu.memory_space<vmem>>, vector<8x32xf32>
    tpu.vector_store %arg11[%c24_68, %c32_69], %181 {strides = array<i32>} : memref<64x64xf32, #tpu.memory_space<vmem>>, vector<8x32xf32>,
    %c40_70 = arith.constant 40 : index
    %c0_71 = arith.constant 0 : index
    %183 = vector.load %arg10[%c40_70, %c0_71] : memref<64x256xf32, #tpu.memory_space<vmem>>, vector<8x256xf32>
    %c16_72 = arith.constant 16 : index
    %c0_73 = arith.constant 0 : index
    %184 = vector.load %arg10[%c16_72, %c0_73] : memref<64x256xf32, #tpu.memory_space<vmem>>, vector<8x256xf32>
    %185 = arith.select %18, %183, %184 : vector<8x256xi1>, vector<8x256xf32>
    %c0_74 = arith.constant 0 : index
    %c0_75 = arith.constant 0 : index
    %186 = vector.load %arg2[%c0_74, %c0_75] : memref<64x256xf32, #tpu.memory_space<vmem>>, vector<64x256xf32>
    %cst_76 = arith.constant dense<0.000000e+00> : vector<8x256xf32>
    %187 = tpu.matmul %178, %186, %cst_76 {dimension_numbers = #tpu.dot_dimension_numbers<[1], [0], [0], [1], [0, 0, 1, 1], [], []>} : vector<8x64xf32>, vector<64x256xf32>, vector<8x256xf32> -> vector<8x256xf32>
    %188 = arith.addf %185, %187 : vector<8x256xf32>
    %189 = vector.extract_strided_slice %188 {offsets = [0, 0], sizes = [8, 128], strides = [1, 1]} : vector<8x256xf32> to vector<8x128xf32>
    %190 = arith.negf %189 : vector<8x128xf32>
    %191 = math.exp %190 : vector<8x128xf32>
    %cst_77 = arith.constant 1.000000e+00 : f32
    %192 = vector.broadcast %cst_77 : f32 to vector<8x128xf32>
    %193 = arith.addf %192, %191 : vector<8x128xf32>
    %194 = arith.divf %192, %193 : vector<8x128xf32>
    %195 = vector.extract_strided_slice %188 {offsets = [0, 128], sizes = [8, 64], strides = [1, 1]} : vector<8x256xf32> to vector<8x64xf32>
    %196 = math.tanh %195 : vector<8x64xf32>
    %197 = vector.extract_strided_slice %188 {offsets = [0, 192], sizes = [8, 64], strides = [1, 1]} : vector<8x256xf32> to vector<8x64xf32>
    %198 = arith.negf %197 : vector<8x64xf32>
    %199 = math.exp %198 : vector<8x64xf32>
    %cst_78 = arith.constant 1.000000e+00 : f32
    %200 = vector.broadcast %cst_78 : f32 to vector<8x64xf32>
    %201 = arith.addf %200, %199 : vector<8x64xf32>
    %202 = arith.divf %200, %201 : vector<8x64xf32>
    %203 = vector.extract_strided_slice %194 {offsets = [0, 0], sizes = [8, 64], strides = [1, 1]} : vector<8x128xf32> to vector<8x64xf32>
    %204 = vector.extract_strided_slice %194 {offsets = [0, 64], sizes = [8, 64], strides = [1, 1]} : vector<8x128xf32> to vector<8x64xf32>
    %205 = arith.mulf %204, %176 : vector<8x64xf32>
    %206 = arith.mulf %203, %196 : vector<8x64xf32>
    %207 = arith.addf %205, %206 : vector<8x64xf32>
    %208 = math.tanh %207 : vector<8x64xf32>
    %209 = arith.mulf %202, %208 : vector<8x64xf32>
    %210 = vector.extract_strided_slice %209 {offsets = [0, 0], sizes = [8, 32], strides = [1, 1]} : vector<8x64xf32> to vector<8x32xf32>
    %c40_79 = arith.constant 40 : index
    %c0_80 = arith.constant 0 : index
    %211 = vector.load %arg11[%c40_79, %c0_80] : memref<64x64xf32, #tpu.memory_space<vmem>>, vector<8x32xf32>
    tpu.vector_store %arg11[%c40_79, %c0_80], %210 {strides = array<i32>} : memref<64x64xf32, #tpu.memory_space<vmem>>, vector<8x32xf32>,
    %212 = vector.extract_strided_slice %209 {offsets = [0, 32], sizes = [8, 32], strides = [1, 1]} : vector<8x64xf32> to vector<8x32xf32>
    %c16_81 = arith.constant 16 : index
    %c32_82 = arith.constant 32 : index
    %213 = vector.load %arg11[%c16_81, %c32_82] : memref<64x64xf32, #tpu.memory_space<vmem>>, vector<8x32xf32>
    tpu.vector_store %arg11[%c16_81, %c32_82], %212 {strides = array<i32>} : memref<64x64xf32, #tpu.memory_space<vmem>>, vector<8x32xf32>,
    %c48_83 = arith.constant 48 : index
    %c0_84 = arith.constant 0 : index
    %214 = vector.load %arg10[%c48_83, %c0_84] : memref<64x256xf32, #tpu.memory_space<vmem>>, vector<8x256xf32>
    %c8_85 = arith.constant 8 : index
    %c0_86 = arith.constant 0 : index
    %215 = vector.load %arg10[%c8_85, %c0_86] : memref<64x256xf32, #tpu.memory_space<vmem>>, vector<8x256xf32>
    %216 = arith.select %18, %214, %215 : vector<8x256xi1>, vector<8x256xf32>
    %c0_87 = arith.constant 0 : index
    %c0_88 = arith.constant 0 : index
    %217 = vector.load %arg2[%c0_87, %c0_88] : memref<64x256xf32, #tpu.memory_space<vmem>>, vector<64x256xf32>
    %cst_89 = arith.constant dense<0.000000e+00> : vector<8x256xf32>
    %218 = tpu.matmul %209, %217, %cst_89 {dimension_numbers = #tpu.dot_dimension_numbers<[1], [0], [0], [1], [0, 0, 1, 1], [], []>} : vector<8x64xf32>, vector<64x256xf32>, vector<8x256xf32> -> vector<8x256xf32>
    %219 = arith.addf %216, %218 : vector<8x256xf32>
    %220 = vector.extract_strided_slice %219 {offsets = [0, 0], sizes = [8, 128], strides = [1, 1]} : vector<8x256xf32> to vector<8x128xf32>
    %221 = arith.negf %220 : vector<8x128xf32>
    %222 = math.exp %221 : vector<8x128xf32>
    %cst_90 = arith.constant 1.000000e+00 : f32
    %223 = vector.broadcast %cst_90 : f32 to vector<8x128xf32>
    %224 = arith.addf %223, %222 : vector<8x128xf32>
    %225 = arith.divf %223, %224 : vector<8x128xf32>
    %226 = vector.extract_strided_slice %219 {offsets = [0, 128], sizes = [8, 64], strides = [1, 1]} : vector<8x256xf32> to vector<8x64xf32>
    %227 = math.tanh %226 : vector<8x64xf32>
    %228 = vector.extract_strided_slice %219 {offsets = [0, 192], sizes = [8, 64], strides = [1, 1]} : vector<8x256xf32> to vector<8x64xf32>
    %229 = arith.negf %228 : vector<8x64xf32>
    %230 = math.exp %229 : vector<8x64xf32>
    %cst_91 = arith.constant 1.000000e+00 : f32
    %231 = vector.broadcast %cst_91 : f32 to vector<8x64xf32>
    %232 = arith.addf %231, %230 : vector<8x64xf32>
    %233 = arith.divf %231, %232 : vector<8x64xf32>
    %234 = vector.extract_strided_slice %225 {offsets = [0, 0], sizes = [8, 64], strides = [1, 1]} : vector<8x128xf32> to vector<8x64xf32>
    %235 = vector.extract_strided_slice %225 {offsets = [0, 64], sizes = [8, 64], strides = [1, 1]} : vector<8x128xf32> to vector<8x64xf32>
    %236 = arith.mulf %235, %207 : vector<8x64xf32>
    %237 = arith.mulf %234, %227 : vector<8x64xf32>
    %238 = arith.addf %236, %237 : vector<8x64xf32>
    %239 = math.tanh %238 : vector<8x64xf32>
    %240 = arith.mulf %233, %239 : vector<8x64xf32>
    %241 = vector.extract_strided_slice %240 {offsets = [0, 0], sizes = [8, 32], strides = [1, 1]} : vector<8x64xf32> to vector<8x32xf32>
    %c48_92 = arith.constant 48 : index
    %c0_93 = arith.constant 0 : index
    %242 = vector.load %arg11[%c48_92, %c0_93] : memref<64x64xf32, #tpu.memory_space<vmem>>, vector<8x32xf32>
    tpu.vector_store %arg11[%c48_92, %c0_93], %241 {strides = array<i32>} : memref<64x64xf32, #tpu.memory_space<vmem>>, vector<8x32xf32>,
    %243 = vector.extract_strided_slice %240 {offsets = [0, 32], sizes = [8, 32], strides = [1, 1]} : vector<8x64xf32> to vector<8x32xf32>
    %c8_94 = arith.constant 8 : index
    %c32_95 = arith.constant 32 : index
    %244 = vector.load %arg11[%c8_94, %c32_95] : memref<64x64xf32, #tpu.memory_space<vmem>>, vector<8x32xf32>
    tpu.vector_store %arg11[%c8_94, %c32_95], %243 {strides = array<i32>} : memref<64x64xf32, #tpu.memory_space<vmem>>, vector<8x32xf32>,
    %c56_96 = arith.constant 56 : index
    %c0_97 = arith.constant 0 : index
    %245 = vector.load %arg10[%c56_96, %c0_97] : memref<64x256xf32, #tpu.memory_space<vmem>>, vector<8x256xf32>
    %c0_98 = arith.constant 0 : index
    %c0_99 = arith.constant 0 : index
    %246 = vector.load %arg10[%c0_98, %c0_99] : memref<64x256xf32, #tpu.memory_space<vmem>>, vector<8x256xf32>
    %247 = arith.select %18, %245, %246 : vector<8x256xi1>, vector<8x256xf32>
    %c0_100 = arith.constant 0 : index
    %c0_101 = arith.constant 0 : index
    %248 = vector.load %arg2[%c0_100, %c0_101] : memref<64x256xf32, #tpu.memory_space<vmem>>, vector<64x256xf32>
    %cst_102 = arith.constant dense<0.000000e+00> : vector<8x256xf32>
    %249 = tpu.matmul %240, %248, %cst_102 {dimension_numbers = #tpu.dot_dimension_numbers<[1], [0], [0], [1], [0, 0, 1, 1], [], []>} : vector<8x64xf32>, vector<64x256xf32>, vector<8x256xf32> -> vector<8x256xf32>
    %250 = arith.addf %247, %249 : vector<8x256xf32>
    %251 = vector.extract_strided_slice %250 {offsets = [0, 0], sizes = [8, 128], strides = [1, 1]} : vector<8x256xf32> to vector<8x128xf32>
    %252 = arith.negf %251 : vector<8x128xf32>
    %253 = math.exp %252 : vector<8x128xf32>
    %cst_103 = arith.constant 1.000000e+00 : f32
    %254 = vector.broadcast %cst_103 : f32 to vector<8x128xf32>
    %255 = arith.addf %254, %253 : vector<8x128xf32>
    %256 = arith.divf %254, %255 : vector<8x128xf32>
    %257 = vector.extract_strided_slice %250 {offsets = [0, 128], sizes = [8, 64], strides = [1, 1]} : vector<8x256xf32> to vector<8x64xf32>
    %258 = math.tanh %257 : vector<8x64xf32>
    %259 = vector.extract_strided_slice %250 {offsets = [0, 192], sizes = [8, 64], strides = [1, 1]} : vector<8x256xf32> to vector<8x64xf32>
    %260 = arith.negf %259 : vector<8x64xf32>
    %261 = math.exp %260 : vector<8x64xf32>
    %cst_104 = arith.constant 1.000000e+00 : f32
    %262 = vector.broadcast %cst_104 : f32 to vector<8x64xf32>
    %263 = arith.addf %262, %261 : vector<8x64xf32>
    %264 = arith.divf %262, %263 : vector<8x64xf32>
    %265 = vector.extract_strided_slice %256 {offsets = [0, 0], sizes = [8, 64], strides = [1, 1]} : vector<8x128xf32> to vector<8x64xf32>
    %266 = vector.extract_strided_slice %256 {offsets = [0, 64], sizes = [8, 64], strides = [1, 1]} : vector<8x128xf32> to vector<8x64xf32>
    %267 = arith.mulf %266, %238 : vector<8x64xf32>
    %268 = arith.mulf %265, %258 : vector<8x64xf32>
    %269 = arith.addf %267, %268 : vector<8x64xf32>
    %270 = math.tanh %269 : vector<8x64xf32>
    %271 = arith.mulf %264, %270 : vector<8x64xf32>
    %272 = vector.extract_strided_slice %271 {offsets = [0, 0], sizes = [8, 32], strides = [1, 1]} : vector<8x64xf32> to vector<8x32xf32>
    %c56_105 = arith.constant 56 : index
    %c0_106 = arith.constant 0 : index
    %273 = vector.load %arg11[%c56_105, %c0_106] : memref<64x64xf32, #tpu.memory_space<vmem>>, vector<8x32xf32>
    tpu.vector_store %arg11[%c56_105, %c0_106], %272 {strides = array<i32>} : memref<64x64xf32, #tpu.memory_space<vmem>>, vector<8x32xf32>,
    %274 = vector.extract_strided_slice %271 {offsets = [0, 32], sizes = [8, 32], strides = [1, 1]} : vector<8x64xf32> to vector<8x32xf32>
    %c0_107 = arith.constant 0 : index
    %c32_108 = arith.constant 32 : index
    %275 = vector.load %arg11[%c0_107, %c32_108] : memref<64x64xf32, #tpu.memory_space<vmem>>, vector<8x32xf32>
    tpu.vector_store %arg11[%c0_107, %c32_108], %274 {strides = array<i32>} : memref<64x64xf32, #tpu.memory_space<vmem>>, vector<8x32xf32>,
    %c0_109 = arith.constant 0 : index
    %c0_110 = arith.constant 0 : index
    %276 = vector.load %arg11[%c0_109, %c0_110] : memref<64x64xf32, #tpu.memory_space<vmem>>, vector<64x64xf32>
    %c0_111 = arith.constant 0 : index
    %c0_112 = arith.constant 0 : index
    %277 = vector.load %arg4[%c0_111, %c0_112] : memref<64x256xf32, #tpu.memory_space<vmem>>, vector<64x256xf32>
    %cst_113 = arith.constant dense<0.000000e+00> : vector<64x256xf32>
    %278 = tpu.matmul %276, %277, %cst_113 {dimension_numbers = #tpu.dot_dimension_numbers<[1], [0], [0], [1], [0, 0, 1, 1], [], []>} : vector<64x64xf32>, vector<64x256xf32>, vector<64x256xf32> -> vector<64x256xf32>
    %c0_114 = arith.constant 0 : index
    %c0_115 = arith.constant 0 : index
    %279 = vector.load %arg6[%c0_114, %c0_115] : memref<1x256xf32, #tpu.memory_space<vmem>>, vector<1x256xf32>
    %280 = vector.broadcast %279 : vector<1x256xf32> to vector<64x256xf32>
    %281 = arith.addf %278, %280 : vector<64x256xf32>
    %c0_116 = arith.constant 0 : index
    %c0_117 = arith.constant 0 : index
    %282 = vector.load %arg10[%c0_116, %c0_117] : memref<64x256xf32, #tpu.memory_space<vmem>>, vector<64x256xf32>
    tpu.vector_store %arg10[%c0_116, %c0_117], %281 {strides = array<i32>} : memref<64x256xf32, #tpu.memory_space<vmem>>, vector<64x256xf32>,
    %cst_118 = arith.constant 0.000000e+00 : f32
    %283 = vector.broadcast %cst_118 : f32 to vector<8x64xf32>
    %cst_119 = arith.constant 0.000000e+00 : f32
    %284 = vector.broadcast %cst_119 : f32 to vector<8x64xf32>
    %c0_120 = arith.constant 0 : index
    %c0_121 = arith.constant 0 : index
    %285 = vector.load %arg10[%c0_120, %c0_121] : memref<64x256xf32, #tpu.memory_space<vmem>>, vector<8x256xf32>
    %c56_122 = arith.constant 56 : index
    %c0_123 = arith.constant 0 : index
    %286 = vector.load %arg10[%c56_122, %c0_123] : memref<64x256xf32, #tpu.memory_space<vmem>>, vector<8x256xf32>
    %287 = arith.select %18, %285, %286 : vector<8x256xi1>, vector<8x256xf32>
    %c0_124 = arith.constant 0 : index
    %c0_125 = arith.constant 0 : index
    %288 = vector.load %arg5[%c0_124, %c0_125] : memref<64x256xf32, #tpu.memory_space<vmem>>, vector<64x256xf32>
    %cst_126 = arith.constant dense<0.000000e+00> : vector<8x256xf32>
    %289 = tpu.matmul %283, %288, %cst_126 {dimension_numbers = #tpu.dot_dimension_numbers<[1], [0], [0], [1], [0, 0, 1, 1], [], []>} : vector<8x64xf32>, vector<64x256xf32>, vector<8x256xf32> -> vector<8x256xf32>
    %290 = arith.addf %287, %289 : vector<8x256xf32>
    %291 = vector.extract_strided_slice %290 {offsets = [0, 0], sizes = [8, 128], strides = [1, 1]} : vector<8x256xf32> to vector<8x128xf32>
    %292 = arith.negf %291 : vector<8x128xf32>
    %293 = math.exp %292 : vector<8x128xf32>
    %cst_127 = arith.constant 1.000000e+00 : f32
    %294 = vector.broadcast %cst_127 : f32 to vector<8x128xf32>
    %295 = arith.addf %294, %293 : vector<8x128xf32>
    %296 = arith.divf %294, %295 : vector<8x128xf32>
    %297 = vector.extract_strided_slice %290 {offsets = [0, 128], sizes = [8, 64], strides = [1, 1]} : vector<8x256xf32> to vector<8x64xf32>
    %298 = math.tanh %297 : vector<8x64xf32>
    %299 = vector.extract_strided_slice %290 {offsets = [0, 192], sizes = [8, 64], strides = [1, 1]} : vector<8x256xf32> to vector<8x64xf32>
    %300 = arith.negf %299 : vector<8x64xf32>
    %301 = math.exp %300 : vector<8x64xf32>
    %cst_128 = arith.constant 1.000000e+00 : f32
    %302 = vector.broadcast %cst_128 : f32 to vector<8x64xf32>
    %303 = arith.addf %302, %301 : vector<8x64xf32>
    %304 = arith.divf %302, %303 : vector<8x64xf32>
    %305 = vector.extract_strided_slice %296 {offsets = [0, 0], sizes = [8, 64], strides = [1, 1]} : vector<8x128xf32> to vector<8x64xf32>
    %306 = vector.extract_strided_slice %296 {offsets = [0, 64], sizes = [8, 64], strides = [1, 1]} : vector<8x128xf32> to vector<8x64xf32>
    %307 = arith.mulf %306, %284 : vector<8x64xf32>
    %308 = arith.mulf %305, %298 : vector<8x64xf32>
    %309 = arith.addf %307, %308 : vector<8x64xf32>
    %310 = math.tanh %309 : vector<8x64xf32>
    %311 = arith.mulf %304, %310 : vector<8x64xf32>
    %312 = vector.extract_strided_slice %311 {offsets = [0, 0], sizes = [8, 32], strides = [1, 1]} : vector<8x64xf32> to vector<8x32xf32>
    %c0_129 = arith.constant 0 : index
    %c0_130 = arith.constant 0 : index
    %313 = vector.load %arg11[%c0_129, %c0_130] : memref<64x64xf32, #tpu.memory_space<vmem>>, vector<8x32xf32>
    tpu.vector_store %arg11[%c0_129, %c0_130], %312 {strides = array<i32>} : memref<64x64xf32, #tpu.memory_space<vmem>>, vector<8x32xf32>,
    %314 = vector.extract_strided_slice %311 {offsets = [0, 32], sizes = [8, 32], strides = [1, 1]} : vector<8x64xf32> to vector<8x32xf32>
    %c56_131 = arith.constant 56 : index
    %c32_132 = arith.constant 32 : index
    %315 = vector.load %arg11[%c56_131, %c32_132] : memref<64x64xf32, #tpu.memory_space<vmem>>, vector<8x32xf32>
    tpu.vector_store %arg11[%c56_131, %c32_132], %314 {strides = array<i32>} : memref<64x64xf32, #tpu.memory_space<vmem>>, vector<8x32xf32>,
    %c8_133 = arith.constant 8 : index
    %c0_134 = arith.constant 0 : index
    %316 = vector.load %arg10[%c8_133, %c0_134] : memref<64x256xf32, #tpu.memory_space<vmem>>, vector<8x256xf32>
    %c48_135 = arith.constant 48 : index
    %c0_136 = arith.constant 0 : index
    %317 = vector.load %arg10[%c48_135, %c0_136] : memref<64x256xf32, #tpu.memory_space<vmem>>, vector<8x256xf32>
    %318 = arith.select %18, %316, %317 : vector<8x256xi1>, vector<8x256xf32>
    %c0_137 = arith.constant 0 : index
    %c0_138 = arith.constant 0 : index
    %319 = vector.load %arg5[%c0_137, %c0_138] : memref<64x256xf32, #tpu.memory_space<vmem>>, vector<64x256xf32>
    %cst_139 = arith.constant dense<0.000000e+00> : vector<8x256xf32>
    %320 = tpu.matmul %311, %319, %cst_139 {dimension_numbers = #tpu.dot_dimension_numbers<[1], [0], [0], [1], [0, 0, 1, 1], [], []>} : vector<8x64xf32>, vector<64x256xf32>, vector<8x256xf32> -> vector<8x256xf32>
    %321 = arith.addf %318, %320 : vector<8x256xf32>
    %322 = vector.extract_strided_slice %321 {offsets = [0, 0], sizes = [8, 128], strides = [1, 1]} : vector<8x256xf32> to vector<8x128xf32>
    %323 = arith.negf %322 : vector<8x128xf32>
    %324 = math.exp %323 : vector<8x128xf32>
    %cst_140 = arith.constant 1.000000e+00 : f32
    %325 = vector.broadcast %cst_140 : f32 to vector<8x128xf32>
    %326 = arith.addf %325, %324 : vector<8x128xf32>
    %327 = arith.divf %325, %326 : vector<8x128xf32>
    %328 = vector.extract_strided_slice %321 {offsets = [0, 128], sizes = [8, 64], strides = [1, 1]} : vector<8x256xf32> to vector<8x64xf32>
    %329 = math.tanh %328 : vector<8x64xf32>
    %330 = vector.extract_strided_slice %321 {offsets = [0, 192], sizes = [8, 64], strides = [1, 1]} : vector<8x256xf32> to vector<8x64xf32>
    %331 = arith.negf %330 : vector<8x64xf32>
    %332 = math.exp %331 : vector<8x64xf32>
    %cst_141 = arith.constant 1.000000e+00 : f32
    %333 = vector.broadcast %cst_141 : f32 to vector<8x64xf32>
    %334 = arith.addf %333, %332 : vector<8x64xf32>
    %335 = arith.divf %333, %334 : vector<8x64xf32>
    %336 = vector.extract_strided_slice %327 {offsets = [0, 0], sizes = [8, 64], strides = [1, 1]} : vector<8x128xf32> to vector<8x64xf32>
    %337 = vector.extract_strided_slice %327 {offsets = [0, 64], sizes = [8, 64], strides = [1, 1]} : vector<8x128xf32> to vector<8x64xf32>
    %338 = arith.mulf %337, %309 : vector<8x64xf32>
    %339 = arith.mulf %336, %329 : vector<8x64xf32>
    %340 = arith.addf %338, %339 : vector<8x64xf32>
    %341 = math.tanh %340 : vector<8x64xf32>
    %342 = arith.mulf %335, %341 : vector<8x64xf32>
    %343 = vector.extract_strided_slice %342 {offsets = [0, 0], sizes = [8, 32], strides = [1, 1]} : vector<8x64xf32> to vector<8x32xf32>
    %c8_142 = arith.constant 8 : index
    %c0_143 = arith.constant 0 : index
    %344 = vector.load %arg11[%c8_142, %c0_143] : memref<64x64xf32, #tpu.memory_space<vmem>>, vector<8x32xf32>
    tpu.vector_store %arg11[%c8_142, %c0_143], %343 {strides = array<i32>} : memref<64x64xf32, #tpu.memory_space<vmem>>, vector<8x32xf32>,
    %345 = vector.extract_strided_slice %342 {offsets = [0, 32], sizes = [8, 32], strides = [1, 1]} : vector<8x64xf32> to vector<8x32xf32>
    %c48_144 = arith.constant 48 : index
    %c32_145 = arith.constant 32 : index
    %346 = vector.load %arg11[%c48_144, %c32_145] : memref<64x64xf32, #tpu.memory_space<vmem>>, vector<8x32xf32>
    tpu.vector_store %arg11[%c48_144, %c32_145], %345 {strides = array<i32>} : memref<64x64xf32, #tpu.memory_space<vmem>>, vector<8x32xf32>,
    %c16_146 = arith.constant 16 : index
    %c0_147 = arith.constant 0 : index
    %347 = vector.load %arg10[%c16_146, %c0_147] : memref<64x256xf32, #tpu.memory_space<vmem>>, vector<8x256xf32>
    %c40_148 = arith.constant 40 : index
    %c0_149 = arith.constant 0 : index
    %348 = vector.load %arg10[%c40_148, %c0_149] : memref<64x256xf32, #tpu.memory_space<vmem>>, vector<8x256xf32>
    %349 = arith.select %18, %347, %348 : vector<8x256xi1>, vector<8x256xf32>
    %c0_150 = arith.constant 0 : index
    %c0_151 = arith.constant 0 : index
    %350 = vector.load %arg5[%c0_150, %c0_151] : memref<64x256xf32, #tpu.memory_space<vmem>>, vector<64x256xf32>
    %cst_152 = arith.constant dense<0.000000e+00> : vector<8x256xf32>
    %351 = tpu.matmul %342, %350, %cst_152 {dimension_numbers = #tpu.dot_dimension_numbers<[1], [0], [0], [1], [0, 0, 1, 1], [], []>} : vector<8x64xf32>, vector<64x256xf32>, vector<8x256xf32> -> vector<8x256xf32>
    %352 = arith.addf %349, %351 : vector<8x256xf32>
    %353 = vector.extract_strided_slice %352 {offsets = [0, 0], sizes = [8, 128], strides = [1, 1]} : vector<8x256xf32> to vector<8x128xf32>
    %354 = arith.negf %353 : vector<8x128xf32>
    %355 = math.exp %354 : vector<8x128xf32>
    %cst_153 = arith.constant 1.000000e+00 : f32
    %356 = vector.broadcast %cst_153 : f32 to vector<8x128xf32>
    %357 = arith.addf %356, %355 : vector<8x128xf32>
    %358 = arith.divf %356, %357 : vector<8x128xf32>
    %359 = vector.extract_strided_slice %352 {offsets = [0, 128], sizes = [8, 64], strides = [1, 1]} : vector<8x256xf32> to vector<8x64xf32>
    %360 = math.tanh %359 : vector<8x64xf32>
    %361 = vector.extract_strided_slice %352 {offsets = [0, 192], sizes = [8, 64], strides = [1, 1]} : vector<8x256xf32> to vector<8x64xf32>
    %362 = arith.negf %361 : vector<8x64xf32>
    %363 = math.exp %362 : vector<8x64xf32>
    %cst_154 = arith.constant 1.000000e+00 : f32
    %364 = vector.broadcast %cst_154 : f32 to vector<8x64xf32>
    %365 = arith.addf %364, %363 : vector<8x64xf32>
    %366 = arith.divf %364, %365 : vector<8x64xf32>
    %367 = vector.extract_strided_slice %358 {offsets = [0, 0], sizes = [8, 64], strides = [1, 1]} : vector<8x128xf32> to vector<8x64xf32>
    %368 = vector.extract_strided_slice %358 {offsets = [0, 64], sizes = [8, 64], strides = [1, 1]} : vector<8x128xf32> to vector<8x64xf32>
    %369 = arith.mulf %368, %340 : vector<8x64xf32>
    %370 = arith.mulf %367, %360 : vector<8x64xf32>
    %371 = arith.addf %369, %370 : vector<8x64xf32>
    %372 = math.tanh %371 : vector<8x64xf32>
    %373 = arith.mulf %366, %372 : vector<8x64xf32>
    %374 = vector.extract_strided_slice %373 {offsets = [0, 0], sizes = [8, 32], strides = [1, 1]} : vector<8x64xf32> to vector<8x32xf32>
    %c16_155 = arith.constant 16 : index
    %c0_156 = arith.constant 0 : index
    %375 = vector.load %arg11[%c16_155, %c0_156] : memref<64x64xf32, #tpu.memory_space<vmem>>, vector<8x32xf32>
    tpu.vector_store %arg11[%c16_155, %c0_156], %374 {strides = array<i32>} : memref<64x64xf32, #tpu.memory_space<vmem>>, vector<8x32xf32>,
    %376 = vector.extract_strided_slice %373 {offsets = [0, 32], sizes = [8, 32], strides = [1, 1]} : vector<8x64xf32> to vector<8x32xf32>
    %c40_157 = arith.constant 40 : index
    %c32_158 = arith.constant 32 : index
    %377 = vector.load %arg11[%c40_157, %c32_158] : memref<64x64xf32, #tpu.memory_space<vmem>>, vector<8x32xf32>
    tpu.vector_store %arg11[%c40_157, %c32_158], %376 {strides = array<i32>} : memref<64x64xf32, #tpu.memory_space<vmem>>, vector<8x32xf32>,
    %c24_159 = arith.constant 24 : index
    %c0_160 = arith.constant 0 : index
    %378 = vector.load %arg10[%c24_159, %c0_160] : memref<64x256xf32, #tpu.memory_space<vmem>>, vector<8x256xf32>
    %c32_161 = arith.constant 32 : index
    %c0_162 = arith.constant 0 : index
    %379 = vector.load %arg10[%c32_161, %c0_162] : memref<64x256xf32, #tpu.memory_space<vmem>>, vector<8x256xf32>
    %380 = arith.select %18, %378, %379 : vector<8x256xi1>, vector<8x256xf32>
    %c0_163 = arith.constant 0 : index
    %c0_164 = arith.constant 0 : index
    %381 = vector.load %arg5[%c0_163, %c0_164] : memref<64x256xf32, #tpu.memory_space<vmem>>, vector<64x256xf32>
    %cst_165 = arith.constant dense<0.000000e+00> : vector<8x256xf32>
    %382 = tpu.matmul %373, %381, %cst_165 {dimension_numbers = #tpu.dot_dimension_numbers<[1], [0], [0], [1], [0, 0, 1, 1], [], []>} : vector<8x64xf32>, vector<64x256xf32>, vector<8x256xf32> -> vector<8x256xf32>
    %383 = arith.addf %380, %382 : vector<8x256xf32>
    %384 = vector.extract_strided_slice %383 {offsets = [0, 0], sizes = [8, 128], strides = [1, 1]} : vector<8x256xf32> to vector<8x128xf32>
    %385 = arith.negf %384 : vector<8x128xf32>
    %386 = math.exp %385 : vector<8x128xf32>
    %cst_166 = arith.constant 1.000000e+00 : f32
    %387 = vector.broadcast %cst_166 : f32 to vector<8x128xf32>
    %388 = arith.addf %387, %386 : vector<8x128xf32>
    %389 = arith.divf %387, %388 : vector<8x128xf32>
    %390 = vector.extract_strided_slice %383 {offsets = [0, 128], sizes = [8, 64], strides = [1, 1]} : vector<8x256xf32> to vector<8x64xf32>
    %391 = math.tanh %390 : vector<8x64xf32>
    %392 = vector.extract_strided_slice %383 {offsets = [0, 192], sizes = [8, 64], strides = [1, 1]} : vector<8x256xf32> to vector<8x64xf32>
    %393 = arith.negf %392 : vector<8x64xf32>
    %394 = math.exp %393 : vector<8x64xf32>
    %cst_167 = arith.constant 1.000000e+00 : f32
    %395 = vector.broadcast %cst_167 : f32 to vector<8x64xf32>
    %396 = arith.addf %395, %394 : vector<8x64xf32>
    %397 = arith.divf %395, %396 : vector<8x64xf32>
    %398 = vector.extract_strided_slice %389 {offsets = [0, 0], sizes = [8, 64], strides = [1, 1]} : vector<8x128xf32> to vector<8x64xf32>
    %399 = vector.extract_strided_slice %389 {offsets = [0, 64], sizes = [8, 64], strides = [1, 1]} : vector<8x128xf32> to vector<8x64xf32>
    %400 = arith.mulf %399, %371 : vector<8x64xf32>
    %401 = arith.mulf %398, %391 : vector<8x64xf32>
    %402 = arith.addf %400, %401 : vector<8x64xf32>
    %403 = math.tanh %402 : vector<8x64xf32>
    %404 = arith.mulf %397, %403 : vector<8x64xf32>
    %405 = vector.extract_strided_slice %404 {offsets = [0, 0], sizes = [8, 32], strides = [1, 1]} : vector<8x64xf32> to vector<8x32xf32>
    %c24_168 = arith.constant 24 : index
    %c0_169 = arith.constant 0 : index
    %406 = vector.load %arg11[%c24_168, %c0_169] : memref<64x64xf32, #tpu.memory_space<vmem>>, vector<8x32xf32>
    tpu.vector_store %arg11[%c24_168, %c0_169], %405 {strides = array<i32>} : memref<64x64xf32, #tpu.memory_space<vmem>>, vector<8x32xf32>,
    %407 = vector.extract_strided_slice %404 {offsets = [0, 32], sizes = [8, 32], strides = [1, 1]} : vector<8x64xf32> to vector<8x32xf32>
    %c32_170 = arith.constant 32 : index
    %c32_171 = arith.constant 32 : index
    %408 = vector.load %arg11[%c32_170, %c32_171] : memref<64x64xf32, #tpu.memory_space<vmem>>, vector<8x32xf32>
    tpu.vector_store %arg11[%c32_170, %c32_171], %407 {strides = array<i32>} : memref<64x64xf32, #tpu.memory_space<vmem>>, vector<8x32xf32>,
    %c32_172 = arith.constant 32 : index
    %c0_173 = arith.constant 0 : index
    %409 = vector.load %arg10[%c32_172, %c0_173] : memref<64x256xf32, #tpu.memory_space<vmem>>, vector<8x256xf32>
    %c24_174 = arith.constant 24 : index
    %c0_175 = arith.constant 0 : index
    %410 = vector.load %arg10[%c24_174, %c0_175] : memref<64x256xf32, #tpu.memory_space<vmem>>, vector<8x256xf32>
    %411 = arith.select %18, %409, %410 : vector<8x256xi1>, vector<8x256xf32>
    %c0_176 = arith.constant 0 : index
    %c0_177 = arith.constant 0 : index
    %412 = vector.load %arg5[%c0_176, %c0_177] : memref<64x256xf32, #tpu.memory_space<vmem>>, vector<64x256xf32>
    %cst_178 = arith.constant dense<0.000000e+00> : vector<8x256xf32>
    %413 = tpu.matmul %404, %412, %cst_178 {dimension_numbers = #tpu.dot_dimension_numbers<[1], [0], [0], [1], [0, 0, 1, 1], [], []>} : vector<8x64xf32>, vector<64x256xf32>, vector<8x256xf32> -> vector<8x256xf32>
    %414 = arith.addf %411, %413 : vector<8x256xf32>
    %415 = vector.extract_strided_slice %414 {offsets = [0, 0], sizes = [8, 128], strides = [1, 1]} : vector<8x256xf32> to vector<8x128xf32>
    %416 = arith.negf %415 : vector<8x128xf32>
    %417 = math.exp %416 : vector<8x128xf32>
    %cst_179 = arith.constant 1.000000e+00 : f32
    %418 = vector.broadcast %cst_179 : f32 to vector<8x128xf32>
    %419 = arith.addf %418, %417 : vector<8x128xf32>
    %420 = arith.divf %418, %419 : vector<8x128xf32>
    %421 = vector.extract_strided_slice %414 {offsets = [0, 128], sizes = [8, 64], strides = [1, 1]} : vector<8x256xf32> to vector<8x64xf32>
    %422 = math.tanh %421 : vector<8x64xf32>
    %423 = vector.extract_strided_slice %414 {offsets = [0, 192], sizes = [8, 64], strides = [1, 1]} : vector<8x256xf32> to vector<8x64xf32>
    %424 = arith.negf %423 : vector<8x64xf32>
    %425 = math.exp %424 : vector<8x64xf32>
    %cst_180 = arith.constant 1.000000e+00 : f32
    %426 = vector.broadcast %cst_180 : f32 to vector<8x64xf32>
    %427 = arith.addf %426, %425 : vector<8x64xf32>
    %428 = arith.divf %426, %427 : vector<8x64xf32>
    %429 = vector.extract_strided_slice %420 {offsets = [0, 0], sizes = [8, 64], strides = [1, 1]} : vector<8x128xf32> to vector<8x64xf32>
    %430 = vector.extract_strided_slice %420 {offsets = [0, 64], sizes = [8, 64], strides = [1, 1]} : vector<8x128xf32> to vector<8x64xf32>
    %431 = arith.mulf %430, %402 : vector<8x64xf32>
    %432 = arith.mulf %429, %422 : vector<8x64xf32>
    %433 = arith.addf %431, %432 : vector<8x64xf32>
    %434 = math.tanh %433 : vector<8x64xf32>
    %435 = arith.mulf %428, %434 : vector<8x64xf32>
    %436 = vector.extract_strided_slice %435 {offsets = [0, 0], sizes = [8, 32], strides = [1, 1]} : vector<8x64xf32> to vector<8x32xf32>
    %c32_181 = arith.constant 32 : index
    %c0_182 = arith.constant 0 : index
    %437 = vector.load %arg11[%c32_181, %c0_182] : memref<64x64xf32, #tpu.memory_space<vmem>>, vector<8x32xf32>
    tpu.vector_store %arg11[%c32_181, %c0_182], %436 {strides = array<i32>} : memref<64x64xf32, #tpu.memory_space<vmem>>, vector<8x32xf32>,
    %438 = vector.extract_strided_slice %435 {offsets = [0, 32], sizes = [8, 32], strides = [1, 1]} : vector<8x64xf32> to vector<8x32xf32>
    %c24_183 = arith.constant 24 : index
    %c32_184 = arith.constant 32 : index
    %439 = vector.load %arg11[%c24_183, %c32_184] : memref<64x64xf32, #tpu.memory_space<vmem>>, vector<8x32xf32>
    tpu.vector_store %arg11[%c24_183, %c32_184], %438 {strides = array<i32>} : memref<64x64xf32, #tpu.memory_space<vmem>>, vector<8x32xf32>,
    %c40_185 = arith.constant 40 : index
    %c0_186 = arith.constant 0 : index
    %440 = vector.load %arg10[%c40_185, %c0_186] : memref<64x256xf32, #tpu.memory_space<vmem>>, vector<8x256xf32>
    %c16_187 = arith.constant 16 : index
    %c0_188 = arith.constant 0 : index
    %441 = vector.load %arg10[%c16_187, %c0_188] : memref<64x256xf32, #tpu.memory_space<vmem>>, vector<8x256xf32>
    %442 = arith.select %18, %440, %441 : vector<8x256xi1>, vector<8x256xf32>
    %c0_189 = arith.constant 0 : index
    %c0_190 = arith.constant 0 : index
    %443 = vector.load %arg5[%c0_189, %c0_190] : memref<64x256xf32, #tpu.memory_space<vmem>>, vector<64x256xf32>
    %cst_191 = arith.constant dense<0.000000e+00> : vector<8x256xf32>
    %444 = tpu.matmul %435, %443, %cst_191 {dimension_numbers = #tpu.dot_dimension_numbers<[1], [0], [0], [1], [0, 0, 1, 1], [], []>} : vector<8x64xf32>, vector<64x256xf32>, vector<8x256xf32> -> vector<8x256xf32>
    %445 = arith.addf %442, %444 : vector<8x256xf32>
    %446 = vector.extract_strided_slice %445 {offsets = [0, 0], sizes = [8, 128], strides = [1, 1]} : vector<8x256xf32> to vector<8x128xf32>
    %447 = arith.negf %446 : vector<8x128xf32>
    %448 = math.exp %447 : vector<8x128xf32>
    %cst_192 = arith.constant 1.000000e+00 : f32
    %449 = vector.broadcast %cst_192 : f32 to vector<8x128xf32>
    %450 = arith.addf %449, %448 : vector<8x128xf32>
    %451 = arith.divf %449, %450 : vector<8x128xf32>
    %452 = vector.extract_strided_slice %445 {offsets = [0, 128], sizes = [8, 64], strides = [1, 1]} : vector<8x256xf32> to vector<8x64xf32>
    %453 = math.tanh %452 : vector<8x64xf32>
    %454 = vector.extract_strided_slice %445 {offsets = [0, 192], sizes = [8, 64], strides = [1, 1]} : vector<8x256xf32> to vector<8x64xf32>
    %455 = arith.negf %454 : vector<8x64xf32>
    %456 = math.exp %455 : vector<8x64xf32>
    %cst_193 = arith.constant 1.000000e+00 : f32
    %457 = vector.broadcast %cst_193 : f32 to vector<8x64xf32>
    %458 = arith.addf %457, %456 : vector<8x64xf32>
    %459 = arith.divf %457, %458 : vector<8x64xf32>
    %460 = vector.extract_strided_slice %451 {offsets = [0, 0], sizes = [8, 64], strides = [1, 1]} : vector<8x128xf32> to vector<8x64xf32>
    %461 = vector.extract_strided_slice %451 {offsets = [0, 64], sizes = [8, 64], strides = [1, 1]} : vector<8x128xf32> to vector<8x64xf32>
    %462 = arith.mulf %461, %433 : vector<8x64xf32>
    %463 = arith.mulf %460, %453 : vector<8x64xf32>
    %464 = arith.addf %462, %463 : vector<8x64xf32>
    %465 = math.tanh %464 : vector<8x64xf32>
    %466 = arith.mulf %459, %465 : vector<8x64xf32>
    %467 = vector.extract_strided_slice %466 {offsets = [0, 0], sizes = [8, 32], strides = [1, 1]} : vector<8x64xf32> to vector<8x32xf32>
    %c40_194 = arith.constant 40 : index
    %c0_195 = arith.constant 0 : index
    %468 = vector.load %arg11[%c40_194, %c0_195] : memref<64x64xf32, #tpu.memory_space<vmem>>, vector<8x32xf32>
    tpu.vector_store %arg11[%c40_194, %c0_195], %467 {strides = array<i32>} : memref<64x64xf32, #tpu.memory_space<vmem>>, vector<8x32xf32>,
    %469 = vector.extract_strided_slice %466 {offsets = [0, 32], sizes = [8, 32], strides = [1, 1]} : vector<8x64xf32> to vector<8x32xf32>
    %c16_196 = arith.constant 16 : index
    %c32_197 = arith.constant 32 : index
    %470 = vector.load %arg11[%c16_196, %c32_197] : memref<64x64xf32, #tpu.memory_space<vmem>>, vector<8x32xf32>
    tpu.vector_store %arg11[%c16_196, %c32_197], %469 {strides = array<i32>} : memref<64x64xf32, #tpu.memory_space<vmem>>, vector<8x32xf32>,
    %c48_198 = arith.constant 48 : index
    %c0_199 = arith.constant 0 : index
    %471 = vector.load %arg10[%c48_198, %c0_199] : memref<64x256xf32, #tpu.memory_space<vmem>>, vector<8x256xf32>
    %c8_200 = arith.constant 8 : index
    %c0_201 = arith.constant 0 : index
    %472 = vector.load %arg10[%c8_200, %c0_201] : memref<64x256xf32, #tpu.memory_space<vmem>>, vector<8x256xf32>
    %473 = arith.select %18, %471, %472 : vector<8x256xi1>, vector<8x256xf32>
    %c0_202 = arith.constant 0 : index
    %c0_203 = arith.constant 0 : index
    %474 = vector.load %arg5[%c0_202, %c0_203] : memref<64x256xf32, #tpu.memory_space<vmem>>, vector<64x256xf32>
    %cst_204 = arith.constant dense<0.000000e+00> : vector<8x256xf32>
    %475 = tpu.matmul %466, %474, %cst_204 {dimension_numbers = #tpu.dot_dimension_numbers<[1], [0], [0], [1], [0, 0, 1, 1], [], []>} : vector<8x64xf32>, vector<64x256xf32>, vector<8x256xf32> -> vector<8x256xf32>
    %476 = arith.addf %473, %475 : vector<8x256xf32>
    %477 = vector.extract_strided_slice %476 {offsets = [0, 0], sizes = [8, 128], strides = [1, 1]} : vector<8x256xf32> to vector<8x128xf32>
    %478 = arith.negf %477 : vector<8x128xf32>
    %479 = math.exp %478 : vector<8x128xf32>
    %cst_205 = arith.constant 1.000000e+00 : f32
    %480 = vector.broadcast %cst_205 : f32 to vector<8x128xf32>
    %481 = arith.addf %480, %479 : vector<8x128xf32>
    %482 = arith.divf %480, %481 : vector<8x128xf32>
    %483 = vector.extract_strided_slice %476 {offsets = [0, 128], sizes = [8, 64], strides = [1, 1]} : vector<8x256xf32> to vector<8x64xf32>
    %484 = math.tanh %483 : vector<8x64xf32>
    %485 = vector.extract_strided_slice %476 {offsets = [0, 192], sizes = [8, 64], strides = [1, 1]} : vector<8x256xf32> to vector<8x64xf32>
    %486 = arith.negf %485 : vector<8x64xf32>
    %487 = math.exp %486 : vector<8x64xf32>
    %cst_206 = arith.constant 1.000000e+00 : f32
    %488 = vector.broadcast %cst_206 : f32 to vector<8x64xf32>
    %489 = arith.addf %488, %487 : vector<8x64xf32>
    %490 = arith.divf %488, %489 : vector<8x64xf32>
    %491 = vector.extract_strided_slice %482 {offsets = [0, 0], sizes = [8, 64], strides = [1, 1]} : vector<8x128xf32> to vector<8x64xf32>
    %492 = vector.extract_strided_slice %482 {offsets = [0, 64], sizes = [8, 64], strides = [1, 1]} : vector<8x128xf32> to vector<8x64xf32>
    %493 = arith.mulf %492, %464 : vector<8x64xf32>
    %494 = arith.mulf %491, %484 : vector<8x64xf32>
    %495 = arith.addf %493, %494 : vector<8x64xf32>
    %496 = math.tanh %495 : vector<8x64xf32>
    %497 = arith.mulf %490, %496 : vector<8x64xf32>
    %498 = vector.extract_strided_slice %497 {offsets = [0, 0], sizes = [8, 32], strides = [1, 1]} : vector<8x64xf32> to vector<8x32xf32>
    %c48_207 = arith.constant 48 : index
    %c0_208 = arith.constant 0 : index
    %499 = vector.load %arg11[%c48_207, %c0_208] : memref<64x64xf32, #tpu.memory_space<vmem>>, vector<8x32xf32>
    tpu.vector_store %arg11[%c48_207, %c0_208], %498 {strides = array<i32>} : memref<64x64xf32, #tpu.memory_space<vmem>>, vector<8x32xf32>,
    %500 = vector.extract_strided_slice %497 {offsets = [0, 32], sizes = [8, 32], strides = [1, 1]} : vector<8x64xf32> to vector<8x32xf32>
    %c8_209 = arith.constant 8 : index
    %c32_210 = arith.constant 32 : index
    %501 = vector.load %arg11[%c8_209, %c32_210] : memref<64x64xf32, #tpu.memory_space<vmem>>, vector<8x32xf32>
    tpu.vector_store %arg11[%c8_209, %c32_210], %500 {strides = array<i32>} : memref<64x64xf32, #tpu.memory_space<vmem>>, vector<8x32xf32>,
    %c56_211 = arith.constant 56 : index
    %c0_212 = arith.constant 0 : index
    %502 = vector.load %arg10[%c56_211, %c0_212] : memref<64x256xf32, #tpu.memory_space<vmem>>, vector<8x256xf32>
    %c0_213 = arith.constant 0 : index
    %c0_214 = arith.constant 0 : index
    %503 = vector.load %arg10[%c0_213, %c0_214] : memref<64x256xf32, #tpu.memory_space<vmem>>, vector<8x256xf32>
    %504 = arith.select %18, %502, %503 : vector<8x256xi1>, vector<8x256xf32>
    %c0_215 = arith.constant 0 : index
    %c0_216 = arith.constant 0 : index
    %505 = vector.load %arg5[%c0_215, %c0_216] : memref<64x256xf32, #tpu.memory_space<vmem>>, vector<64x256xf32>
    %cst_217 = arith.constant dense<0.000000e+00> : vector<8x256xf32>
    %506 = tpu.matmul %497, %505, %cst_217 {dimension_numbers = #tpu.dot_dimension_numbers<[1], [0], [0], [1], [0, 0, 1, 1], [], []>} : vector<8x64xf32>, vector<64x256xf32>, vector<8x256xf32> -> vector<8x256xf32>
    %507 = arith.addf %504, %506 : vector<8x256xf32>
    %508 = vector.extract_strided_slice %507 {offsets = [0, 0], sizes = [8, 128], strides = [1, 1]} : vector<8x256xf32> to vector<8x128xf32>
    %509 = arith.negf %508 : vector<8x128xf32>
    %510 = math.exp %509 : vector<8x128xf32>
    %cst_218 = arith.constant 1.000000e+00 : f32
    %511 = vector.broadcast %cst_218 : f32 to vector<8x128xf32>
    %512 = arith.addf %511, %510 : vector<8x128xf32>
    %513 = arith.divf %511, %512 : vector<8x128xf32>
    %514 = vector.extract_strided_slice %507 {offsets = [0, 128], sizes = [8, 64], strides = [1, 1]} : vector<8x256xf32> to vector<8x64xf32>
    %515 = math.tanh %514 : vector<8x64xf32>
    %516 = vector.extract_strided_slice %507 {offsets = [0, 192], sizes = [8, 64], strides = [1, 1]} : vector<8x256xf32> to vector<8x64xf32>
    %517 = arith.negf %516 : vector<8x64xf32>
    %518 = math.exp %517 : vector<8x64xf32>
    %cst_219 = arith.constant 1.000000e+00 : f32
    %519 = vector.broadcast %cst_219 : f32 to vector<8x64xf32>
    %520 = arith.addf %519, %518 : vector<8x64xf32>
    %521 = arith.divf %519, %520 : vector<8x64xf32>
    %522 = vector.extract_strided_slice %513 {offsets = [0, 0], sizes = [8, 64], strides = [1, 1]} : vector<8x128xf32> to vector<8x64xf32>
    %523 = vector.extract_strided_slice %513 {offsets = [0, 64], sizes = [8, 64], strides = [1, 1]} : vector<8x128xf32> to vector<8x64xf32>
    %524 = arith.mulf %523, %495 : vector<8x64xf32>
    %525 = arith.mulf %522, %515 : vector<8x64xf32>
    %526 = arith.addf %524, %525 : vector<8x64xf32>
    %527 = math.tanh %526 : vector<8x64xf32>
    %528 = arith.mulf %521, %527 : vector<8x64xf32>
    %529 = vector.extract_strided_slice %528 {offsets = [0, 0], sizes = [8, 32], strides = [1, 1]} : vector<8x64xf32> to vector<8x32xf32>
    %c56_220 = arith.constant 56 : index
    %c0_221 = arith.constant 0 : index
    %530 = vector.load %arg11[%c56_220, %c0_221] : memref<64x64xf32, #tpu.memory_space<vmem>>, vector<8x32xf32>
    tpu.vector_store %arg11[%c56_220, %c0_221], %529 {strides = array<i32>} : memref<64x64xf32, #tpu.memory_space<vmem>>, vector<8x32xf32>,
    %531 = vector.extract_strided_slice %528 {offsets = [0, 32], sizes = [8, 32], strides = [1, 1]} : vector<8x64xf32> to vector<8x32xf32>
    %c0_222 = arith.constant 0 : index
    %c32_223 = arith.constant 32 : index
    %532 = vector.load %arg11[%c0_222, %c32_223] : memref<64x64xf32, #tpu.memory_space<vmem>>, vector<8x32xf32>
    tpu.vector_store %arg11[%c0_222, %c32_223], %531 {strides = array<i32>} : memref<64x64xf32, #tpu.memory_space<vmem>>, vector<8x32xf32>,
    %c56_224 = arith.constant 56 : index
    %c0_225 = arith.constant 0 : index
    %533 = vector.load %arg11[%c56_224, %c0_225] : memref<64x64xf32, #tpu.memory_space<vmem>>, vector<8x64xf32>
    %c0_226 = arith.constant 0 : index
    %c0_227 = arith.constant 0 : index
    %534 = vector.load %arg7[%c0_226, %c0_227] : memref<1x64xf32, #tpu.memory_space<vmem>>, vector<1x64xf32>
    %535 = vector.broadcast %534 : vector<1x64xf32> to vector<8x64xf32>
    %536 = arith.mulf %533, %535 : vector<8x64xf32>
    %cst_228 = arith.constant dense<0.000000e+00> : vector<8xf32>
    %537 = vector.multi_reduction <add>, %536, %cst_228 [1] : vector<8x64xf32> to vector<8xf32>
    %538 = vector.shape_cast %537 : vector<8xf32> to vector<8x1xf32>
    %c0_229 = arith.constant 0 : index
    %c0_230 = arith.constant 0 : index
    %539 = vector.load %arg8[%c0_229, %c0_230] : memref<1x1xf32, #tpu.memory_space<vmem>>, vector<1x1xf32>
    %540 = vector.broadcast %539 : vector<1x1xf32> to vector<8x1xf32>
    %541 = arith.addf %538, %540 : vector<8x1xf32>
    %542 = arith.negf %541 : vector<8x1xf32>
    %543 = math.exp %542 : vector<8x1xf32>
    %cst_231 = arith.constant 1.000000e+00 : f32
    %544 = vector.broadcast %cst_231 : f32 to vector<8x1xf32>
    %545 = arith.addf %544, %543 : vector<8x1xf32>
    %546 = arith.divf %544, %545 : vector<8x1xf32>
    %c0_232 = arith.constant 0 : index
    %c0_233 = arith.constant 0 : index
    %547 = vector.load %arg9[%c0_232, %c0_233] : memref<8x1xf32, #tpu.memory_space<vmem>>, vector<8x1xf32>
    tpu.vector_store %arg9[%c0_232, %c0_233], %546 {strides = array<i32>} : memref<8x1xf32, #tpu.memory_space<vmem>>, vector<8x1xf32>,
    return
  }
}

</mosaic_0001>

<bundles_post_ra>
// kernel: lstm_sequence_forward.1
= control target key start
LH: loop header
LB: loop body
LE: loop exit
PB: predicated region body
PF: predicated region fallthrough
CT: control target
= control target key end

     0   :  { %s3639_s0 = inlined_call_operand.vmem [shape: f32[64,32], index: 0, kind: input, shape index: {}]   ;;  %s3640_s1 = inlined_call_operand.vmem [shape: f32[32,256], index: 1, kind: input, shape index: {}]   ;;  %s3641_s2 = inlined_call_operand.hbm [shape: f32[64,256], index: 2, kind: input, shape index: {}]   ;;  %s3642_s3 = inlined_call_operand.vmem [shape: f32[1,256], index: 3, kind: input, shape index: {}]   ;;  %s3643_s4 = inlined_call_operand.hbm [shape: f32[64,256], index: 4, kind: input, shape index: {}]   ;;  %s3644_s5 = inlined_call_operand.hbm [shape: f32[64,256], index: 5, kind: input, shape index: {}]   ;;  %s3645_s6 = inlined_call_operand.vmem [shape: f32[1,256], index: 6, kind: input, shape index: {}]   ;;  %s3646_s7 = inlined_call_operand.vmem [shape: f32[1,64], index: 7, kind: input, shape index: {}]   ;;  %s3647_s8 = inlined_call_operand.<no memory space> [shape: f32[1,1], index: 8, kind: input, shape index: {}]   ;;  %s3648_s9 = inlined_call_operand.vmem [shape: f32[8,1], index: 9, kind: output, shape index: {}]  }
   0x1   :  { %v14_v0 = vstv %s3647_s8 }
   0x2   :  { %15 = vst [vmem:[#allocation4] sm:$0x1] %v14_v0 }
   0x3   :  { %16 = vsyncpa [#allocation6], 0 }
   0x4   :  { %17 = vsyncpa [#allocation8], 0  ;;  %s41_s13 = sshll.u32 %s3643_s4, 4  ;;  %s2743_s14 = smov [#allocation7]   ;;  %s42_s13 = int_to_ptr.hbm [resolvable:$true] %s41_s13 }
   0x5   :  { %s43_s15 = sshll.u32 %s2743_s14, 4  ;;  %s26_s18 = sshll.u32 %s3641_s2, 4  ;;  %s44_s15 = int_to_ptr.vmem [resolvable:$true] %s43_s15  ;;  %s27_s18 = int_to_ptr.hbm [resolvable:$true] %s26_s18 }
   0x6   :  { %s2744_s19 = smov 256   ;;  %s2745_s20 = smov 16  }
   0x7   :  { %49 = dma.hbm_to_vmem [thread:$0]  %s42_s13, 2048, %s44_s15, [#allocation8], %s2744_s19, %s2744_s19, %s2745_s20  }
   0x8   :  { %s2746_s8 = smov [#allocation5]   ;;  %s54_s24 = sshll.u32 %s3644_s5, 4  ;;  %s55_s24 = int_to_ptr.hbm [resolvable:$true] %s54_s24 }
   0x9   :  { %s28_s21 = sshll.u32 %s2746_s8, 4  ;;  %s2747_s4 = smov [#allocation9]   ;;  %s29_s21 = int_to_ptr.vmem [resolvable:$true] %s28_s21 }
   0xa   :  { %34 = dma.hbm_to_vmem [thread:$0]  %s27_s18, 2048, %s29_s21, [#allocation6], %s2744_s19, %s2744_s19, %s2745_s20  }
   0xb   :  { %s56_s25 = sshll.u32 %s2747_s4, 4  ;;  %s57_s25 = int_to_ptr.vmem [resolvable:$true] %s56_s25 }
   0xc   :  { %62 = dma.hbm_to_vmem [thread:$0]  %s55_s24, 2048, %s57_s25, [#allocation8], %s2744_s19, %s2744_s19, %s2745_s20  }
   0xd   :  { %2739 = dma.done.wait [#allocation6], 2048  }
   0xe   :  { %2740 = vsyncadd [#allocation6], 4294965248 }
   0xf   :  { %2741 = dma.done.wait [#allocation8], 4096  }
  0x10   :  { %2742 = vsyncadd [#allocation8], 4294963200  ;;  %v124_v1 = vld [vmem:[%s3640_s1 + $0x30] sm:$0xff]  ;;  %v125_v2 = vld [vmem:[%s3640_s1 + $0x38] sm:$0xff]  ;;  %vm132_vm0 = vcmask 261120   ;;  %v3649_v29 = vmov 0.0   ;;  %v81_v47 = vlaneseq }
  0x11   :  { %v122_v3 = vld [vmem:[%s3640_s1 + $0x20] sm:$0xff]  ;;  %169 = vmatpush.msra.mxu0 %v124_v1  ;;  %210 = vmatpush.msra.mxu1 %v125_v2  ;;  %v123_v4 = vld [vmem:[%s3640_s1 + $0x28] sm:$0xff]  ;;  %v120_v5 = vld [vmem:[%s3640_s1 + $0x10] sm:$0xff]  ;;  %vm277_vm11 = vcmask 523264   ;;  %vm376_vm12 = vcmask 523520  }
  0x12   :  { %v121_v6 = vld [vmem:[%s3640_s1 + $0x18] sm:$0xff]  ;;  %v118_v7 = vld [vmem:[%s3640_s1] sm:$0xff]  ;;  %v119_v8 = vld [vmem:[%s3640_s1 + $0x8] sm:$0xff]  ;;  %v82_v50 = vand.u32 127, %v81_v47 }
  0x13   :  { %170 = vmatpush.msra.mxu0 %v122_v3  ;;  %211 = vmatpush.msra.mxu1 %v123_v4  ;;  %v110_v9 = vld [vmem:[%s3639_s0] sm:$0xff]  ;;  %v2841_v10 = vld [vmem:[#allocation5 + $0x70] sm:$0xff]  ;;  %v111_v12 = vld [vmem:[%s3639_s0 + $0x8] sm:$0xff] }
  0x14   :  { %v2843_v11 = vld [vmem:[#allocation5 + $0x78] sm:$0xff]  ;;  %289 = vmatpush.msra.mxu2 %v2841_v10  ;;  %v2852_v13 = vld [vmem:[#allocation5 + $0x60] sm:$0xff]  ;;  %v2854_v14 = vld [vmem:[#allocation5 + $0x68] sm:$0xff]  ;;  %v83_v53 = vadd.s32 128, %v82_v50  ;;  %v88_v54 = vand.u32 63, %v82_v50 }
  0x15   :  { %171 = vmatpush.msra.mxu0 %v120_v5  ;;  %212 = vmatpush.msra.mxu1 %v121_v6  ;;  %v2858_v15 = vld [vmem:[#allocation5 + $0x50] sm:$0xff]  ;;  %v2860_v16 = vld [vmem:[#allocation5 + $0x58] sm:$0xff]  ;;  %v2864_v17 = vld [vmem:[#allocation5 + $0x40] sm:$0xff] }
  0x16   :  { %309 = vmatpush.msra.mxu3 %v2843_v11  ;;  %290 = vmatpush.msra.mxu2 %v2852_v13  ;;  %v2866_v18 = vld [vmem:[#allocation5 + $0x48] sm:$0xff]  ;;  %v2872_v19 = vld [vmem:[#allocation5 + $0x30] sm:$0xff]  ;;  %v2874_v20 = vld [vmem:[#allocation5 + $0x38] sm:$0xff]  ;;  %v95_v55 = vand.u32 63, %v83_v53  ;;  %vm2989_vm1 = vcmp.lt.s32.totalorder %v88_v54, 32 }
  0x17   :  { %172 = vmatpush.msra.mxu0 %v118_v7  ;;  %213 = vmatpush.msra.mxu1 %v119_v8  ;;  %v112_v21 = vld [vmem:[%s3639_s0 + $0x10] sm:$0xff]  ;;  %v2887_v22 = vld [vmem:[#allocation5 + $0x20] sm:$0xff]  ;;  %v2895_v25 = vld [vmem:[#allocation5 + $0x18] sm:$0xff] }
  0x18   :  { %2369 = vmatmul.msk.f32.vlgmr.msra.gmra.mxu0 %vm132_vm0, %v110_v9  ;;  %2377 = vmatmul.msk.f32.vlgmr.msra.gmra.mxu1 %vm132_vm0, %v110_v9  ;;  %v2889_v23 = vld [vmem:[#allocation5 + $0x28] sm:$0xff]  ;;  %v2893_v24 = vld [vmem:[#allocation5 + $0x10] sm:$0xff]  ;;  %v2899_v26 = vld [vmem:[#allocation5] sm:$0xff]  ;;  %vm2997_vm2 = vcmp.lt.s32.totalorder %v95_v55, 32 }
  0x19   :  { %770 = vmatpush.msrb.mxu0 %v2841_v10  ;;  %790 = vmatpush.msrb.mxu1 %v2843_v11  ;;  %v2901_v27 = vld [vmem:[#allocation5 + $0x8] sm:$0xff]  ;;  %v113_v28 = vld [vmem:[%s3639_s0 + $0x18] sm:$0xff]  ;;  %v114_v30 = vld [vmem:[%s3639_s0 + $0x20] sm:$0xff] }
  0x1a   :  { %310 = vmatpush.msra.mxu3 %v2854_v14  ;;  %291 = vmatpush.msra.mxu2 %v2858_v15  ;;  %v115_v31 = vld [vmem:[%s3639_s0 + $0x28] sm:$0xff]  ;;  %v116_v32 = vld [vmem:[%s3639_s0 + $0x30] sm:$0xff]  ;;  %v117_v33 = vld [vmem:[%s3639_s0 + $0x38] sm:$0xff]  ;;  %s2749_s0 = smov 64  }
  0x1b   :  { %771 = vmatpush.msrb.mxu0 %v2852_v13  ;;  %791 = vmatpush.msrb.mxu1 %v2854_v14  ;;  %v126_v36 = vld [vmem:[%s3642_s3] sm:$0x3] }
  0x1c   :  { %311 = vmatpush.msra.mxu3 %v2860_v16  ;;  %292 = vmatpush.msra.mxu2 %v2864_v17  ;;  %v128_v37 = vperm.slane %v126_v36, 0  ;;  %v129_v38 = vperm.slane %v126_v36, 1 }
  0x1d   :  { %772 = vmatpush.msrb.mxu0 %v2858_v15  ;;  %792 = vmatpush.msrb.mxu1 %v2860_v16 }
  0x1e   :  { %312 = vmatpush.msra.mxu3 %v2866_v18  ;;  %293 = vmatpush.msra.mxu2 %v2872_v19 }
  0x1f   :  { %773 = vmatpush.msrb.mxu0 %v2864_v17  ;;  %793 = vmatpush.msrb.mxu1 %v2866_v18 }
  0x20   :  { %2370 = vmatmul.msk.f32.gmra.mxu0 %vm132_vm0, %v111_v12  ;;  %2378 = vmatmul.msk.f32.gmra.mxu1 %vm132_vm0, %v111_v12 }
  0x21   :  { %313 = vmatpush.msra.mxu3 %v2874_v20  ;;  %294 = vmatpush.msra.mxu2 %v2887_v22 }
  0x22   :  { %774 = vmatpush.msrb.mxu0 %v2872_v19  ;;  %794 = vmatpush.msrb.mxu1 %v2874_v20 }
  0x23   :  { %314 = vmatpush.msra.mxu3 %v2889_v23  ;;  %295 = vmatpush.msra.mxu2 %v2893_v24 }
  0x24   :  { %775 = vmatpush.msrb.mxu0 %v2887_v22  ;;  %795 = vmatpush.msrb.mxu1 %v2889_v23 }
  0x25   :  { %315 = vmatpush.msra.mxu3 %v2895_v25  ;;  %296 = vmatpush.msra.mxu2 %v2899_v26 }
  0x26   :  { %297 = vmatmul.f32.vlgmr.msra.gmra.mxu2 %v3649_v29  ;;  %776 = vmatpush.msrb.mxu0 %v2893_v24 }
  0x27   :  { %316 = vmatpush.msra.mxu3 %v2901_v27  ;;  %410 = vmatpush.msrb.mxu2 %v2841_v10 }
  0x28   :  { %2371 = vmatmul.msk.f32.gmra.mxu0 %vm132_vm0, %v112_v21  ;;  %2379 = vmatmul.msk.f32.gmra.mxu1 %vm132_vm0, %v112_v21 }
  0x29   :  { %317 = vmatmul.f32.vlgmr.msra.gmra.mxu3 %v3649_v29  ;;  %411 = vmatpush.msrb.mxu2 %v2852_v13 }
  0x2a   :  { %430 = vmatpush.msrb.mxu3 %v2843_v11  ;;  %796 = vmatpush.msrb.mxu1 %v2895_v25 }
  0x2b   :  { %412 = vmatpush.msrb.mxu2 %v2858_v15  ;;  %777 = vmatpush.msrb.mxu0 %v2899_v26 }
  0x2c   :  { %431 = vmatpush.msrb.mxu3 %v2854_v14  ;;  %797 = vmatpush.msrb.mxu1 %v2901_v27 }
  0x2d   :  { %413 = vmatpush.msrb.mxu2 %v2864_v17 }
  0x2e   :  { %432 = vmatpush.msrb.mxu3 %v2860_v16 }
  0x2f   :  { %414 = vmatpush.msrb.mxu2 %v2872_v19 }
  0x30   :  { %2372 = vmatmul.msk.f32.gmra.mxu0 %vm132_vm0, %v113_v28  ;;  %2380 = vmatmul.msk.f32.gmra.mxu1 %vm132_vm0, %v113_v28 }
  0x31   :  { %433 = vmatpush.msrb.mxu3 %v2866_v18  ;;  %415 = vmatpush.msrb.mxu2 %v2887_v22 }
  0x33   :  { %434 = vmatpush.msrb.mxu3 %v2874_v20  ;;  %416 = vmatpush.msrb.mxu2 %v2893_v24 }
  0x35   :  { %435 = vmatpush.msrb.mxu3 %v2889_v23  ;;  %417 = vmatpush.msrb.mxu2 %v2899_v26 }
  0x37   :  { %436 = vmatpush.msrb.mxu3 %v2895_v25  ;;  %530 = vmatpush.msra.mxu2 %v2841_v10 }
  0x38   :  { %2373 = vmatmul.msk.f32.gmra.mxu0 %vm132_vm0, %v114_v30  ;;  %2381 = vmatmul.msk.f32.gmra.mxu1 %vm132_vm0, %v114_v30 }
  0x39   :  { %437 = vmatpush.msrb.mxu3 %v2901_v27  ;;  %531 = vmatpush.msra.mxu2 %v2852_v13 }
  0x3b   :  { %550 = vmatpush.msra.mxu3 %v2843_v11  ;;  %532 = vmatpush.msra.mxu2 %v2858_v15 }
  0x3d   :  { %551 = vmatpush.msra.mxu3 %v2854_v14  ;;  %533 = vmatpush.msra.mxu2 %v2864_v17 }
  0x3f   :  { %552 = vmatpush.msra.mxu3 %v2860_v16  ;;  %534 = vmatpush.msra.mxu2 %v2872_v19 }
  0x40   :  { %2374 = vmatmul.msk.f32.gmra.mxu0 %vm132_vm0, %v115_v31  ;;  %2382 = vmatmul.msk.f32.gmra.mxu1 %vm132_vm0, %v115_v31 }
  0x41   :  { %553 = vmatpush.msra.mxu3 %v2866_v18  ;;  %535 = vmatpush.msra.mxu2 %v2887_v22 }
  0x43   :  { %554 = vmatpush.msra.mxu3 %v2874_v20  ;;  %536 = vmatpush.msra.mxu2 %v2893_v24 }
  0x45   :  { %555 = vmatpush.msra.mxu3 %v2889_v23  ;;  %537 = vmatpush.msra.mxu2 %v2899_v26 }
  0x47   :  { %556 = vmatpush.msra.mxu3 %v2895_v25 }
  0x48   :  { %2375 = vmatmul.msk.f32.gmra.mxu0 %vm132_vm0, %v116_v32  ;;  %2383 = vmatmul.msk.f32.gmra.mxu1 %vm132_vm0, %v116_v32 }
  0x49   :  { %557 = vmatpush.msra.mxu3 %v2901_v27 }
  0x50   :  { %2376 = vmatmul.msk.f32.gmra.mxu0 %vm132_vm0, %v117_v33  ;;  %2384 = vmatmul.msk.f32.gmra.mxu1 %vm132_vm0, %v117_v33 }
  0x95   :  { %v174_v34 = vpop.f32.mrf.mxu0  ;;  %v215_v35 = vpop.f32.mrf.mxu1 }
  0x9d   :  { %v177_v39 = vpop.f32.mrf.mxu0  ;;  %v218_v40 = vpop.f32.mrf.mxu1 }
  0x9e   :  { %v2977_v41 = vadd.f32 %v177_v39, %v128_v37  ;;  %v2979_v42 = vadd.f32 %v218_v40, %v129_v38 }
  0xa5   :  { %v180_v43 = vpop.f32.mrf.mxu0  ;;  %v221_v44 = vpop.f32.mrf.mxu1 }
  0xa6   :  { %v2981_v45 = vadd.f32 %v180_v43, %v128_v37  ;;  %v2983_v46 = vadd.f32 %v221_v44, %v129_v38  ;;  %v3057_v43 = vadd.f32 %v174_v34, %v128_v37  ;;  %v3059_v44 = vadd.f32 %v215_v35, %v129_v38 }
  0xad   :  { %v183_v48 = vpop.f32.mrf.mxu0  ;;  %v224_v49 = vpop.f32.mrf.mxu1 }
  0xae   :  { %v2985_v51 = vadd.f32 %v183_v48, %v128_v37  ;;  %v2987_v52 = vadd.f32 %v224_v49, %v129_v38  ;;  %v298_v49 = vpop.f32.mrf.mxu2 }
  0xb5   :  { %v186_v56 = vpop.f32.mrf.mxu0  ;;  %v227_v57 = vpop.f32.mrf.mxu1 }
  0xb6   :  { %v2993_v59 = vadd.f32 %v186_v56, %v128_v37  ;;  %v2995_v60 = vadd.f32 %v227_v57, %v129_v38  ;;  %v318_v56 = vpop.f32.mrf.mxu3 }
  0xb8   :  { %v622_v62 = vsel %vm2989_vm1, %v2985_v51, %v2993_v59  ;;  %v623_v63 = vsel %vm2997_vm2, %v2987_v52, %v2995_v60  ;;  %v742_v0 = vsel %vm2989_vm1, %v2993_v59, %v2985_v51  ;;  %v743_v1 = vsel %vm2997_vm2, %v2995_v60, %v2987_v52 }
  0xbd   :  { %v189_v2 = vpop.f32.mrf.mxu0  ;;  %v230_v3 = vpop.f32.mrf.mxu1 }
  0xbe   :  { %v3017_v4 = vadd.f32 %v189_v2, %v128_v37  ;;  %v3019_v5 = vadd.f32 %v230_v3, %v129_v38 }
  0xc0   :  { %v502_v6 = vsel %vm2989_vm1, %v2981_v45, %v3017_v4  ;;  %v503_v7 = vsel %vm2997_vm2, %v2983_v46, %v3019_v5  ;;  %v862_v8 = vsel %vm2989_vm1, %v3017_v4, %v2981_v45  ;;  %v863_v9 = vsel %vm2997_vm2, %v3019_v5, %v2983_v46 }
  0xc5   :  { %v192_v12 = vpop.f32.mrf.mxu0  ;;  %v233_v21 = vpop.f32.mrf.mxu1 }
  0xc6   :  { %v3037_v28 = vadd.f32 %v192_v12, %v128_v37  ;;  %v3039_v30 = vadd.f32 %v233_v21, %v129_v38 }
  0xc8   :  { %v382_v31 = vsel %vm2989_vm1, %v2977_v41, %v3037_v28  ;;  %v383_v32 = vsel %vm2997_vm2, %v2979_v42, %v3039_v30  ;;  %v982_v33 = vsel %vm2989_vm1, %v3037_v28, %v2977_v41 }
  0xcd   :  { %v195_v39 = vpop.f32.mrf.mxu0  ;;  %v236_v40 = vpop.f32.mrf.mxu1 }
  0xce   :  { %v3061_v47 = vadd.f32 %v195_v39, %v128_v37  ;;  %v3063_v48 = vadd.f32 %v236_v40, %v129_v38 }
  0xd0   :  { %v259_v50 = vsel %vm2989_vm1, %v3057_v43, %v3061_v47  ;;  %v260_v55 = vsel %vm2997_vm2, %v3059_v44, %v3063_v48 }
  0xd1   :  { %v321_v35 = vadd.f32 %v298_v49, %v259_v50  ;;  %v322_v2 = vadd.f32 %v318_v56, %v260_v55 }
  0xd3   :  { %v2385_v37 = vmul.f32 -1.442695, %v321_v35  ;;  %v2386_v55 = vmul.f32 -1.442695, %v322_v2 }
  0xd5   :  { %2471 = vpow2.f32 %v2385_v37 }
  0xdb   :  { %v2472_v38 = vpop.eup %2471 }
  0xdc   :  { %v326_v54 = vadd.f32 1.0, %v2472_v38 }
  0xde   :  { %2473 = vrcp.f32 %v326_v54  ;;  %v338_v21 = vand.u32 2147483648, %v326_v54  ;;  %v336_v40 = vand.u32 2147483647, %v326_v54  ;;  %vm332_vm4 = vweird.f32 %v326_v54 }
  0xdf   :  { %2475 = vtanh.f32 %v322_v2 }
  0xe0   :  { %v339_v50 = vor.u32 1.1754944e-38, %v338_v21  ;;  %vm337_vm6 = vcmp.eq.f32.partialorder %v336_v40, 8.507059e+37  ;;  %2477 = vpow2.f32 %v2386_v55 }
  0xe4   :  { %v2474_v57 = vpop.eup %2473 }
  0xe5   :  { %v328_v3 = vmul.f32 %v2474_v57, %v326_v54  ;;  %vm333_vm3 = vweird.f32 %v2474_v57  ;;  %v2476_v37 = vpop.eup %2475 }
  0xe6   :  { %vm334_vm5 = vmor %vm332_vm4, %vm333_vm3  ;;  %v2478_v56 = vpop.eup %2477 }
  0xe7   :  { %v329_v12 = vsub.f32 1.0, %v328_v3  ;;  %v346_v3 = vadd.f32 1.0, %v2478_v56 }
  0xe9   :  { %v330_v39 = vmul.f32 %v2474_v57, %v329_v12  ;;  %2479 = vrcp.f32 %v346_v3  ;;  %v358_v40 = vand.u32 2147483648, %v346_v3  ;;  %vm352_vm8 = vweird.f32 %v346_v3 }
  0xeb   :  { %v331_v49 = vadd.f32 %v2474_v57, %v330_v39 }
  0xed   :  { %v335_v35 = vsel %vm334_vm5, %v2474_v57, %v331_v49  ;;  %v359_v49 = vor.u32 1.1754944e-38, %v358_v40 }
  0xee   :  { %v340_v38 = vsel %vm337_vm6, %v339_v50, %v335_v35 }
  0xef   :  { %v363_v29 = vmul.f32 %v2476_v37, %v340_v38  ;;  %v2480_v12 = vpop.eup %2479  ;;  %v362_v54 = vmul.f32 0.0, %v340_v38 }
  0xf0   :  { %v348_v34 = vmul.f32 %v2480_v12, %v346_v3  ;;  %vm353_vm7 = vweird.f32 %v2480_v12 }
  0xf1   :  { %365 = vrot.lane.b32.xlu0 %v363_v29, %s2749_s0  ;;  %v356_v29 = vand.u32 2147483647, %v346_v3  ;;  %vm354_vm9 = vmor %vm352_vm8, %vm353_vm7 }
  0xf2   :  { %v349_v53 = vsub.f32 1.0, %v348_v34 }
  0xf3   :  { %vm357_vm10 = vcmp.eq.f32.partialorder %v356_v29, 8.507059e+37 }
  0xf4   :  { %v350_v39 = vmul.f32 %v2480_v12, %v349_v53 }
  0xf6   :  { %v351_v57 = vadd.f32 %v2480_v12, %v350_v39 }
  0xf8   :  { %v355_v2 = vsel %vm354_vm9, %v2480_v12, %v351_v57 }
  0xf9   :  { %v360_v35 = vsel %vm357_vm10, %v359_v49, %v355_v2 }
 0x163   :  { %v366_v36 = vpop.permute.xlu0 %365 }
 0x164   :  { %v3082_v21 = vadd.f32 %v366_v36, %v362_v54 }
 0x166   :  { %2481 = vtanh.f32 %v3082_v21 }
 0x16c   :  { %v2482_v50 = vpop.eup %2481 }
 0x16d   :  { %v370_v37 = vmul.f32 %v2482_v50, %v360_v35 }
 0x16f   :  { %372 = vrot.lane.b32.xlu0 %v370_v37, %s2749_s0 }
 0x1e1   :  { %v373_v36 = vpop.permute.xlu0 %372 }
 0x1e2   :  { %375 = vst.msk [vmem:[#allocation3] sm:$0xff] %vm132_vm0, %v373_v36  ;;  %2387 = vmatmul.msk.f32.vlgmr.msrb.gmra.mxu2 %vm277_vm11, %v373_v36  ;;  %2388 = vmatmul.msk.f32.vlgmr.msrb.gmra.mxu3 %vm277_vm11, %v373_v36 }
 0x1e3   :  { %377 = vst.msk [vmem:[#allocation3 + $0x38] sm:$0xff] %vm376_vm12, %v373_v36  ;;  %650 = vmatpush.msrb.mxu2 %v2841_v10  ;;  %670 = vmatpush.msrb.mxu3 %v2843_v11 }
 0x1e5   :  { %651 = vmatpush.msrb.mxu2 %v2852_v13  ;;  %671 = vmatpush.msrb.mxu3 %v2854_v14 }
 0x1e7   :  { %652 = vmatpush.msrb.mxu2 %v2858_v15  ;;  %672 = vmatpush.msrb.mxu3 %v2860_v16 }
 0x1e9   :  { %653 = vmatpush.msrb.mxu2 %v2864_v17  ;;  %673 = vmatpush.msrb.mxu3 %v2866_v18 }
 0x1eb   :  { %654 = vmatpush.msrb.mxu2 %v2872_v19  ;;  %674 = vmatpush.msrb.mxu3 %v2874_v20 }
 0x1ed   :  { %655 = vmatpush.msrb.mxu2 %v2887_v22  ;;  %675 = vmatpush.msrb.mxu3 %v2889_v23 }
 0x1ef   :  { %656 = vmatpush.msrb.mxu2 %v2893_v24  ;;  %676 = vmatpush.msrb.mxu3 %v2895_v25 }
 0x1f1   :  { %657 = vmatpush.msrb.mxu2 %v2899_v26  ;;  %677 = vmatpush.msrb.mxu3 %v2901_v27 }
 0x265   :  { %v419_v53 = vpop.f32.mrf.mxu2  ;;  %v439_v3 = vpop.f32.mrf.mxu3 }
 0x266   :  { %v442_v34 = vadd.f32 %v419_v53, %v382_v31  ;;  %v443_v39 = vadd.f32 %v439_v3, %v383_v32 }
 0x268   :  { %v2389_v38 = vmul.f32 -1.442695, %v442_v34  ;;  %v2390_v53 = vmul.f32 -1.442695, %v443_v39 }
 0x26a   :  { %2483 = vpow2.f32 %v2389_v38 }
 0x270   :  { %v2484_v55 = vpop.eup %2483 }
 0x271   :  { %v447_v56 = vadd.f32 1.0, %v2484_v55 }
 0x273   :  { %2485 = vrcp.f32 %v447_v56  ;;  %v459_v40 = vand.u32 2147483648, %v447_v56  ;;  %v457_v31 = vand.u32 2147483647, %v447_v56  ;;  %vm453_vm14 = vweird.f32 %v447_v56 }
 0x274   :  { %2487 = vtanh.f32 %v443_v39 }
 0x275   :  { %v460_v49 = vor.u32 1.1754944e-38, %v459_v40  ;;  %vm458_vm3 = vcmp.eq.f32.partialorder %v457_v31, 8.507059e+37  ;;  %2489 = vpow2.f32 %v2390_v53 }
 0x279   :  { %v2486_v12 = vpop.eup %2485 }
 0x27a   :  { %v449_v54 = vmul.f32 %v2486_v12, %v447_v56  ;;  %vm454_vm13 = vweird.f32 %v2486_v12  ;;  %v2488_v35 = vpop.eup %2487 }
 0x27b   :  { %vm455_vm15 = vmor %vm453_vm14, %vm454_vm13  ;;  %v2490_v32 = vpop.eup %2489 }
 0x27c   :  { %v450_v57 = vsub.f32 1.0, %v449_v54  ;;  %v467_v34 = vadd.f32 1.0, %v2490_v32 }
 0x27e   :  { %v451_v29 = vmul.f32 %v2486_v12, %v450_v57  ;;  %2491 = vrcp.f32 %v467_v34  ;;  %vm473_vm5 = vweird.f32 %v467_v34  ;;  %v477_v39 = vand.u32 2147483647, %v467_v34 }
 0x280   :  { %v452_v2 = vadd.f32 %v2486_v12, %v451_v29  ;;  %v479_v29 = vand.u32 2147483648, %v467_v34  ;;  %vm478_vm7 = vcmp.eq.f32.partialorder %v477_v39, 8.507059e+37 }
 0x282   :  { %v456_v50 = vsel %vm455_vm15, %v2486_v12, %v452_v2  ;;  %v480_v2 = vor.u32 1.1754944e-38, %v479_v29 }
 0x283   :  { %v461_v37 = vsel %vm458_vm3, %v460_v49, %v456_v50 }
 0x284   :  { %v484_v36 = vmul.f32 %v2488_v35, %v461_v37  ;;  %v2492_v38 = vpop.eup %2491  ;;  %v483_v56 = vmul.f32 %v461_v37, %v3082_v21 }
 0x285   :  { %v469_v55 = vmul.f32 %v2492_v38, %v467_v34  ;;  %vm474_vm4 = vweird.f32 %v2492_v38 }
 0x286   :  { %486 = vrot.lane.b32.xlu1 %v484_v36, %s2749_s0  ;;  %vm475_vm6 = vmor %vm473_vm5, %vm474_vm4 }
 0x287   :  { %v470_v3 = vsub.f32 1.0, %v469_v55 }
 0x289   :  { %v471_v54 = vmul.f32 %v2492_v38, %v470_v3 }
 0x28b   :  { %v472_v12 = vadd.f32 %v2492_v38, %v471_v54 }
 0x28d   :  { %v476_v31 = vsel %vm475_vm6, %v2492_v38, %v472_v12 }
 0x28e   :  { %v481_v50 = vsel %vm478_vm7, %v480_v2, %v476_v31 }
 0x2f8   :  { %v487_v57 = vpop.permute.xlu1 %486 }
 0x2f9   :  { %v3118_v40 = vadd.f32 %v487_v57, %v483_v56 }
 0x2fb   :  { %2493 = vtanh.f32 %v3118_v40 }
 0x301   :  { %v2494_v49 = vpop.eup %2493 }
 0x302   :  { %v491_v35 = vmul.f32 %v2494_v49, %v481_v50 }
 0x304   :  { %493 = vrot.lane.b32.xlu1 %v491_v35, %s2749_s0 }
 0x376   :  { %v494_v21 = vpop.permute.xlu1 %493 }
 0x377   :  { %496 = vst.msk [vmem:[#allocation3 + $0x8] sm:$0xff] %vm132_vm0, %v494_v21  ;;  %2391 = vmatmul.msk.f32.vlgmr.msra.gmra.mxu2 %vm277_vm11, %v494_v21  ;;  %2392 = vmatmul.msk.f32.vlgmr.msra.gmra.mxu3 %vm277_vm11, %v494_v21 }
 0x378   :  { %497 = vst.msk [vmem:[#allocation3 + $0x30] sm:$0xff] %vm376_vm12, %v494_v21  ;;  %890 = vmatpush.msra.mxu2 %v2841_v10  ;;  %910 = vmatpush.msra.mxu3 %v2843_v11 }
 0x37a   :  { %891 = vmatpush.msra.mxu2 %v2852_v13  ;;  %911 = vmatpush.msra.mxu3 %v2854_v14 }
 0x37c   :  { %892 = vmatpush.msra.mxu2 %v2858_v15  ;;  %912 = vmatpush.msra.mxu3 %v2860_v16 }
 0x37e   :  { %893 = vmatpush.msra.mxu2 %v2864_v17  ;;  %913 = vmatpush.msra.mxu3 %v2866_v18 }
 0x380   :  { %894 = vmatpush.msra.mxu2 %v2872_v19  ;;  %914 = vmatpush.msra.mxu3 %v2874_v20 }
 0x382   :  { %895 = vmatpush.msra.mxu2 %v2887_v22  ;;  %915 = vmatpush.msra.mxu3 %v2889_v23 }
 0x384   :  { %896 = vmatpush.msra.mxu2 %v2893_v24  ;;  %916 = vmatpush.msra.mxu3 %v2895_v25 }
 0x386   :  { %897 = vmatpush.msra.mxu2 %v2899_v26  ;;  %917 = vmatpush.msra.mxu3 %v2901_v27 }
 0x3fa   :  { %v539_v10 = vpop.f32.mrf.mxu2  ;;  %v559_v16 = vpop.f32.mrf.mxu3 }
 0x3fb   :  { %v562_v11 = vadd.f32 %v539_v10, %v502_v6  ;;  %v563_v18 = vadd.f32 %v559_v16, %v503_v7 }
 0x3fd   :  { %v2393_v13 = vmul.f32 -1.442695, %v562_v11  ;;  %v2394_v53 = vmul.f32 -1.442695, %v563_v18 }
 0x3ff   :  { %2495 = vpow2.f32 %v2393_v13 }
 0x405   :  { %v2496_v14 = vpop.eup %2495 }
 0x406   :  { %v567_v15 = vadd.f32 1.0, %v2496_v14 }
 0x408   :  { %2497 = vrcp.f32 %v567_v15  ;;  %v579_v22 = vand.u32 2147483648, %v567_v15  ;;  %v577_v24 = vand.u32 2147483647, %v567_v15  ;;  %vm573_vm9 = vweird.f32 %v567_v15 }
 0x409   :  { %2499 = vtanh.f32 %v563_v18 }
 0x40a   :  { %v580_v26 = vor.u32 1.1754944e-38, %v579_v22  ;;  %vm578_vm13 = vcmp.eq.f32.partialorder %v577_v24, 8.507059e+37  ;;  %2501 = vpow2.f32 %v2394_v53 }
 0x40e   :  { %v2498_v17 = vpop.eup %2497 }
 0x40f   :  { %v569_v19 = vmul.f32 %v2498_v17, %v567_v15  ;;  %vm574_vm8 = vweird.f32 %v2498_v17  ;;  %v2500_v6 = vpop.eup %2499 }
 0x410   :  { %vm575_vm10 = vmor %vm573_vm9, %vm574_vm8  ;;  %v2502_v7 = vpop.eup %2501 }
 0x411   :  { %v570_v20 = vsub.f32 1.0, %v569_v19  ;;  %v587_v32 = vadd.f32 1.0, %v2502_v7 }
 0x413   :  { %v571_v23 = vmul.f32 %v2498_v17, %v570_v20  ;;  %2503 = vrcp.f32 %v587_v32  ;;  %v599_v29 = vand.u32 2147483648, %v587_v32  ;;  %vm593_vm15 = vweird.f32 %v587_v32 }
 0x414   :  { %v597_v39 = vand.u32 2147483647, %v587_v32 }
 0x415   :  { %v572_v25 = vadd.f32 %v2498_v17, %v571_v23  ;;  %v600_v2 = vor.u32 1.1754944e-38, %v599_v29 }
 0x416   :  { %vm598_vm4 = vcmp.eq.f32.partialorder %v597_v39, 8.507059e+37 }
 0x417   :  { %v576_v27 = vsel %vm575_vm10, %v2498_v17, %v572_v25 }
 0x418   :  { %v581_v37 = vsel %vm578_vm13, %v580_v26, %v576_v27 }
 0x419   :  { %v604_v36 = vmul.f32 %v2500_v6, %v581_v37  ;;  %v2504_v34 = vpop.eup %2503  ;;  %v603_v54 = vmul.f32 %v581_v37, %v3118_v40 }
 0x41a   :  { %v589_v38 = vmul.f32 %v2504_v34, %v587_v32  ;;  %vm594_vm14 = vweird.f32 %v2504_v34 }
 0x41b   :  { %606 = vrot.lane.b32.xlu2 %v604_v36, %s2749_s0  ;;  %vm595_vm3 = vmor %vm593_vm15, %vm594_vm14 }
 0x41c   :  { %v590_v55 = vsub.f32 1.0, %v589_v38 }
 0x41e   :  { %v591_v3 = vmul.f32 %v2504_v34, %v590_v55 }
 0x420   :  { %v592_v12 = vadd.f32 %v2504_v34, %v591_v3 }
 0x422   :  { %v596_v31 = vsel %vm595_vm3, %v2504_v34, %v592_v12 }
 0x423   :  { %v601_v50 = vsel %vm598_vm4, %v600_v2, %v596_v31 }
 0x475   :  { %v607_v56 = vpop.permute.xlu2 %606 }
 0x476   :  { %v609_v57 = vadd.f32 %v607_v56, %v603_v54 }
 0x478   :  { %2505 = vtanh.f32 %v609_v57 }
 0x47e   :  { %v2506_v49 = vpop.eup %2505 }
 0x47f   :  { %v611_v35 = vmul.f32 %v2506_v49, %v601_v50 }
 0x481   :  { %613 = vrot.lane.b32.xlu2 %v611_v35, %s2749_s0 }
 0x4db   :  { %v614_v21 = vpop.permute.xlu2 %613 }
 0x4dc   :  { %616 = vst.msk [vmem:[#allocation3 + $0x10] sm:$0xff] %vm132_vm0, %v614_v21  ;;  %2395 = vmatmul.msk.f32.vlgmr.msrb.gmra.mxu2 %vm277_vm11, %v614_v21  ;;  %2396 = vmatmul.msk.f32.vlgmr.msrb.gmra.mxu3 %vm277_vm11, %v614_v21 }
 0x4dd   :  { %617 = vst.msk [vmem:[#allocation3 + $0x28] sm:$0xff] %vm376_vm12, %v614_v21 }
 0x55f   :  { %v659_v40 = vpop.f32.mrf.mxu2  ;;  %v679_v15 = vpop.f32.mrf.mxu3 }
 0x560   :  { %v682_v10 = vadd.f32 %v659_v40, %v622_v62  ;;  %v683_v17 = vadd.f32 %v679_v15, %v623_v63 }
 0x562   :  { %v2397_v11 = vmul.f32 -1.442695, %v682_v10  ;;  %v2398_v37 = vmul.f32 -1.442695, %v683_v17 }
 0x564   :  { %2507 = vpow2.f32 %v2397_v11 }
 0x56a   :  { %v2508_v13 = vpop.eup %2507 }
 0x56b   :  { %v687_v14 = vadd.f32 1.0, %v2508_v13 }
 0x56d   :  { %2509 = vrcp.f32 %v687_v14  ;;  %v699_v20 = vand.u32 2147483648, %v687_v14  ;;  %v697_v62 = vand.u32 2147483647, %v687_v14  ;;  %vm693_vm6 = vweird.f32 %v687_v14 }
 0x56e   :  { %2511 = vtanh.f32 %v683_v17 }
 0x56f   :  { %v700_v24 = vor.u32 1.1754944e-38, %v699_v20  ;;  %vm698_vm8 = vcmp.eq.f32.partialorder %v697_v62, 8.507059e+37  ;;  %2513 = vpow2.f32 %v2398_v37 }
 0x573   :  { %v2510_v16 = vpop.eup %2509 }
 0x574   :  { %v689_v18 = vmul.f32 %v2510_v16, %v687_v14  ;;  %vm694_vm5 = vweird.f32 %v2510_v16  ;;  %v2512_v26 = vpop.eup %2511 }
 0x575   :  { %vm695_vm7 = vmor %vm693_vm6, %vm694_vm5  ;;  %v2514_v63 = vpop.eup %2513 }
 0x576   :  { %v690_v19 = vsub.f32 1.0, %v689_v18  ;;  %v707_v36 = vadd.f32 1.0, %v2514_v63 }
 0x578   :  { %v691_v22 = vmul.f32 %v2510_v16, %v690_v19  ;;  %2515 = vrcp.f32 %v707_v36  ;;  %v719_v56 = vand.u32 2147483648, %v707_v36  ;;  %vm713_vm10 = vweird.f32 %v707_v36 }
 0x579   :  { %v717_v12 = vand.u32 2147483647, %v707_v36 }
 0x57a   :  { %v692_v23 = vadd.f32 %v2510_v16, %v691_v22  ;;  %v720_v39 = vor.u32 1.1754944e-38, %v719_v56 }
 0x57b   :  { %vm718_vm14 = vcmp.eq.f32.partialorder %v717_v12, 8.507059e+37 }
 0x57c   :  { %v696_v25 = vsel %vm695_vm7, %v2510_v16, %v692_v23 }
 0x57d   :  { %v701_v27 = vsel %vm698_vm8, %v700_v24, %v696_v25 }
 0x57e   :  { %v724_v6 = vmul.f32 %v2512_v26, %v701_v27  ;;  %v2516_v53 = vpop.eup %2515  ;;  %v723_v38 = vmul.f32 %v701_v27, %v609_v57 }
 0x57f   :  { %v709_v7 = vmul.f32 %v2516_v53, %v707_v36  ;;  %vm714_vm9 = vweird.f32 %v2516_v53 }
 0x580   :  { %726 = vrot.lane.b32.xlu0 %v724_v6, %s2749_s0  ;;  %vm715_vm13 = vmor %vm713_vm10, %vm714_vm9 }
 0x581   :  { %v710_v32 = vsub.f32 1.0, %v709_v7 }
 0x583   :  { %v711_v34 = vmul.f32 %v2516_v53, %v710_v32 }
 0x585   :  { %v712_v54 = vadd.f32 %v2516_v53, %v711_v34 }
 0x587   :  { %v716_v29 = vsel %vm715_vm13, %v2516_v53, %v712_v54 }
 0x588   :  { %v721_v2 = vsel %vm718_vm14, %v720_v39, %v716_v29 }
 0x5f2   :  { %v727_v55 = vpop.permute.xlu0 %726 }
 0x5f3   :  { %v729_v3 = vadd.f32 %v727_v55, %v723_v38 }
 0x5f5   :  { %2517 = vtanh.f32 %v729_v3 }
 0x5fb   :  { %v2518_v31 = vpop.eup %2517 }
 0x5fc   :  { %v731_v49 = vmul.f32 %v2518_v31, %v721_v2 }
 0x5fe   :  { %733 = vrot.lane.b32.xlu1 %v731_v49, %s2749_s0 }
 0x670   :  { %v734_v50 = vpop.permute.xlu1 %733 }
 0x671   :  { %736 = vst.msk [vmem:[#allocation3 + $0x18] sm:$0xff] %vm132_vm0, %v734_v50  ;;  %2399 = vmatmul.msk.f32.vlgmr.msrb.gmra.mxu0 %vm277_vm11, %v734_v50  ;;  %2400 = vmatmul.msk.f32.vlgmr.msrb.gmra.mxu1 %vm277_vm11, %v734_v50 }
 0x672   :  { %737 = vst.msk [vmem:[#allocation3 + $0x20] sm:$0xff] %vm376_vm12, %v734_v50 }
 0x6ee   :  { %v779_v57 = vpop.f32.mrf.mxu0  ;;  %v799_v11 = vpop.f32.mrf.mxu1 }
 0x6ef   :  { %v802_v35 = vadd.f32 %v779_v57, %v742_v0  ;;  %v803_v14 = vadd.f32 %v799_v11, %v743_v1 }
 0x6f1   :  { %v2401_v21 = vmul.f32 -1.442695, %v802_v35  ;;  %v2402_v52 = vmul.f32 -1.442695, %v803_v14 }
 0x6f3   :  { %2519 = vpow2.f32 %v2401_v21 }
 0x6f9   :  { %v2520_v40 = vpop.eup %2519 }
 0x6fa   :  { %v807_v10 = vadd.f32 1.0, %v2520_v40 }
 0x6fc   :  { %2521 = vrcp.f32 %v807_v10  ;;  %v819_v17 = vand.u32 2147483648, %v807_v10  ;;  %v817_v51 = vand.u32 2147483647, %v807_v10  ;;  %vm813_vm3 = vweird.f32 %v807_v10 }
 0x6fd   :  { %2523 = vtanh.f32 %v803_v14  ;;  %v998_v14 = vld [vmem:[#allocation5 + $0x70] sm:$0xff] }
 0x6fe   :  { %v820_v0 = vor.u32 1.1754944e-38, %v819_v17  ;;  %vm818_vm5 = vcmp.eq.f32.partialorder %v817_v51, 8.507059e+37  ;;  %2525 = vpow2.f32 %v2402_v52  ;;  %1010 = vmatpush.msra.mxu0 %v998_v14  ;;  %v997_v17 = vld [vmem:[#allocation5 + $0x68] sm:$0xff]  ;;  %v995_v51 = vld [vmem:[#allocation5 + $0x58] sm:$0xff]  ;;  %1130 = vmatpush.msrb.mxu2 %v998_v14 }
 0x6ff   :  { %v989_v52 = vld [vmem:[#allocation5 + $0x28] sm:$0xff] }
 0x702   :  { %v2522_v13 = vpop.eup %2521 }
 0x703   :  { %v809_v15 = vmul.f32 %v2522_v13, %v807_v10  ;;  %vm814_vm15 = vweird.f32 %v2522_v13  ;;  %v2524_v20 = vpop.eup %2523 }
 0x704   :  { %vm815_vm4 = vmor %vm813_vm3, %vm814_vm15  ;;  %v2526_v60 = vpop.eup %2525 }
 0x705   :  { %v810_v16 = vsub.f32 1.0, %v809_v15  ;;  %v827_v1 = vadd.f32 1.0, %v2526_v60  ;;  %v999_v15 = vld [vmem:[#allocation5 + $0x78] sm:$0xff] }
 0x706   :  { %1030 = vmatpush.msra.mxu1 %v999_v15  ;;  %1150 = vmatpush.msrb.mxu3 %v999_v15 }
 0x707   :  { %v811_v18 = vmul.f32 %v2522_v13, %v810_v16  ;;  %2527 = vrcp.f32 %v827_v1  ;;  %v839_v36 = vand.u32 2147483648, %v827_v1  ;;  %vm833_vm7 = vweird.f32 %v827_v1  ;;  %v996_v16 = vld [vmem:[#allocation5 + $0x60] sm:$0xff] }
 0x708   :  { %v837_v53 = vand.u32 2147483647, %v827_v1  ;;  %1011 = vmatpush.msra.mxu0 %v996_v16  ;;  %1031 = vmatpush.msra.mxu1 %v997_v17 }
 0x709   :  { %v812_v59 = vadd.f32 %v2522_v13, %v811_v18  ;;  %v840_v32 = vor.u32 1.1754944e-38, %v839_v36  ;;  %v994_v18 = vld [vmem:[#allocation5 + $0x50] sm:$0xff]  ;;  %1131 = vmatpush.msrb.mxu2 %v996_v16  ;;  %1151 = vmatpush.msrb.mxu3 %v997_v17 }
 0x70a   :  { %vm838_vm9 = vcmp.eq.f32.partialorder %v837_v53, 8.507059e+37  ;;  %1012 = vmatpush.msra.mxu0 %v994_v18  ;;  %1032 = vmatpush.msra.mxu1 %v995_v51 }
 0x70b   :  { %v816_v19 = vsel %vm815_vm4, %v2522_v13, %v812_v59  ;;  %v992_v59 = vld [vmem:[#allocation5 + $0x40] sm:$0xff]  ;;  %1132 = vmatpush.msrb.mxu2 %v994_v18  ;;  %1152 = vmatpush.msrb.mxu3 %v995_v51 }
 0x70c   :  { %v821_v22 = vsel %vm818_vm5, %v820_v0, %v816_v19  ;;  %v993_v0 = vld [vmem:[#allocation5 + $0x48] sm:$0xff]  ;;  %v990_v19 = vld [vmem:[#allocation5 + $0x30] sm:$0xff]  ;;  %1013 = vmatpush.msra.mxu0 %v992_v59 }
 0x70d   :  { %v844_v62 = vmul.f32 %v2524_v20, %v821_v22  ;;  %v2528_v23 = vpop.eup %2527  ;;  %v843_v27 = vmul.f32 %v821_v22, %v729_v3  ;;  %v991_v20 = vld [vmem:[#allocation5 + $0x38] sm:$0xff]  ;;  %1033 = vmatpush.msra.mxu1 %v993_v0  ;;  %1133 = vmatpush.msrb.mxu2 %v992_v59 }
 0x70e   :  { %v829_v24 = vmul.f32 %v2528_v23, %v827_v1  ;;  %vm834_vm6 = vweird.f32 %v2528_v23  ;;  %1153 = vmatpush.msrb.mxu3 %v993_v0  ;;  %1014 = vmatpush.msra.mxu0 %v990_v19  ;;  %v986_v1 = vld [vmem:[#allocation5 + $0x10] sm:$0xff] }
 0x70f   :  { %846 = vrot.lane.b32.xlu2 %v844_v62, %s2749_s0  ;;  %vm835_vm8 = vmor %vm833_vm7, %vm834_vm6  ;;  %v988_v62 = vld [vmem:[#allocation5 + $0x20] sm:$0xff]  ;;  %1034 = vmatpush.msra.mxu1 %v991_v20 }
 0x710   :  { %v830_v25 = vsub.f32 1.0, %v829_v24  ;;  %1134 = vmatpush.msrb.mxu2 %v990_v19  ;;  %1154 = vmatpush.msrb.mxu3 %v991_v20  ;;  %v984_v24 = vld [vmem:[#allocation5] sm:$0xff] }
 0x711   :  { %1015 = vmatpush.msra.mxu0 %v988_v62  ;;  %1035 = vmatpush.msra.mxu1 %v989_v52 }
 0x712   :  { %v831_v26 = vmul.f32 %v2528_v23, %v830_v25  ;;  %v985_v25 = vld [vmem:[#allocation5 + $0x8] sm:$0xff]  ;;  %1135 = vmatpush.msrb.mxu2 %v988_v62  ;;  %1155 = vmatpush.msrb.mxu3 %v989_v52 }
 0x713   :  { %1016 = vmatpush.msra.mxu0 %v986_v1 }
 0x714   :  { %v832_v63 = vadd.f32 %v2528_v23, %v831_v26  ;;  %1136 = vmatpush.msrb.mxu2 %v986_v1  ;;  %v3656_v1 = vsel %vm2989_vm1, %v3061_v47, %v3057_v43 }
 0x715   :  { %1017 = vmatpush.msra.mxu0 %v984_v24 }
 0x716   :  { %v836_v7 = vsel %vm835_vm8, %v2528_v23, %v832_v63  ;;  %v987_v23 = vld [vmem:[#allocation5 + $0x18] sm:$0xff]  ;;  %1137 = vmatpush.msrb.mxu2 %v984_v24 }
 0x717   :  { %v841_v38 = vsel %vm838_vm9, %v840_v32, %v836_v7  ;;  %1036 = vmatpush.msra.mxu1 %v987_v23  ;;  %1156 = vmatpush.msrb.mxu3 %v987_v23 }
 0x719   :  { %1037 = vmatpush.msra.mxu1 %v985_v25  ;;  %1157 = vmatpush.msrb.mxu3 %v985_v25 }
 0x769   :  { %v847_v6 = vpop.permute.xlu2 %846 }
 0x76a   :  { %v3186_v37 = vadd.f32 %v847_v6, %v843_v27 }
 0x76c   :  { %2529 = vtanh.f32 %v3186_v37 }
 0x772   :  { %v2530_v34 = vpop.eup %2529 }
 0x773   :  { %v851_v55 = vmul.f32 %v2530_v34, %v841_v38 }
 0x775   :  { %853 = vrot.lane.b32.xlu0 %v851_v55, %s2749_s0 }
 0x7e7   :  { %v854_v3 = vpop.permute.xlu0 %853 }
 0x7e8   :  { %856 = vst.msk [vmem:[#allocation3 + $0x20] sm:$0xff] %vm132_vm0, %v854_v3  ;;  %2403 = vmatmul.msk.f32.vlgmr.msra.gmra.mxu2 %vm277_vm11, %v854_v3  ;;  %2404 = vmatmul.msk.f32.vlgmr.msra.gmra.mxu3 %vm277_vm11, %v854_v3 }
 0x7e9   :  { %857 = vst.msk [vmem:[#allocation3 + $0x18] sm:$0xff] %vm376_vm12, %v854_v3 }
 0x86b   :  { %v899_v54 = vpop.f32.mrf.mxu2  ;;  %v919_v31 = vpop.f32.mrf.mxu3 }
 0x86c   :  { %v922_v56 = vadd.f32 %v899_v54, %v862_v8  ;;  %v923_v49 = vadd.f32 %v919_v31, %v863_v9 }
 0x86e   :  { %v2405_v12 = vmul.f32 -1.442695, %v922_v56  ;;  %v2406_v46 = vmul.f32 -1.442695, %v923_v49 }
 0x870   :  { %2531 = vpow2.f32 %v2405_v12 }
 0x876   :  { %v2532_v29 = vpop.eup %2531 }
 0x877   :  { %v927_v39 = vadd.f32 1.0, %v2532_v29 }
 0x879   :  { %2533 = vrcp.f32 %v927_v39  ;;  %v939_v35 = vand.u32 2147483648, %v927_v39  ;;  %v937_v45 = vand.u32 2147483647, %v927_v39  ;;  %vm933_vm13 = vweird.f32 %v927_v39 }
 0x87a   :  { %2535 = vtanh.f32 %v923_v49 }
 0x87b   :  { %v940_v8 = vor.u32 1.1754944e-38, %v939_v35  ;;  %vm938_vm15 = vcmp.eq.f32.partialorder %v937_v45, 8.507059e+37  ;;  %2537 = vpow2.f32 %v2406_v46 }
 0x87f   :  { %v2534_v2 = vpop.eup %2533 }
 0x880   :  { %v929_v50 = vmul.f32 %v2534_v2, %v927_v39  ;;  %vm934_vm10 = vweird.f32 %v2534_v2  ;;  %v2536_v10 = vpop.eup %2535 }
 0x881   :  { %vm935_vm14 = vmor %vm933_vm13, %vm934_vm10  ;;  %v2538_v5 = vpop.eup %2537 }
 0x882   :  { %v930_v57 = vsub.f32 1.0, %v929_v50  ;;  %v3205_v9 = vadd.f32 1.0, %v2538_v5  ;;  %v3655_v50 = vsel %vm2997_vm2, %v3039_v30, %v2979_v42 }
 0x884   :  { %v931_v21 = vmul.f32 %v2534_v2, %v930_v57  ;;  %2539 = vrcp.f32 %v3205_v9  ;;  %v959_v7 = vand.u32 2147483648, %v3205_v9  ;;  %vm953_vm4 = vweird.f32 %v3205_v9 }
 0x885   :  { %v957_v32 = vand.u32 2147483647, %v3205_v9 }
 0x886   :  { %v932_v4 = vadd.f32 %v2534_v2, %v931_v21  ;;  %v960_v38 = vor.u32 1.1754944e-38, %v959_v7 }
 0x887   :  { %vm958_vm6 = vcmp.eq.f32.partialorder %v957_v32, 8.507059e+37 }
 0x888   :  { %v936_v40 = vsel %vm935_vm14, %v2534_v2, %v932_v4 }
 0x889   :  { %v941_v11 = vsel %vm938_vm15, %v940_v8, %v936_v40 }
 0x88a   :  { %v964_v13 = vmul.f32 %v2536_v10, %v941_v11  ;;  %v2540_v22 = vpop.eup %2539  ;;  %v963_v6 = vmul.f32 %v941_v11, %v3186_v37 }
 0x88b   :  { %v949_v60 = vmul.f32 %v2540_v22, %v3205_v9  ;;  %vm954_vm3 = vweird.f32 %v2540_v22 }
 0x88c   :  { %966 = vrot.lane.b32.xlu1 %v964_v13, %s2749_s0  ;;  %vm955_vm5 = vmor %vm953_vm4, %vm954_vm3 }
 0x88d   :  { %v950_v26 = vsub.f32 1.0, %v949_v60 }
 0x88f   :  { %v951_v27 = vmul.f32 %v2540_v22, %v950_v26 }
 0x891   :  { %v952_v53 = vadd.f32 %v2540_v22, %v951_v27 }
 0x893   :  { %v956_v34 = vsel %vm955_vm5, %v2540_v22, %v952_v53 }
 0x894   :  { %v961_v3 = vsel %vm958_vm6, %v960_v38, %v956_v34 }
 0x8fe   :  { %v967_v63 = vpop.permute.xlu1 %966 }
 0x8ff   :  { %v969_v36 = vadd.f32 %v967_v63, %v963_v6  ;;  %v3657_v63 = vsel %vm2997_vm2, %v3063_v48, %v3059_v44 }
 0x901   :  { %2541 = vtanh.f32 %v969_v36 }
 0x907   :  { %v2542_v55 = vpop.eup %2541 }
 0x908   :  { %v971_v54 = vmul.f32 %v2542_v55, %v961_v3 }
 0x90a   :  { %973 = vrot.lane.b32.xlu2 %v971_v54, %s2749_s0 }
 0x964   :  { %v974_v37 = vpop.permute.xlu2 %973 }
 0x965   :  { %976 = vst.msk [vmem:[#allocation3 + $0x28] sm:$0xff] %vm132_vm0, %v974_v37  ;;  %2407 = vmatmul.msk.f32.vlgmr.msra.gmra.mxu0 %vm277_vm11, %v974_v37  ;;  %2408 = vmatmul.msk.f32.vlgmr.msra.gmra.mxu1 %vm277_vm11, %v974_v37 }
 0x966   :  { %977 = vst.msk [vmem:[#allocation3 + $0x10] sm:$0xff] %vm376_vm12, %v974_v37 }
 0x9e2   :  { %v1019_v56 = vpop.f32.mrf.mxu0  ;;  %v1039_v2 = vpop.f32.mrf.mxu1 }
 0x9e3   :  { %v1042_v12 = vadd.f32 %v1019_v56, %v982_v33  ;;  %v1043_v57 = vadd.f32 %v1039_v2, %v3655_v50  ;;  %v1236_v2 = vld [vmem:[#allocation7 + $0x50] sm:$0xff]  ;;  %v1234_v50 = vld [vmem:[#allocation7 + $0x40] sm:$0xff] }
 0x9e5   :  { %v2409_v29 = vmul.f32 -1.442695, %v1042_v12  ;;  %v2410_v42 = vmul.f32 -1.442695, %v1043_v57  ;;  %v1240_v12 = vld [vmem:[#allocation7 + $0x70] sm:$0xff] }
 0x9e6   :  { %1280 = vmatpush.msrb.mxu0 %v1240_v12 }
 0x9e7   :  { %2543 = vpow2.f32 %v2409_v29  ;;  %v1241_v29 = vld [vmem:[#allocation7 + $0x78] sm:$0xff] }
 0x9e8   :  { %1321 = vmatpush.msrb.mxu1 %v1241_v29 }
 0x9ed   :  { %v2544_v39 = vpop.eup %2543 }
 0x9ee   :  { %v1047_v31 = vadd.f32 1.0, %v2544_v39  ;;  %v1238_v39 = vld [vmem:[#allocation7 + $0x60] sm:$0xff] }
 0x9ef   :  { %1281 = vmatpush.msrb.mxu0 %v1238_v39 }
 0x9f0   :  { %2545 = vrcp.f32 %v1047_v31  ;;  %v1059_v45 = vand.u32 2147483648, %v1047_v31  ;;  %v1057_v41 = vand.u32 2147483647, %v1047_v31  ;;  %vm1053_vm8 = vweird.f32 %v1047_v31 }
 0x9f1   :  { %2547 = vtanh.f32 %v1043_v57  ;;  %v1235_v57 = vld [vmem:[#allocation7 + $0x48] sm:$0xff]  ;;  %1282 = vmatpush.msrb.mxu0 %v1236_v2 }
 0x9f2   :  { %v1060_v33 = vor.u32 1.1754944e-38, %v1059_v45  ;;  %vm1058_vm10 = vcmp.eq.f32.partialorder %v1057_v41, 8.507059e+37  ;;  %2549 = vpow2.f32 %v2410_v42 }
 0x9f3   :  { %1283 = vmatpush.msrb.mxu0 %v1234_v50 }
 0x9f6   :  { %v2546_v49 = vpop.eup %2545 }
 0x9f7   :  { %v1049_v35 = vmul.f32 %v2546_v49, %v1047_v31  ;;  %vm1054_vm7 = vweird.f32 %v2546_v49  ;;  %v2548_v40 = vpop.eup %2547  ;;  %v1239_v31 = vld [vmem:[#allocation7 + $0x68] sm:$0xff] }
 0x9f8   :  { %vm1055_vm9 = vmor %vm1053_vm8, %vm1054_vm7  ;;  %v2550_v30 = vpop.eup %2549  ;;  %1322 = vmatpush.msrb.mxu1 %v1239_v31 }
 0x9f9   :  { %v1050_v21 = vsub.f32 1.0, %v1049_v35  ;;  %v1067_v13 = vadd.f32 1.0, %v2550_v30 }
 0x9fb   :  { %v1051_v4 = vmul.f32 %v2546_v49, %v1050_v21  ;;  %2551 = vrcp.f32 %v1067_v13  ;;  %v1079_v51 = vand.u32 2147483648, %v1067_v13  ;;  %vm1073_vm14 = vweird.f32 %v1067_v13 }
 0x9fc   :  { %v1077_v59 = vand.u32 2147483647, %v1067_v13 }
 0x9fd   :  { %v1052_v28 = vadd.f32 %v2546_v49, %v1051_v4  ;;  %v1080_v19 = vor.u32 1.1754944e-38, %v1079_v51  ;;  %v1227_v51 = vld [vmem:[#allocation7 + $0x8] sm:$0xff] }
 0x9fe   :  { %vm1078_vm3 = vcmp.eq.f32.partialorder %v1077_v59, 8.507059e+37 }
 0x9ff   :  { %v1056_v8 = vsel %vm1055_vm9, %v2546_v49, %v1052_v28  ;;  %v1237_v49 = vld [vmem:[#allocation7 + $0x58] sm:$0xff] }
 0xa00   :  { %v1061_v10 = vsel %vm1058_vm10, %v1060_v33, %v1056_v8  ;;  %1323 = vmatpush.msrb.mxu1 %v1237_v49 }
 0xa01   :  { %v1084_v11 = vmul.f32 %v2548_v40, %v1061_v10  ;;  %v2552_v46 = vpop.eup %2551  ;;  %v1083_v15 = vmul.f32 %v1061_v10, %v969_v36 }
 0xa02   :  { %v1069_v5 = vmul.f32 %v2552_v46, %v1067_v13  ;;  %vm1074_vm13 = vweird.f32 %v2552_v46  ;;  %1324 = vmatpush.msrb.mxu1 %v1235_v57 }
 0xa03   :  { %1086 = vrot.lane.b32.xlu0 %v1084_v11, %s2749_s0  ;;  %vm1075_vm15 = vmor %vm1073_vm14, %vm1074_vm13 }
 0xa04   :  { %v1070_v9 = vsub.f32 1.0, %v1069_v5  ;;  %v1232_v5 = vld [vmem:[#allocation7 + $0x30] sm:$0xff] }
 0xa05   :  { %1284 = vmatpush.msrb.mxu0 %v1232_v5 }
 0xa06   :  { %v1071_v14 = vmul.f32 %v2552_v46, %v1070_v9  ;;  %v1233_v9 = vld [vmem:[#allocation7 + $0x38] sm:$0xff] }
 0xa07   :  { %1325 = vmatpush.msrb.mxu1 %v1233_v9 }
 0xa08   :  { %v1072_v18 = vadd.f32 %v2552_v46, %v1071_v14  ;;  %v1230_v14 = vld [vmem:[#allocation7 + $0x20] sm:$0xff] }
 0xa09   :  { %1285 = vmatpush.msrb.mxu0 %v1230_v14 }
 0xa0a   :  { %v1076_v0 = vsel %vm1075_vm15, %v2552_v46, %v1072_v18  ;;  %v1226_v18 = vld [vmem:[#allocation7] sm:$0xff] }
 0xa0b   :  { %v1081_v22 = vsel %vm1078_vm3, %v1080_v19, %v1076_v0  ;;  %v3254_v19 = vld [vmem:[#allocation9 + $0x70] sm:$0xff] }
 0xa0c   :  { %1400 = vmatpush.msra.mxu2 %v3254_v19 }
 0xa75   :  { %v1087_v16 = vpop.permute.xlu0 %1086 }
 0xa76   :  { %v3229_v17 = vadd.f32 %v1087_v16, %v1083_v15  ;;  %v1231_v15 = vld [vmem:[#allocation7 + $0x28] sm:$0xff]  ;;  %v1228_v16 = vld [vmem:[#allocation7 + $0x10] sm:$0xff] }
 0xa77   :  { %1326 = vmatpush.msrb.mxu1 %v1231_v15  ;;  %1286 = vmatpush.msrb.mxu0 %v1228_v16 }
 0xa78   :  { %2553 = vtanh.f32 %v3229_v17 }
 0xa79   :  { %1287 = vmatpush.msrb.mxu0 %v1226_v18 }
 0xa7b   :  { %1880 = vmatpush.msra.mxu0 %v3254_v19 }
 0xa7e   :  { %v2554_v20 = vpop.eup %2553 }
 0xa7f   :  { %v1091_v62 = vmul.f32 %v2554_v20, %v1081_v22  ;;  %v3256_v20 = vld [vmem:[#allocation9 + $0x78] sm:$0xff] }
 0xa80   :  { %1420 = vmatpush.msra.mxu3 %v3256_v20 }
 0xa81   :  { %1093 = vrot.lane.b32.xlu1 %v1091_v62, %s2749_s0  ;;  %v3262_v62 = vld [vmem:[#allocation9 + $0x60] sm:$0xff] }
 0xa82   :  { %1401 = vmatpush.msra.mxu2 %v3262_v62  ;;  %1881 = vmatpush.msra.mxu0 %v3262_v62 }
 0xaf3   :  { %v1094_v52 = vpop.permute.xlu1 %1093 }
 0xaf4   :  { %1096 = vst.msk [vmem:[#allocation3 + $0x30] sm:$0xff] %vm132_vm0, %v1094_v52  ;;  %2411 = vmatmul.msk.f32.vlgmr.msrb.gmra.mxu2 %vm277_vm11, %v1094_v52  ;;  %2412 = vmatmul.msk.f32.vlgmr.msrb.gmra.mxu3 %vm277_vm11, %v1094_v52 }
 0xaf5   :  { %1097 = vst.msk [vmem:[#allocation3 + $0x8] sm:$0xff] %vm376_vm12, %v1094_v52  ;;  %v3264_v52 = vld [vmem:[#allocation9 + $0x68] sm:$0xff] }
 0xaf6   :  { %1421 = vmatpush.msra.mxu3 %v3264_v52 }
 0xafc   :  { %v1219_v22 = vld [vmem:[#allocation3 + $0x8] sm:$0xff] }
 0xb77   :  { %v1139_v60 = vpop.f32.mrf.mxu2  ;;  %v1159_v27 = vpop.f32.mrf.mxu3 }
 0xb78   :  { %v1162_v23 = vadd.f32 %v1139_v60, %v3656_v1  ;;  %v1163_v36 = vadd.f32 %v1159_v27, %v3657_v63  ;;  %v3268_v60 = vld [vmem:[#allocation9 + $0x50] sm:$0xff]  ;;  %v3270_v1 = vld [vmem:[#allocation9 + $0x58] sm:$0xff]  ;;  %v3296_v63 = vld [vmem:[#allocation9 + $0x28] sm:$0xff] }
 0xb79   :  { %1402 = vmatpush.msra.mxu2 %v3268_v60  ;;  %1422 = vmatpush.msra.mxu3 %v3270_v1  ;;  %v1220_v27 = vld [vmem:[#allocation3 + $0x10] sm:$0xff] }
 0xb7a   :  { %v2413_v24 = vmul.f32 -1.442695, %v1162_v23  ;;  %v2414_v44 = vmul.f32 -1.442695, %v1163_v36  ;;  %v3274_v23 = vld [vmem:[#allocation9 + $0x40] sm:$0xff]  ;;  %1882 = vmatpush.msra.mxu0 %v3268_v60 }
 0xb7b   :  { %1403 = vmatpush.msra.mxu2 %v3274_v23 }
 0xb7c   :  { %2555 = vpow2.f32 %v2413_v24  ;;  %v3276_v24 = vld [vmem:[#allocation9 + $0x48] sm:$0xff]  ;;  %1883 = vmatpush.msra.mxu0 %v3274_v23 }
 0xb7d   :  { %1423 = vmatpush.msra.mxu3 %v3276_v24 }
 0xb82   :  { %v2556_v25 = vpop.eup %2555 }
 0xb83   :  { %v1167_v26 = vadd.f32 1.0, %v2556_v25  ;;  %v3282_v25 = vld [vmem:[#allocation9 + $0x30] sm:$0xff] }
 0xb84   :  { %1404 = vmatpush.msra.mxu2 %v3282_v25  ;;  %1884 = vmatpush.msra.mxu0 %v3282_v25 }
 0xb85   :  { %2557 = vrcp.f32 %v1167_v26  ;;  %v1179_v32 = vand.u32 2147483648, %v1167_v26  ;;  %v1177_v43 = vand.u32 2147483647, %v1167_v26  ;;  %vm1173_vm5 = vweird.f32 %v1167_v26 }
 0xb86   :  { %2559 = vtanh.f32 %v1163_v36  ;;  %v3300_v36 = vld [vmem:[#allocation9 + $0x10] sm:$0xff] }
 0xb87   :  { %v1180_v38 = vor.u32 1.1754944e-38, %v1179_v32  ;;  %vm1178_vm7 = vcmp.eq.f32.partialorder %v1177_v43, 8.507059e+37  ;;  %2561 = vpow2.f32 %v2414_v44  ;;  %v3308_v32 = vld [vmem:[#allocation9 + $0x8] sm:$0xff]  ;;  %v1221_v43 = vld [vmem:[#allocation3 + $0x18] sm:$0xff]  ;;  %v1242_v44 = vld [vmem:[%s3645_s6] sm:$0x3] }
 0xb8b   :  { %v2558_v6 = vpop.eup %2557 }
 0xb8c   :  { %v1169_v53 = vmul.f32 %v2558_v6, %v1167_v26  ;;  %vm1174_vm4 = vweird.f32 %v2558_v6  ;;  %v2560_v3 = vpop.eup %2559  ;;  %v3284_v26 = vld [vmem:[#allocation9 + $0x38] sm:$0xff] }
 0xb8d   :  { %vm1175_vm6 = vmor %vm1173_vm5, %vm1174_vm4  ;;  %v2562_v48 = vpop.eup %2561  ;;  %1424 = vmatpush.msra.mxu3 %v3284_v26 }
 0xb8e   :  { %v1170_v7 = vsub.f32 1.0, %v1169_v53  ;;  %v1187_v56 = vadd.f32 1.0, %v2562_v48  ;;  %v3302_v53 = vld [vmem:[#allocation9 + $0x18] sm:$0xff]  ;;  %v1244_v48 = vperm.slane %v1242_v44, 0 }
 0xb8f   :  { %1425 = vmatpush.msra.mxu3 %v3296_v63 }
 0xb90   :  { %v1171_v34 = vmul.f32 %v2558_v6, %v1170_v7  ;;  %2563 = vrcp.f32 %v1187_v56  ;;  %v1199_v40 = vand.u32 2147483648, %v1187_v56  ;;  %vm1193_vm9 = vweird.f32 %v1187_v56  ;;  %v3306_v7 = vld [vmem:[#allocation9] sm:$0xff] }
 0xb91   :  { %v1197_v10 = vand.u32 2147483647, %v1187_v56  ;;  %1426 = vmatpush.msra.mxu3 %v3302_v53 }
 0xb92   :  { %v1172_v47 = vadd.f32 %v2558_v6, %v1171_v34  ;;  %v1200_v42 = vor.u32 1.1754944e-38, %v1199_v40  ;;  %v3658_v34 = vmov 0.0  }
 0xb93   :  { %vm1198_vm13 = vcmp.eq.f32.partialorder %v1197_v10, 8.507059e+37  ;;  %1427 = vmatpush.msra.mxu3 %v3308_v32 }
 0xb94   :  { %v1176_v55 = vsel %vm1175_vm6, %v2558_v6, %v1172_v47  ;;  %v3294_v6 = vld [vmem:[#allocation9 + $0x20] sm:$0xff]  ;;  %1428 = vmatmul.f32.vlgmr.msra.gmra.mxu3 %v3658_v34 }
 0xb95   :  { %v1181_v54 = vsel %vm1178_vm7, %v1180_v38, %v1176_v55  ;;  %1405 = vmatpush.msra.mxu2 %v3294_v6  ;;  %1885 = vmatpush.msra.mxu0 %v3294_v6  ;;  %v1222_v47 = vld [vmem:[#allocation3 + $0x20] sm:$0xff]  ;;  %v1223_v38 = vld [vmem:[#allocation3 + $0x28] sm:$0xff]  ;;  %v1224_v55 = vld [vmem:[#allocation3 + $0x30] sm:$0xff] }
 0xb96   :  { %v1204_v37 = vmul.f32 %v2560_v3, %v1181_v54  ;;  %v2564_v35 = vpop.eup %2563  ;;  %v1203_v41 = vmul.f32 %v1181_v54, %v3229_v17  ;;  %v1229_v17 = vld [vmem:[#allocation7 + $0x18] sm:$0xff]  ;;  %1540 = vmatpush.msrb.mxu3 %v3256_v20 }
 0xb97   :  { %v1189_v21 = vmul.f32 %v2564_v35, %v1187_v56  ;;  %vm1194_vm8 = vweird.f32 %v2564_v35  ;;  %1327 = vmatpush.msrb.mxu1 %v1229_v17  ;;  %1406 = vmatpush.msra.mxu2 %v3300_v36  ;;  %v1245_v56 = vperm.slane %v1242_v44, 1 }
 0xb98   :  { %1206 = vrot.lane.b32.xlu2 %v1204_v37, %s2749_s0  ;;  %vm1195_vm10 = vmor %vm1193_vm9, %vm1194_vm8  ;;  %1541 = vmatpush.msrb.mxu3 %v3264_v52 }
 0xb99   :  { %v1190_v45 = vsub.f32 1.0, %v1189_v21  ;;  %1328 = vmatpush.msrb.mxu1 %v1227_v51  ;;  %1407 = vmatpush.msra.mxu2 %v3306_v7 }
 0xb9a   :  { %1408 = vmatmul.f32.vlgmr.msra.gmra.mxu2 %v3658_v34  ;;  %1886 = vmatpush.msra.mxu0 %v3300_v36 }
 0xb9b   :  { %v1191_v4 = vmul.f32 %v2564_v35, %v1190_v45  ;;  %1900 = vmatpush.msra.mxu1 %v3256_v20  ;;  %1520 = vmatpush.msrb.mxu2 %v3254_v19 }
 0xb9c   :  { %1542 = vmatpush.msrb.mxu3 %v3270_v1  ;;  %1887 = vmatpush.msra.mxu0 %v3306_v7 }
 0xb9d   :  { %v1192_v8 = vadd.f32 %v2564_v35, %v1191_v4  ;;  %1901 = vmatpush.msra.mxu1 %v3264_v52  ;;  %1521 = vmatpush.msrb.mxu2 %v3262_v62 }
 0xb9e   :  { %1543 = vmatpush.msrb.mxu3 %v3276_v24 }
 0xb9f   :  { %v1196_v11 = vsel %vm1195_vm10, %v2564_v35, %v1192_v8  ;;  %1902 = vmatpush.msra.mxu1 %v3270_v1  ;;  %1522 = vmatpush.msrb.mxu2 %v3268_v60 }
 0xba0   :  { %v1201_v13 = vsel %vm1198_vm13, %v1200_v42, %v1196_v11  ;;  %1544 = vmatpush.msrb.mxu3 %v3284_v26 }
 0xba1   :  { %1903 = vmatpush.msra.mxu1 %v3276_v24  ;;  %1523 = vmatpush.msrb.mxu2 %v3274_v23 }
 0xba2   :  { %1545 = vmatpush.msrb.mxu3 %v3296_v63 }
 0xba3   :  { %1904 = vmatpush.msra.mxu1 %v3284_v26  ;;  %1524 = vmatpush.msrb.mxu2 %v3282_v25 }
 0xba4   :  { %1546 = vmatpush.msrb.mxu3 %v3302_v53 }
 0xba5   :  { %1905 = vmatpush.msra.mxu1 %v3296_v63  ;;  %1525 = vmatpush.msrb.mxu2 %v3294_v6 }
 0xba6   :  { %1547 = vmatpush.msrb.mxu3 %v3308_v32 }
 0xba7   :  { %1906 = vmatpush.msra.mxu1 %v3302_v53  ;;  %1526 = vmatpush.msrb.mxu2 %v3300_v36 }
 0xba8   :  { %1660 = vmatpush.msra.mxu3 %v3256_v20 }
 0xba9   :  { %1907 = vmatpush.msra.mxu1 %v3308_v32  ;;  %1527 = vmatpush.msrb.mxu2 %v3306_v7 }
 0xbaa   :  { %1661 = vmatpush.msra.mxu3 %v3264_v52 }
 0xbab   :  { %1640 = vmatpush.msra.mxu2 %v3254_v19 }
 0xbac   :  { %1662 = vmatpush.msra.mxu3 %v3270_v1 }
 0xbad   :  { %1641 = vmatpush.msra.mxu2 %v3262_v62 }
 0xbae   :  { %1663 = vmatpush.msra.mxu3 %v3276_v24 }
 0xbaf   :  { %1642 = vmatpush.msra.mxu2 %v3268_v60 }
 0xbb0   :  { %1664 = vmatpush.msra.mxu3 %v3284_v26 }
 0xbb1   :  { %1643 = vmatpush.msra.mxu2 %v3274_v23 }
 0xbb2   :  { %1665 = vmatpush.msra.mxu3 %v3296_v63 }
 0xbb3   :  { %1644 = vmatpush.msra.mxu2 %v3282_v25 }
 0xbb4   :  { %1666 = vmatpush.msra.mxu3 %v3302_v53 }
 0xbb5   :  { %1645 = vmatpush.msra.mxu2 %v3294_v6 }
 0xbb6   :  { %1667 = vmatpush.msra.mxu3 %v3308_v32 }
 0xbb7   :  { %1646 = vmatpush.msra.mxu2 %v3300_v36 }
 0xbb9   :  { %1647 = vmatpush.msra.mxu2 %v3306_v7 }
 0xbf2   :  { %v1207_v28 = vpop.permute.xlu2 %1206 }
 0xbf3   :  { %v1209_v33 = vadd.f32 %v1207_v28, %v1203_v41 }
 0xbf5   :  { %2565 = vtanh.f32 %v1209_v33 }
 0xbfb   :  { %v2566_v30 = vpop.eup %2565 }
 0xbfc   :  { %v1211_v46 = vmul.f32 %v2566_v30, %v1201_v13 }
 0xbfe   :  { %1213 = vrot.lane.b32.xlu0 %v1211_v46, %s2749_s0 }
 0xc70   :  { %v1214_v59 = vpop.permute.xlu0 %1213 }
 0xc71   :  { %1216 = vst.msk [vmem:[#allocation3 + $0x38] sm:$0xff] %vm132_vm0, %v1214_v59 }
 0xc72   :  { %1217 = vst.msk [vmem:[#allocation3] sm:$0xff] %vm376_vm12, %v1214_v59 }
 0xc78   :  { %v1225_v3 = vld [vmem:[#allocation3 + $0x38] sm:$0xff] }
 0xc79   :  { %v1218_v0 = vld [vmem:[#allocation3] sm:$0xff] }
 0xc7a   :  { %2415 = vmatmul.msk.f32.vlgmr.msrb.gmra.mxu0 %vm277_vm11, %v1218_v0  ;;  %2423 = vmatmul.msk.f32.vlgmr.msrb.gmra.mxu1 %vm277_vm11, %v1218_v0 }
 0xc82   :  { %2416 = vmatmul.msk.f32.gmra.mxu0 %vm277_vm11, %v1219_v22  ;;  %2424 = vmatmul.msk.f32.gmra.mxu1 %vm277_vm11, %v1219_v22 }
 0xc8a   :  { %2417 = vmatmul.msk.f32.gmra.mxu0 %vm277_vm11, %v1220_v27  ;;  %2425 = vmatmul.msk.f32.gmra.mxu1 %vm277_vm11, %v1220_v27 }
 0xc92   :  { %2418 = vmatmul.msk.f32.gmra.mxu0 %vm277_vm11, %v1221_v43  ;;  %2426 = vmatmul.msk.f32.gmra.mxu1 %vm277_vm11, %v1221_v43 }
 0xc9a   :  { %2419 = vmatmul.msk.f32.gmra.mxu0 %vm277_vm11, %v1222_v47  ;;  %2427 = vmatmul.msk.f32.gmra.mxu1 %vm277_vm11, %v1222_v47 }
 0xca2   :  { %2420 = vmatmul.msk.f32.gmra.mxu0 %vm277_vm11, %v1223_v38  ;;  %2428 = vmatmul.msk.f32.gmra.mxu1 %vm277_vm11, %v1223_v38 }
 0xcaa   :  { %2421 = vmatmul.msk.f32.gmra.mxu0 %vm277_vm11, %v1224_v55  ;;  %2429 = vmatmul.msk.f32.gmra.mxu1 %vm277_vm11, %v1224_v55 }
 0xcb2   :  { %2422 = vmatmul.msk.f32.gmra.mxu0 %vm277_vm11, %v1225_v3  ;;  %2430 = vmatmul.msk.f32.gmra.mxu1 %vm277_vm11, %v1225_v3 }
 0xcf7   :  { %v1289_v54 = vpop.f32.mrf.mxu0  ;;  %v1330_v37 = vpop.f32.mrf.mxu1 }
 0xcf8   :  { %v3441_v38 = vadd.f32 %v1289_v54, %v1244_v48  ;;  %v3443_v55 = vadd.f32 %v1330_v37, %v1245_v56 }
 0xcff   :  { %v1292_v12 = vpop.f32.mrf.mxu0  ;;  %v1333_v29 = vpop.f32.mrf.mxu1 }
 0xd00   :  { %v3369_v39 = vadd.f32 %v1292_v12, %v1244_v48  ;;  %v3371_v31 = vadd.f32 %v1333_v29, %v1245_v56  ;;  %v1409_v12 = vpop.f32.mrf.mxu2 }
 0xd07   :  { %v1295_v2 = vpop.f32.mrf.mxu0  ;;  %v1336_v49 = vpop.f32.mrf.mxu1 }
 0xd08   :  { %v3373_v50 = vadd.f32 %v1295_v2, %v1244_v48  ;;  %v3375_v57 = vadd.f32 %v1336_v49, %v1245_v56 }
 0xd0f   :  { %v1298_v35 = vpop.f32.mrf.mxu0  ;;  %v1339_v21 = vpop.f32.mrf.mxu1 }
 0xd10   :  { %v3377_v45 = vadd.f32 %v1298_v35, %v1244_v48  ;;  %v3379_v4 = vadd.f32 %v1339_v21, %v1245_v56  ;;  %v1429_v21 = vpop.f32.mrf.mxu3 }
 0xd17   :  { %v1301_v41 = vpop.f32.mrf.mxu0  ;;  %v1342_v28 = vpop.f32.mrf.mxu1 }
 0xd18   :  { %v3381_v33 = vadd.f32 %v1301_v41, %v1244_v48  ;;  %v3383_v8 = vadd.f32 %v1342_v28, %v1245_v56 }
 0xd1a   :  { %v1732_v40 = vsel %vm2989_vm1, %v3377_v45, %v3381_v33  ;;  %v1733_v10 = vsel %vm2997_vm2, %v3379_v4, %v3383_v8  ;;  %v1852_v11 = vsel %vm2989_vm1, %v3381_v33, %v3377_v45  ;;  %v1853_v42 = vsel %vm2997_vm2, %v3383_v8, %v3379_v4 }
 0xd1f   :  { %v1304_v30 = vpop.f32.mrf.mxu0  ;;  %v1345_v13 = vpop.f32.mrf.mxu1 }
 0xd20   :  { %v3401_v46 = vadd.f32 %v1304_v30, %v1244_v48  ;;  %v3403_v5 = vadd.f32 %v1345_v13, %v1245_v56 }
 0xd22   :  { %v1612_v9 = vsel %vm2989_vm1, %v3373_v50, %v3401_v46  ;;  %v1613_v14 = vsel %vm2997_vm2, %v3375_v57, %v3403_v5  ;;  %v1972_v15 = vsel %vm2989_vm1, %v3401_v46, %v3373_v50  ;;  %v1973_v16 = vsel %vm2997_vm2, %v3403_v5, %v3375_v57 }
 0xd27   :  { %v1307_v17 = vpop.f32.mrf.mxu0  ;;  %v1348_v18 = vpop.f32.mrf.mxu1 }
 0xd28   :  { %v3421_v51 = vadd.f32 %v1307_v17, %v1244_v48  ;;  %v3423_v59 = vadd.f32 %v1348_v18, %v1245_v56 }
 0xd2a   :  { %v1492_v0 = vsel %vm2989_vm1, %v3369_v39, %v3421_v51  ;;  %v1493_v22 = vsel %vm2997_vm2, %v3371_v31, %v3423_v59 }
 0xd2f   :  { %v1310_v43 = vpop.f32.mrf.mxu0  ;;  %v1351_v47 = vpop.f32.mrf.mxu1 }
 0xd30   :  { %v3445_v3 = vadd.f32 %v1310_v43, %v1244_v48  ;;  %v3447_v44 = vadd.f32 %v1351_v47, %v1245_v56 }
 0xd32   :  { %v1374_v29 = vsel %vm2989_vm1, %v3441_v38, %v3445_v3  ;;  %v1375_v35 = vsel %vm2997_vm2, %v3443_v55, %v3447_v44 }
 0xd33   :  { %v1432_v37 = vadd.f32 %v1409_v12, %v1374_v29  ;;  %v1433_v28 = vadd.f32 %v1429_v21, %v1375_v35 }
 0xd35   :  { %v2431_v48 = vmul.f32 -1.442695, %v1432_v37  ;;  %v2432_v54 = vmul.f32 -1.442695, %v1433_v28 }
 0xd37   :  { %2567 = vpow2.f32 %v2431_v48 }
 0xd3d   :  { %v2568_v56 = vpop.eup %2567 }
 0xd3e   :  { %v1437_v49 = vadd.f32 1.0, %v2568_v56 }
 0xd40   :  { %2569 = vrcp.f32 %v1437_v49  ;;  %v1449_v17 = vand.u32 2147483648, %v1437_v49  ;;  %v1447_v43 = vand.u32 2147483647, %v1437_v49  ;;  %vm1443_vm15 = vweird.f32 %v1437_v49 }
 0xd41   :  { %2571 = vtanh.f32 %v1433_v28 }
 0xd42   :  { %v1450_v12 = vor.u32 1.1754944e-38, %v1449_v17  ;;  %vm1448_vm4 = vcmp.eq.f32.partialorder %v1447_v43, 8.507059e+37  ;;  %2573 = vpow2.f32 %v2432_v54 }
 0xd46   :  { %v2570_v41 = vpop.eup %2569 }
 0xd47   :  { %v1439_v30 = vmul.f32 %v2570_v41, %v1437_v49  ;;  %vm1444_vm14 = vweird.f32 %v2570_v41  ;;  %v2572_v37 = vpop.eup %2571 }
 0xd48   :  { %vm1445_vm3 = vmor %vm1443_vm15, %vm1444_vm14  ;;  %v2574_v35 = vpop.eup %2573 }
 0xd49   :  { %v1440_v13 = vsub.f32 1.0, %v1439_v30  ;;  %v1457_v21 = vadd.f32 1.0, %v2574_v35 }
 0xd4b   :  { %v1441_v18 = vmul.f32 %v2570_v41, %v1440_v13  ;;  %2575 = vrcp.f32 %v1457_v21  ;;  %v1469_v17 = vand.u32 2147483648, %v1457_v21  ;;  %vm1463_vm6 = vweird.f32 %v1457_v21 }
 0xd4c   :  { %v1467_v43 = vand.u32 2147483647, %v1457_v21 }
 0xd4d   :  { %v1442_v47 = vadd.f32 %v2570_v41, %v1441_v18  ;;  %v1470_v28 = vor.u32 1.1754944e-38, %v1469_v17 }
 0xd4e   :  { %vm1468_vm8 = vcmp.eq.f32.partialorder %v1467_v43, 8.507059e+37 }
 0xd4f   :  { %v1446_v29 = vsel %vm1445_vm3, %v2570_v41, %v1442_v47 }
 0xd50   :  { %v1451_v48 = vsel %vm1448_vm4, %v1450_v12, %v1446_v29 }
 0xd51   :  { %v1474_v56 = vmul.f32 %v2572_v37, %v1451_v48  ;;  %v2576_v30 = vpop.eup %2575  ;;  %v1473_v18 = vmul.f32 0.0, %v1451_v48 }
 0xd52   :  { %v1459_v13 = vmul.f32 %v2576_v30, %v1457_v21  ;;  %vm1464_vm5 = vweird.f32 %v2576_v30 }
 0xd53   :  { %1476 = vrot.lane.b32.xlu1 %v1474_v56, %s2749_s0  ;;  %vm1465_vm7 = vmor %vm1463_vm6, %vm1464_vm5 }
 0xd54   :  { %v1460_v2 = vsub.f32 1.0, %v1459_v13 }
 0xd56   :  { %v1461_v34 = vmul.f32 %v2576_v30, %v1460_v2 }
 0xd58   :  { %v1462_v41 = vadd.f32 %v2576_v30, %v1461_v34 }
 0xd5a   :  { %v1466_v54 = vsel %vm1465_vm7, %v2576_v30, %v1462_v41 }
 0xd5b   :  { %v1471_v12 = vsel %vm1468_vm8, %v1470_v28, %v1466_v54 }
 0xdc5   :  { %v1477_v49 = vpop.permute.xlu1 %1476 }
 0xdc6   :  { %v3466_v27 = vadd.f32 %v1477_v49, %v1473_v18 }
 0xdc8   :  { %2577 = vtanh.f32 %v3466_v27 }
 0xdce   :  { %v2578_v47 = vpop.eup %2577 }
 0xdcf   :  { %v1481_v29 = vmul.f32 %v2578_v47, %v1471_v12 }
 0xdd1   :  { %1483 = vrot.lane.b32.xlu2 %v1481_v29, %s2749_s0 }
 0xe2b   :  { %v1484_v2 = vpop.permute.xlu2 %1483 }
 0xe2c   :  { %1486 = vst.msk [vmem:[#allocation3] sm:$0xff] %vm132_vm0, %v1484_v2  ;;  %2433 = vmatmul.msk.f32.vlgmr.msrb.gmra.mxu2 %vm277_vm11, %v1484_v2  ;;  %2434 = vmatmul.msk.f32.vlgmr.msrb.gmra.mxu3 %vm277_vm11, %v1484_v2 }
 0xe2d   :  { %1487 = vst.msk [vmem:[#allocation3 + $0x38] sm:$0xff] %vm376_vm12, %v1484_v2  ;;  %1760 = vmatpush.msrb.mxu2 %v3254_v19  ;;  %1780 = vmatpush.msrb.mxu3 %v3256_v20 }
 0xe2f   :  { %1761 = vmatpush.msrb.mxu2 %v3262_v62  ;;  %1781 = vmatpush.msrb.mxu3 %v3264_v52 }
 0xe31   :  { %1762 = vmatpush.msrb.mxu2 %v3268_v60  ;;  %1782 = vmatpush.msrb.mxu3 %v3270_v1 }
 0xe33   :  { %1763 = vmatpush.msrb.mxu2 %v3274_v23  ;;  %1783 = vmatpush.msrb.mxu3 %v3276_v24 }
 0xe35   :  { %1764 = vmatpush.msrb.mxu2 %v3282_v25  ;;  %1784 = vmatpush.msrb.mxu3 %v3284_v26 }
 0xe37   :  { %1765 = vmatpush.msrb.mxu2 %v3294_v6  ;;  %1785 = vmatpush.msrb.mxu3 %v3296_v63 }
 0xe39   :  { %1766 = vmatpush.msrb.mxu2 %v3300_v36  ;;  %1786 = vmatpush.msrb.mxu3 %v3302_v53 }
 0xe3b   :  { %1767 = vmatpush.msrb.mxu2 %v3306_v7  ;;  %1787 = vmatpush.msrb.mxu3 %v3308_v32 }
 0xeaf   :  { %v1529_v34 = vpop.f32.mrf.mxu2  ;;  %v1549_v21 = vpop.f32.mrf.mxu3 }
 0xeb0   :  { %v1552_v37 = vadd.f32 %v1529_v34, %v1492_v0  ;;  %v1553_v13 = vadd.f32 %v1549_v21, %v1493_v22 }
 0xeb2   :  { %v2435_v48 = vmul.f32 -1.442695, %v1552_v37  ;;  %v2436_v2 = vmul.f32 -1.442695, %v1553_v13 }
 0xeb4   :  { %2579 = vpow2.f32 %v2435_v48 }
 0xeba   :  { %v2580_v56 = vpop.eup %2579 }
 0xebb   :  { %v1557_v35 = vadd.f32 1.0, %v2580_v56 }
 0xebd   :  { %2581 = vrcp.f32 %v1557_v35  ;;  %v1569_v41 = vand.u32 2147483648, %v1557_v35  ;;  %v1567_v0 = vand.u32 2147483647, %v1557_v35  ;;  %vm1563_vm10 = vweird.f32 %v1557_v35 }
 0xebe   :  { %2583 = vtanh.f32 %v1553_v13 }
 0xebf   :  { %v1570_v54 = vor.u32 1.1754944e-38, %v1569_v41  ;;  %vm1568_vm14 = vcmp.eq.f32.partialorder %v1567_v0, 8.507059e+37  ;;  %2585 = vpow2.f32 %v2436_v2 }
 0xec3   :  { %v2582_v30 = vpop.eup %2581 }
 0xec4   :  { %v1559_v18 = vmul.f32 %v2582_v30, %v1557_v35  ;;  %vm1564_vm9 = vweird.f32 %v2582_v30  ;;  %v2584_v47 = vpop.eup %2583 }
 0xec5   :  { %vm1565_vm13 = vmor %vm1563_vm10, %vm1564_vm9  ;;  %v2586_v22 = vpop.eup %2585 }
 0xec6   :  { %v1560_v49 = vsub.f32 1.0, %v1559_v18  ;;  %v1577_v34 = vadd.f32 1.0, %v2586_v22 }
 0xec8   :  { %v1561_v17 = vmul.f32 %v2582_v30, %v1560_v49  ;;  %2587 = vrcp.f32 %v1577_v34  ;;  %v1589_v41 = vand.u32 2147483648, %v1577_v34  ;;  %vm1583_vm3 = vweird.f32 %v1577_v34 }
 0xec9   :  { %v1587_v13 = vand.u32 2147483647, %v1577_v34 }
 0xeca   :  { %v1562_v43 = vadd.f32 %v2582_v30, %v1561_v17  ;;  %v1590_v0 = vor.u32 1.1754944e-38, %v1589_v41 }
 0xecb   :  { %vm1588_vm5 = vcmp.eq.f32.partialorder %v1587_v13, 8.507059e+37 }
 0xecc   :  { %v1566_v28 = vsel %vm1565_vm13, %v2582_v30, %v1562_v43 }
 0xecd   :  { %v1571_v12 = vsel %vm1568_vm14, %v1570_v54, %v1566_v28 }
 0xece   :  { %v1594_v29 = vmul.f32 %v2584_v47, %v1571_v12  ;;  %v2588_v37 = vpop.eup %2587  ;;  %v1593_v35 = vmul.f32 %v1571_v12, %v3466_v27 }
 0xecf   :  { %v1579_v48 = vmul.f32 %v2588_v37, %v1577_v34  ;;  %vm1584_vm15 = vweird.f32 %v2588_v37 }
 0xed0   :  { %1596 = vrot.lane.b32.xlu0 %v1594_v29, %s2749_s0  ;;  %vm1585_vm4 = vmor %vm1583_vm3, %vm1584_vm15 }
 0xed1   :  { %v1580_v56 = vsub.f32 1.0, %v1579_v48 }
 0xed3   :  { %v1581_v21 = vmul.f32 %v2588_v37, %v1580_v56 }
 0xed5   :  { %v1582_v30 = vadd.f32 %v2588_v37, %v1581_v21 }
 0xed7   :  { %v1586_v17 = vsel %vm1585_vm4, %v2588_v37, %v1582_v30 }
 0xed8   :  { %v1591_v54 = vsel %vm1588_vm5, %v1590_v0, %v1586_v17 }
 0xf42   :  { %v1597_v18 = vpop.permute.xlu0 %1596 }
 0xf43   :  { %v3502_v49 = vadd.f32 %v1597_v18, %v1593_v35 }
 0xf45   :  { %2589 = vtanh.f32 %v3502_v49 }
 0xf4b   :  { %v2590_v43 = vpop.eup %2589 }
 0xf4c   :  { %v1601_v28 = vmul.f32 %v2590_v43, %v1591_v54 }
 0xf4e   :  { %1603 = vrot.lane.b32.xlu1 %v1601_v28, %s2749_s0 }
 0xfc0   :  { %v1604_v27 = vpop.permute.xlu1 %1603 }
 0xfc1   :  { %1606 = vst.msk [vmem:[#allocation3 + $0x8] sm:$0xff] %vm132_vm0, %v1604_v27  ;;  %2437 = vmatmul.msk.f32.vlgmr.msra.gmra.mxu2 %vm277_vm11, %v1604_v27  ;;  %2438 = vmatmul.msk.f32.vlgmr.msra.gmra.mxu3 %vm277_vm11, %v1604_v27 }
 0xfc2   :  { %1607 = vst.msk [vmem:[#allocation3 + $0x30] sm:$0xff] %vm376_vm12, %v1604_v27  ;;  %2000 = vmatpush.msra.mxu2 %v3254_v19  ;;  %2020 = vmatpush.msra.mxu3 %v3256_v20 }
 0xfc4   :  { %2001 = vmatpush.msra.mxu2 %v3262_v62  ;;  %2021 = vmatpush.msra.mxu3 %v3264_v52 }
 0xfc6   :  { %2002 = vmatpush.msra.mxu2 %v3268_v60  ;;  %2022 = vmatpush.msra.mxu3 %v3270_v1 }
 0xfc8   :  { %2003 = vmatpush.msra.mxu2 %v3274_v23  ;;  %2023 = vmatpush.msra.mxu3 %v3276_v24 }
 0xfca   :  { %2004 = vmatpush.msra.mxu2 %v3282_v25  ;;  %2024 = vmatpush.msra.mxu3 %v3284_v26 }
 0xfcc   :  { %2005 = vmatpush.msra.mxu2 %v3294_v6  ;;  %2025 = vmatpush.msra.mxu3 %v3296_v63 }
 0xfce   :  { %2006 = vmatpush.msra.mxu2 %v3300_v36  ;;  %2026 = vmatpush.msra.mxu3 %v3302_v53 }
 0xfd0   :  { %2007 = vmatpush.msra.mxu2 %v3306_v7  ;;  %2027 = vmatpush.msra.mxu3 %v3308_v32 }
0x1044   :  { %v1649_v19 = vpop.f32.mrf.mxu2  ;;  %v1669_v1 = vpop.f32.mrf.mxu3 }
0x1045   :  { %v1672_v20 = vadd.f32 %v1649_v19, %v1612_v9  ;;  %v1673_v24 = vadd.f32 %v1669_v1, %v1613_v14 }
0x1047   :  { %v2439_v62 = vmul.f32 -1.442695, %v1672_v20  ;;  %v2440_v29 = vmul.f32 -1.442695, %v1673_v24 }
0x1049   :  { %2591 = vpow2.f32 %v2439_v62 }
0x104f   :  { %v2592_v52 = vpop.eup %2591 }
0x1050   :  { %v1677_v60 = vadd.f32 1.0, %v2592_v52 }
0x1052   :  { %2593 = vrcp.f32 %v1677_v60  ;;  %v1689_v6 = vand.u32 2147483648, %v1677_v60  ;;  %v1687_v36 = vand.u32 2147483647, %v1677_v60  ;;  %vm1683_vm7 = vweird.f32 %v1677_v60 }
0x1053   :  { %2595 = vtanh.f32 %v1673_v24 }
0x1054   :  { %v1690_v7 = vor.u32 1.1754944e-38, %v1689_v6  ;;  %vm1688_vm9 = vcmp.eq.f32.partialorder %v1687_v36, 8.507059e+37  ;;  %2597 = vpow2.f32 %v2440_v29 }
0x1058   :  { %v2594_v23 = vpop.eup %2593 }
0x1059   :  { %v1679_v25 = vmul.f32 %v2594_v23, %v1677_v60  ;;  %vm1684_vm6 = vweird.f32 %v2594_v23  ;;  %v2596_v9 = vpop.eup %2595 }
0x105a   :  { %vm1685_vm8 = vmor %vm1683_vm7, %vm1684_vm6  ;;  %v2598_v14 = vpop.eup %2597 }
0x105b   :  { %v1680_v26 = vsub.f32 1.0, %v1679_v25  ;;  %v1697_v2 = vadd.f32 1.0, %v2598_v14 }
0x105d   :  { %v1681_v63 = vmul.f32 %v2594_v23, %v1680_v26  ;;  %2599 = vrcp.f32 %v1697_v2  ;;  %v1709_v30 = vand.u32 2147483648, %v1697_v2  ;;  %vm1703_vm13 = vweird.f32 %v1697_v2 }
0x105e   :  { %v1707_v41 = vand.u32 2147483647, %v1697_v2 }
0x105f   :  { %v1682_v53 = vadd.f32 %v2594_v23, %v1681_v63  ;;  %v1710_v17 = vor.u32 1.1754944e-38, %v1709_v30 }
0x1060   :  { %vm1708_vm15 = vcmp.eq.f32.partialorder %v1707_v41, 8.507059e+37 }
0x1061   :  { %v1686_v32 = vsel %vm1685_vm8, %v2594_v23, %v1682_v53 }
0x1062   :  { %v1691_v47 = vsel %vm1688_vm9, %v1690_v7, %v1686_v32 }
0x1063   :  { %v1714_v12 = vmul.f32 %v2596_v9, %v1691_v47  ;;  %v2600_v22 = vpop.eup %2599  ;;  %v1713_v56 = vmul.f32 %v1691_v47, %v3502_v49 }
0x1064   :  { %v1699_v34 = vmul.f32 %v2600_v22, %v1697_v2  ;;  %vm1704_vm10 = vweird.f32 %v2600_v22 }
0x1065   :  { %1716 = vrot.lane.b32.xlu2 %v1714_v12, %s2749_s0  ;;  %vm1705_vm14 = vmor %vm1703_vm13, %vm1704_vm10 }
0x1066   :  { %v1700_v37 = vsub.f32 1.0, %v1699_v34 }
0x1068   :  { %v1701_v48 = vmul.f32 %v2600_v22, %v1700_v37 }
0x106a   :  { %v1702_v18 = vadd.f32 %v2600_v22, %v1701_v48 }
0x106c   :  { %v1706_v13 = vsel %vm1705_vm14, %v2600_v22, %v1702_v18 }
0x106d   :  { %v1711_v43 = vsel %vm1708_vm15, %v1710_v17, %v1706_v13 }
0x10bf   :  { %v1717_v21 = vpop.permute.xlu2 %1716 }
0x10c0   :  { %v1719_v35 = vadd.f32 %v1717_v21, %v1713_v56 }
0x10c2   :  { %2601 = vtanh.f32 %v1719_v35 }
0x10c8   :  { %v2602_v0 = vpop.eup %2601 }
0x10c9   :  { %v1721_v54 = vmul.f32 %v2602_v0, %v1711_v43 }
0x10cb   :  { %1723 = vrot.lane.b32.xlu0 %v1721_v54, %s2749_s0 }
0x113d   :  { %v1724_v28 = vpop.permute.xlu0 %1723 }
0x113e   :  { %1726 = vst.msk [vmem:[#allocation3 + $0x10] sm:$0xff] %vm132_vm0, %v1724_v28  ;;  %2441 = vmatmul.msk.f32.vlgmr.msrb.gmra.mxu2 %vm277_vm11, %v1724_v28  ;;  %2442 = vmatmul.msk.f32.vlgmr.msrb.gmra.mxu3 %vm277_vm11, %v1724_v28 }
0x113f   :  { %1727 = vst.msk [vmem:[#allocation3 + $0x28] sm:$0xff] %vm376_vm12, %v1724_v28 }
0x11c1   :  { %v1769_v49 = vpop.f32.mrf.mxu2  ;;  %v1789_v52 = vpop.f32.mrf.mxu3 }
0x11c2   :  { %v1792_v27 = vadd.f32 %v1769_v49, %v1732_v40  ;;  %v1793_v1 = vadd.f32 %v1789_v52, %v1733_v10 }
0x11c4   :  { %v2443_v19 = vmul.f32 -1.442695, %v1792_v27  ;;  %v2444_v9 = vmul.f32 -1.442695, %v1793_v1 }
0x11c6   :  { %2603 = vpow2.f32 %v2443_v19 }
0x11cc   :  { %v2604_v20 = vpop.eup %2603 }
0x11cd   :  { %v1797_v62 = vadd.f32 1.0, %v2604_v20 }
0x11cf   :  { %2605 = vrcp.f32 %v1797_v62  ;;  %v1809_v25 = vand.u32 2147483648, %v1797_v62  ;;  %v1807_v40 = vand.u32 2147483647, %v1797_v62  ;;  %vm1803_vm4 = vweird.f32 %v1797_v62 }
0x11d0   :  { %2607 = vtanh.f32 %v1793_v1 }
0x11d1   :  { %v1810_v63 = vor.u32 1.1754944e-38, %v1809_v25  ;;  %vm1808_vm6 = vcmp.eq.f32.partialorder %v1807_v40, 8.507059e+37  ;;  %2609 = vpow2.f32 %v2444_v9 }
0x11d5   :  { %v2606_v60 = vpop.eup %2605 }
0x11d6   :  { %v1799_v23 = vmul.f32 %v2606_v60, %v1797_v62  ;;  %vm1804_vm3 = vweird.f32 %v2606_v60  ;;  %v2608_v53 = vpop.eup %2607 }
0x11d7   :  { %vm1805_vm5 = vmor %vm1803_vm4, %vm1804_vm3  ;;  %v2610_v10 = vpop.eup %2609 }
0x11d8   :  { %v1800_v24 = vsub.f32 1.0, %v1799_v23  ;;  %v1817_v47 = vadd.f32 1.0, %v2610_v10 }
0x11da   :  { %v1801_v26 = vmul.f32 %v2606_v60, %v1800_v24  ;;  %2611 = vrcp.f32 %v1817_v47  ;;  %v1829_v56 = vand.u32 2147483648, %v1817_v47  ;;  %vm1823_vm8 = vweird.f32 %v1817_v47 }
0x11db   :  { %v1827_v21 = vand.u32 2147483647, %v1817_v47 }
0x11dc   :  { %v1802_v6 = vadd.f32 %v2606_v60, %v1801_v26  ;;  %v1830_v30 = vor.u32 1.1754944e-38, %v1829_v56 }
0x11dd   :  { %vm1828_vm10 = vcmp.eq.f32.partialorder %v1827_v21, 8.507059e+37 }
0x11de   :  { %v1806_v36 = vsel %vm1805_vm5, %v2606_v60, %v1802_v6 }
0x11df   :  { %v1811_v7 = vsel %vm1808_vm6, %v1810_v63, %v1806_v36 }
0x11e0   :  { %v1834_v32 = vmul.f32 %v2608_v53, %v1811_v7  ;;  %v2612_v12 = vpop.eup %2611  ;;  %v1833_v22 = vmul.f32 %v1811_v7, %v1719_v35 }
0x11e1   :  { %v1819_v29 = vmul.f32 %v2612_v12, %v1817_v47  ;;  %vm1824_vm7 = vweird.f32 %v2612_v12 }
0x11e2   :  { %1836 = vrot.lane.b32.xlu1 %v1834_v32, %s2749_s0  ;;  %vm1825_vm9 = vmor %vm1823_vm8, %vm1824_vm7 }
0x11e3   :  { %v1820_v14 = vsub.f32 1.0, %v1819_v29 }
0x11e5   :  { %v1821_v2 = vmul.f32 %v2612_v12, %v1820_v14 }
0x11e7   :  { %v1822_v48 = vadd.f32 %v2612_v12, %v1821_v2 }
0x11e9   :  { %v1826_v18 = vsel %vm1825_vm9, %v2612_v12, %v1822_v48 }
0x11ea   :  { %v1831_v13 = vsel %vm1828_vm10, %v1830_v30, %v1826_v18 }
0x1254   :  { %v1837_v34 = vpop.permute.xlu1 %1836 }
0x1255   :  { %v1839_v37 = vadd.f32 %v1837_v34, %v1833_v22 }
0x1257   :  { %2613 = vtanh.f32 %v1839_v37 }
0x125d   :  { %v2614_v41 = vpop.eup %2613 }
0x125e   :  { %v1841_v17 = vmul.f32 %v2614_v41, %v1831_v13 }
0x1260   :  { %1843 = vrot.lane.b32.xlu2 %v1841_v17, %s2749_s0 }
0x12ba   :  { %v1844_v0 = vpop.permute.xlu2 %1843 }
0x12bb   :  { %1846 = vst.msk [vmem:[#allocation3 + $0x18] sm:$0xff] %vm132_vm0, %v1844_v0  ;;  %2445 = vmatmul.msk.f32.vlgmr.msra.gmra.mxu0 %vm277_vm11, %v1844_v0  ;;  %2446 = vmatmul.msk.f32.vlgmr.msra.gmra.mxu1 %vm277_vm11, %v1844_v0 }
0x12bc   :  { %1847 = vst.msk [vmem:[#allocation3 + $0x20] sm:$0xff] %vm376_vm12, %v1844_v0 }
0x1338   :  { %v1889_v35 = vpop.f32.mrf.mxu0  ;;  %v1909_v27 = vpop.f32.mrf.mxu1 }
0x1339   :  { %v1912_v43 = vadd.f32 %v1889_v35, %v1852_v11  ;;  %v1913_v20 = vadd.f32 %v1909_v27, %v1853_v42 }
0x133b   :  { %v2447_v54 = vmul.f32 -1.442695, %v1912_v43  ;;  %v2448_v4 = vmul.f32 -1.442695, %v1913_v20 }
0x133d   :  { %2615 = vpow2.f32 %v2447_v54 }
0x1343   :  { %v2616_v28 = vpop.eup %2615 }
0x1344   :  { %v1917_v49 = vadd.f32 1.0, %v2616_v28 }
0x1346   :  { %2617 = vrcp.f32 %v1917_v49  ;;  %v1929_v60 = vand.u32 2147483648, %v1917_v49  ;;  %v1927_v45 = vand.u32 2147483647, %v1917_v49  ;;  %vm1923_vm14 = vweird.f32 %v1917_v49 }
0x1347   :  { %2619 = vtanh.f32 %v1913_v20  ;;  %v2109_v20 = vld [vmem:[#allocation9 + $0x78] sm:$0xff] }
0x1348   :  { %v1930_v11 = vor.u32 1.1754944e-38, %v1929_v60  ;;  %vm1928_vm3 = vcmp.eq.f32.partialorder %v1927_v45, 8.507059e+37  ;;  %2621 = vpow2.f32 %v2448_v4  ;;  %2140 = vmatpush.msrb.mxu1 %v2109_v20  ;;  %v2104_v60 = vld [vmem:[#allocation9 + $0x50] sm:$0xff]  ;;  %2260 = vmatpush.msrb.mxu3 %v2109_v20  ;;  %v2102_v45 = vld [vmem:[#allocation9 + $0x40] sm:$0xff] }
0x134c   :  { %v2618_v19 = vpop.eup %2617 }
0x134d   :  { %v1919_v62 = vmul.f32 %v2618_v19, %v1917_v49  ;;  %vm1924_vm13 = vweird.f32 %v2618_v19  ;;  %v2620_v24 = vpop.eup %2619 }
0x134e   :  { %vm1925_vm15 = vmor %vm1923_vm14, %vm1924_vm13  ;;  %v2622_v8 = vpop.eup %2621 }
0x134f   :  { %v1920_v52 = vsub.f32 1.0, %v1919_v62  ;;  %v1937_v42 = vadd.f32 1.0, %v2622_v8  ;;  %v2106_v62 = vld [vmem:[#allocation9 + $0x60] sm:$0xff]  ;;  %v2096_v8 = vld [vmem:[#allocation9 + $0x10] sm:$0xff] }
0x1351   :  { %v1921_v1 = vmul.f32 %v2618_v19, %v1920_v52  ;;  %2623 = vrcp.f32 %v1937_v42  ;;  %v1949_v10 = vand.u32 2147483648, %v1937_v42  ;;  %vm1943_vm5 = vweird.f32 %v1937_v42  ;;  %v2107_v52 = vld [vmem:[#allocation9 + $0x68] sm:$0xff] }
0x1352   :  { %v1947_v47 = vand.u32 2147483647, %v1937_v42  ;;  %2141 = vmatpush.msrb.mxu1 %v2107_v52  ;;  %2261 = vmatpush.msrb.mxu3 %v2107_v52 }
0x1353   :  { %v1922_v33 = vadd.f32 %v2618_v19, %v1921_v1  ;;  %v1950_v29 = vor.u32 1.1754944e-38, %v1949_v10  ;;  %v2105_v1 = vld [vmem:[#allocation9 + $0x58] sm:$0xff] }
0x1354   :  { %vm1948_vm7 = vcmp.eq.f32.partialorder %v1947_v47, 8.507059e+37  ;;  %2142 = vmatpush.msrb.mxu1 %v2105_v1  ;;  %2262 = vmatpush.msrb.mxu3 %v2105_v1 }
0x1355   :  { %v1926_v23 = vsel %vm1925_vm15, %v2618_v19, %v1922_v33  ;;  %v2108_v19 = vld [vmem:[#allocation9 + $0x70] sm:$0xff]  ;;  %v2103_v33 = vld [vmem:[#allocation9 + $0x48] sm:$0xff] }
0x1356   :  { %v1931_v25 = vsel %vm1928_vm3, %v1930_v11, %v1926_v23  ;;  %2120 = vmatpush.msrb.mxu0 %v2108_v19  ;;  %2240 = vmatpush.msrb.mxu2 %v2108_v19  ;;  %v2100_v11 = vld [vmem:[#allocation9 + $0x30] sm:$0xff]  ;;  %v2101_v23 = vld [vmem:[#allocation9 + $0x38] sm:$0xff] }
0x1357   :  { %v1954_v26 = vmul.f32 %v2620_v24, %v1931_v25  ;;  %v2624_v40 = vpop.eup %2623  ;;  %v1953_v53 = vmul.f32 %v1931_v25, %v1839_v37  ;;  %2143 = vmatpush.msrb.mxu1 %v2103_v33  ;;  %v2098_v25 = vld [vmem:[#allocation9 + $0x20] sm:$0xff]  ;;  %2263 = vmatpush.msrb.mxu3 %v2103_v33 }
0x1358   :  { %v1939_v6 = vmul.f32 %v2624_v40, %v1937_v42  ;;  %vm1944_vm4 = vweird.f32 %v2624_v40  ;;  %2121 = vmatpush.msrb.mxu0 %v2106_v62  ;;  %2241 = vmatpush.msrb.mxu2 %v2106_v62  ;;  %v2097_v42 = vld [vmem:[#allocation9 + $0x18] sm:$0xff] }
0x1359   :  { %1956 = vrot.lane.b32.xlu0 %v1954_v26, %s2749_s0  ;;  %vm1945_vm6 = vmor %vm1943_vm5, %vm1944_vm4  ;;  %v2099_v26 = vld [vmem:[#allocation9 + $0x28] sm:$0xff]  ;;  %2144 = vmatpush.msrb.mxu1 %v2101_v23 }
0x135a   :  { %v1940_v63 = vsub.f32 1.0, %v1939_v6  ;;  %2122 = vmatpush.msrb.mxu0 %v2104_v60  ;;  %2242 = vmatpush.msrb.mxu2 %v2104_v60  ;;  %v2095_v6 = vld [vmem:[#allocation9 + $0x8] sm:$0xff] }
0x135b   :  { %2264 = vmatpush.msrb.mxu3 %v2101_v23  ;;  %2145 = vmatpush.msrb.mxu1 %v2099_v26 }
0x135c   :  { %v1941_v36 = vmul.f32 %v2624_v40, %v1940_v63  ;;  %2123 = vmatpush.msrb.mxu0 %v2102_v45  ;;  %2243 = vmatpush.msrb.mxu2 %v2102_v45 }
0x135d   :  { %2265 = vmatpush.msrb.mxu3 %v2099_v26  ;;  %2146 = vmatpush.msrb.mxu1 %v2097_v42 }
0x135e   :  { %v1942_v9 = vadd.f32 %v2624_v40, %v1941_v36  ;;  %2124 = vmatpush.msrb.mxu0 %v2100_v11  ;;  %2244 = vmatpush.msrb.mxu2 %v2100_v11 }
0x135f   :  { %2266 = vmatpush.msrb.mxu3 %v2097_v42  ;;  %2147 = vmatpush.msrb.mxu1 %v2095_v6  ;;  %v3661_v42 = vsel %vm2989_vm1, %v3445_v3, %v3441_v38 }
0x1360   :  { %v1946_v12 = vsel %vm1945_vm6, %v2624_v40, %v1942_v9  ;;  %2125 = vmatpush.msrb.mxu0 %v2098_v25  ;;  %v2094_v40 = vld [vmem:[#allocation9] sm:$0xff]  ;;  %2245 = vmatpush.msrb.mxu2 %v2098_v25 }
0x1361   :  { %v1951_v2 = vsel %vm1948_vm7, %v1950_v29, %v1946_v12  ;;  %2267 = vmatpush.msrb.mxu3 %v2095_v6 }
0x1362   :  { %2126 = vmatpush.msrb.mxu0 %v2096_v8  ;;  %2246 = vmatpush.msrb.mxu2 %v2096_v8 }
0x1364   :  { %2127 = vmatpush.msrb.mxu0 %v2094_v40  ;;  %2247 = vmatpush.msrb.mxu2 %v2094_v40 }
0x13cb   :  { %v1957_v7 = vpop.permute.xlu0 %1956 }
0x13cc   :  { %v3570_v32 = vadd.f32 %v1957_v7, %v1953_v53 }
0x13ce   :  { %2625 = vtanh.f32 %v3570_v32 }
0x13d4   :  { %v2626_v14 = vpop.eup %2625 }
0x13d5   :  { %v1961_v22 = vmul.f32 %v2626_v14, %v1951_v2 }
0x13d7   :  { %1963 = vrot.lane.b32.xlu1 %v1961_v22, %s2749_s0 }
0x1449   :  { %v1964_v34 = vpop.permute.xlu1 %1963 }
0x144a   :  { %1966 = vst.msk [vmem:[#allocation3 + $0x20] sm:$0xff] %vm132_vm0, %v1964_v34  ;;  %2449 = vmatmul.msk.f32.vlgmr.msra.gmra.mxu2 %vm277_vm11, %v1964_v34  ;;  %2450 = vmatmul.msk.f32.vlgmr.msra.gmra.mxu3 %vm277_vm11, %v1964_v34 }
0x144b   :  { %1967 = vst.msk [vmem:[#allocation3 + $0x18] sm:$0xff] %vm376_vm12, %v1964_v34 }
0x14cd   :  { %v2009_v37 = vpop.f32.mrf.mxu2  ;;  %v2029_v30 = vpop.f32.mrf.mxu3 }
0x14ce   :  { %v2032_v48 = vadd.f32 %v2009_v37, %v1972_v15  ;;  %v2033_v13 = vadd.f32 %v2029_v30, %v1973_v16 }
0x14d0   :  { %v2451_v56 = vmul.f32 -1.442695, %v2032_v48  ;;  %v2452_v57 = vmul.f32 -1.442695, %v2033_v13  ;;  %v3659_v48 = vsel %vm2989_vm1, %v3421_v51, %v3369_v39 }
0x14d2   :  { %2627 = vpow2.f32 %v2451_v56 }
0x14d8   :  { %v2628_v21 = vpop.eup %2627 }
0x14d9   :  { %v2037_v18 = vadd.f32 1.0, %v2628_v21 }
0x14db   :  { %2629 = vrcp.f32 %v2037_v18  ;;  %v2049_v35 = vand.u32 2147483648, %v2037_v18  ;;  %v2047_v50 = vand.u32 2147483647, %v2037_v18  ;;  %vm2043_vm9 = vweird.f32 %v2037_v18 }
0x14dc   :  { %2631 = vtanh.f32 %v2033_v13 }
0x14dd   :  { %v2050_v15 = vor.u32 1.1754944e-38, %v2049_v35  ;;  %vm2048_vm13 = vcmp.eq.f32.partialorder %v2047_v50, 8.507059e+37  ;;  %2633 = vpow2.f32 %v2452_v57 }
0x14e1   :  { %v2630_v41 = vpop.eup %2629 }
0x14e2   :  { %v2039_v17 = vmul.f32 %v2630_v41, %v2037_v18  ;;  %vm2044_vm8 = vweird.f32 %v2630_v41  ;;  %v2632_v28 = vpop.eup %2631 }
0x14e3   :  { %vm2045_vm10 = vmor %vm2043_vm9, %vm2044_vm8  ;;  %v2634_v5 = vpop.eup %2633 }
0x14e4   :  { %v2040_v0 = vsub.f32 1.0, %v2039_v17  ;;  %v3589_v16 = vadd.f32 1.0, %v2634_v5  ;;  %v3660_v17 = vsel %vm2997_vm2, %v3423_v59, %v3371_v31 }
0x14e6   :  { %v2041_v43 = vmul.f32 %v2630_v41, %v2040_v0  ;;  %2635 = vrcp.f32 %v3589_v16  ;;  %v2069_v47 = vand.u32 2147483648, %v3589_v16  ;;  %vm2063_vm15 = vweird.f32 %v3589_v16 }
0x14e7   :  { %v2067_v12 = vand.u32 2147483647, %v3589_v16 }
0x14e8   :  { %v2042_v46 = vadd.f32 %v2630_v41, %v2041_v43  ;;  %v2070_v14 = vor.u32 1.1754944e-38, %v2069_v47 }
0x14e9   :  { %vm2068_vm4 = vcmp.eq.f32.partialorder %v2067_v12, 8.507059e+37 }
0x14ea   :  { %v2046_v54 = vsel %vm2045_vm10, %v2630_v41, %v2042_v46 }
0x14eb   :  { %v2051_v49 = vsel %vm2048_vm13, %v2050_v15, %v2046_v54 }
0x14ec   :  { %v2074_v27 = vmul.f32 %v2632_v28, %v2051_v49  ;;  %v2636_v24 = vpop.eup %2635  ;;  %v2073_v53 = vmul.f32 %v2051_v49, %v3570_v32 }
0x14ed   :  { %v2059_v4 = vmul.f32 %v2636_v24, %v3589_v16  ;;  %vm2064_vm14 = vweird.f32 %v2636_v24 }
0x14ee   :  { %2076 = vrot.lane.b32.xlu2 %v2074_v27, %s2749_s0  ;;  %vm2065_vm3 = vmor %vm2063_vm15, %vm2064_vm14 }
0x14ef   :  { %v2060_v63 = vsub.f32 1.0, %v2059_v4 }
0x14f1   :  { %v2061_v36 = vmul.f32 %v2636_v24, %v2060_v63 }
0x14f3   :  { %v2062_v10 = vadd.f32 %v2636_v24, %v2061_v36 }
0x14f5   :  { %v2066_v29 = vsel %vm2065_vm3, %v2636_v24, %v2062_v10 }
0x14f6   :  { %v2071_v22 = vsel %vm2068_vm4, %v2070_v14, %v2066_v29 }
0x1548   :  { %v2077_v7 = vpop.permute.xlu2 %2076 }
0x1549   :  { %v2079_v9 = vadd.f32 %v2077_v7, %v2073_v53 }
0x154b   :  { %2637 = vtanh.f32 %v2079_v9 }
0x1551   :  { %v2638_v2 = vpop.eup %2637 }
0x1552   :  { %v2081_v34 = vmul.f32 %v2638_v2, %v2071_v22 }
0x1554   :  { %2083 = vrot.lane.b32.xlu0 %v2081_v34, %s2749_s0 }
0x15c6   :  { %v2084_v32 = vpop.permute.xlu0 %2083 }
0x15c7   :  { %2086 = vst.msk [vmem:[#allocation3 + $0x28] sm:$0xff] %vm132_vm0, %v2084_v32  ;;  %2453 = vmatmul.msk.f32.vlgmr.msrb.gmra.mxu0 %vm277_vm11, %v2084_v32  ;;  %2454 = vmatmul.msk.f32.vlgmr.msrb.gmra.mxu1 %vm277_vm11, %v2084_v32 }
0x15c8   :  { %2087 = vst.msk [vmem:[#allocation3 + $0x10] sm:$0xff] %vm376_vm12, %v2084_v32 }
0x1644   :  { %v2129_v37 = vpop.f32.mrf.mxu0  ;;  %v2149_v41 = vpop.f32.mrf.mxu1 }
0x1645   :  { %v2152_v56 = vadd.f32 %v2129_v37, %v3659_v48  ;;  %v2153_v0 = vadd.f32 %v2149_v41, %v3660_v17 }
0x1647   :  { %v2455_v21 = vmul.f32 -1.442695, %v2152_v56  ;;  %v2456_v31 = vmul.f32 -1.442695, %v2153_v0 }
0x1649   :  { %2639 = vpow2.f32 %v2455_v21 }
0x164f   :  { %v2640_v18 = vpop.eup %2639 }
0x1650   :  { %v2157_v30 = vadd.f32 1.0, %v2640_v18 }
0x1652   :  { %2641 = vrcp.f32 %v2157_v30  ;;  %v2169_v50 = vand.u32 2147483648, %v2157_v30  ;;  %v2167_v39 = vand.u32 2147483647, %v2157_v30  ;;  %vm2163_vm6 = vweird.f32 %v2157_v30 }
0x1653   :  { %2643 = vtanh.f32 %v2153_v0 }
0x1654   :  { %v2170_v15 = vor.u32 1.1754944e-38, %v2169_v50  ;;  %vm2168_vm8 = vcmp.eq.f32.partialorder %v2167_v39, 8.507059e+37  ;;  %2645 = vpow2.f32 %v2456_v31 }
0x1658   :  { %v2642_v13 = vpop.eup %2641 }
0x1659   :  { %v2159_v35 = vmul.f32 %v2642_v13, %v2157_v30  ;;  %vm2164_vm5 = vweird.f32 %v2642_v13  ;;  %v2644_v28 = vpop.eup %2643 }
0x165a   :  { %vm2165_vm7 = vmor %vm2163_vm6, %vm2164_vm5  ;;  %v2646_v59 = vpop.eup %2645 }
0x165b   :  { %v2160_v43 = vsub.f32 1.0, %v2159_v35  ;;  %v2177_v57 = vadd.f32 1.0, %v2646_v59 }
0x165d   :  { %v2161_v46 = vmul.f32 %v2642_v13, %v2160_v43  ;;  %2647 = vrcp.f32 %v2177_v57  ;;  %v2189_v45 = vand.u32 2147483648, %v2177_v57  ;;  %vm2183_vm10 = vweird.f32 %v2177_v57 }
0x165e   :  { %v2187_v33 = vand.u32 2147483647, %v2177_v57 }
0x165f   :  { %v2162_v51 = vadd.f32 %v2642_v13, %v2161_v46  ;;  %v2190_v23 = vor.u32 1.1754944e-38, %v2189_v45 }
0x1660   :  { %vm2188_vm14 = vcmp.eq.f32.partialorder %v2187_v33, 8.507059e+37 }
0x1661   :  { %v2166_v54 = vsel %vm2165_vm7, %v2642_v13, %v2162_v51 }
0x1662   :  { %v2171_v49 = vsel %vm2168_vm8, %v2170_v15, %v2166_v54  ;;  %v2469_v15 = vld [vmem:[%s3646_s7] ss:$0 sm:$0xff]  ;;  %vm2361_vm8 = vcmask 7168  }
0x1663   :  { %v2194_v27 = vmul.f32 %v2644_v28, %v2171_v49  ;;  %v2648_v5 = vpop.eup %2647  ;;  %v2193_v62 = vmul.f32 %v2171_v49, %v2079_v9  ;;  %v3662_v9 = vsel %vm2997_vm2, %v3447_v44, %v3443_v55 }
0x1664   :  { %v2179_v16 = vmul.f32 %v2648_v5, %v2177_v57  ;;  %vm2184_vm9 = vweird.f32 %v2648_v5 }
0x1665   :  { %2196 = vrot.lane.b32.xlu1 %v2194_v27, %s2749_s0  ;;  %vm2185_vm13 = vmor %vm2183_vm10, %vm2184_vm9  ;;  %v2470_v27 = vld [vmem:[#allocation4] ss:$0 sm:$0xff] }
0x1666   :  { %v2180_v19 = vsub.f32 1.0, %v2179_v16 }
0x1668   :  { %v2181_v20 = vmul.f32 %v2648_v5, %v2180_v19 }
0x166a   :  { %v2182_v1 = vadd.f32 %v2648_v5, %v2181_v20 }
0x166c   :  { %v2186_v11 = vsel %vm2185_vm13, %v2648_v5, %v2182_v1 }
0x166d   :  { %v2191_v25 = vsel %vm2188_vm14, %v2190_v23, %v2186_v11 }
0x16d7   :  { %v2197_v52 = vpop.permute.xlu1 %2196 }
0x16d8   :  { %v2199_v60 = vadd.f32 %v2197_v52, %v2193_v62 }
0x16da   :  { %2649 = vtanh.f32 %v2199_v60 }
0x16e0   :  { %v2650_v24 = vpop.eup %2649 }
0x16e1   :  { %v2201_v26 = vmul.f32 %v2650_v24, %v2191_v25 }
0x16e3   :  { %2203 = vrot.lane.b32.xlu2 %v2201_v26, %s2749_s0 }
0x173d   :  { %v2204_v4 = vpop.permute.xlu2 %2203 }
0x173e   :  { %2206 = vst.msk [vmem:[#allocation3 + $0x30] sm:$0xff] %vm132_vm0, %v2204_v4  ;;  %2457 = vmatmul.msk.f32.vlgmr.msrb.gmra.mxu2 %vm277_vm11, %v2204_v4  ;;  %2458 = vmatmul.msk.f32.vlgmr.msrb.gmra.mxu3 %vm277_vm11, %v2204_v4 }
0x173f   :  { %2207 = vst.msk [vmem:[#allocation3 + $0x8] sm:$0xff] %vm376_vm12, %v2204_v4 }
0x17c1   :  { %v2249_v8 = vpop.f32.mrf.mxu2  ;;  %v2269_v53 = vpop.f32.mrf.mxu3 }
0x17c2   :  { %v2272_v40 = vadd.f32 %v2249_v8, %v3661_v42  ;;  %v2273_v10 = vadd.f32 %v2269_v53, %v3662_v9 }
0x17c4   :  { %v2459_v6 = vmul.f32 -1.442695, %v2272_v40  ;;  %v2460_v55 = vmul.f32 -1.442695, %v2273_v10 }
0x17c6   :  { %2651 = vpow2.f32 %v2459_v6 }
0x17cc   :  { %v2652_v63 = vpop.eup %2651 }
0x17cd   :  { %v2277_v36 = vadd.f32 1.0, %v2652_v63 }
0x17cf   :  { %2653 = vrcp.f32 %v2277_v36  ;;  %v2289_v58 = vand.u32 2147483648, %v2277_v36  ;;  %v2287_v38 = vand.u32 2147483647, %v2277_v36  ;;  %vm2283_vm15 = vweird.f32 %v2277_v36 }
0x17d0   :  { %2655 = vtanh.f32 %v2273_v10 }
0x17d1   :  { %v2290_v14 = vor.u32 1.1754944e-38, %v2289_v58  ;;  %vm2288_vm4 = vcmp.eq.f32.partialorder %v2287_v38, 8.507059e+37  ;;  %2657 = vpow2.f32 %v2460_v55 }
0x17d5   :  { %v2654_v7 = vpop.eup %2653 }
0x17d6   :  { %v2279_v47 = vmul.f32 %v2654_v7, %v2277_v36  ;;  %vm2284_vm1 = vweird.f32 %v2654_v7  ;;  %v2656_v22 = vpop.eup %2655 }
0x17d7   :  { %vm2285_vm3 = vmor %vm2283_vm15, %vm2284_vm1  ;;  %v2658_v44 = vpop.eup %2657 }
0x17d8   :  { %v2280_v12 = vsub.f32 1.0, %v2279_v47  ;;  %v2297_v32 = vadd.f32 1.0, %v2658_v44 }
0x17da   :  { %v2281_v29 = vmul.f32 %v2654_v7, %v2280_v12  ;;  %2659 = vrcp.f32 %v2297_v32  ;;  %v2309_v17 = vand.u32 2147483648, %v2297_v32  ;;  %vm2303_vm5 = vweird.f32 %v2297_v32 }
0x17db   :  { %v2307_v0 = vand.u32 2147483647, %v2297_v32 }
0x17dc   :  { %v2282_v3 = vadd.f32 %v2654_v7, %v2281_v29  ;;  %v2310_v43 = vor.u32 1.1754944e-38, %v2309_v17 }
0x17dd   :  { %vm2308_vm7 = vcmp.eq.f32.partialorder %v2307_v0, 8.507059e+37 }
0x17de   :  { %v2286_v2 = vsel %vm2285_vm3, %v2654_v7, %v2282_v3 }
0x17df   :  { %v2291_v34 = vsel %vm2288_vm4, %v2290_v14, %v2286_v2 }
0x17e0   :  { %v2314_v61 = vmul.f32 %v2656_v22, %v2291_v34  ;;  %v2660_v37 = vpop.eup %2659  ;;  %v2313_v18 = vmul.f32 %v2291_v34, %v2199_v60 }
0x17e1   :  { %v2299_v48 = vmul.f32 %v2660_v37, %v2297_v32  ;;  %vm2304_vm2 = vweird.f32 %v2660_v37 }
0x17e2   :  { %2316 = vrot.lane.b32.xlu0 %v2314_v61, %s2749_s0  ;;  %vm2305_vm6 = vmor %vm2303_vm5, %vm2304_vm2 }
0x17e3   :  { %v2300_v56 = vsub.f32 1.0, %v2299_v48 }
0x17e5   :  { %v2301_v21 = vmul.f32 %v2660_v37, %v2300_v56 }
0x17e7   :  { %v2302_v13 = vadd.f32 %v2660_v37, %v2301_v21 }
0x17e9   :  { %v2306_v35 = vsel %vm2305_vm6, %v2660_v37, %v2302_v13 }
0x17ea   :  { %v2311_v46 = vsel %vm2308_vm7, %v2310_v43, %v2306_v35 }
0x1854   :  { %v2317_v30 = vpop.permute.xlu0 %2316 }
0x1855   :  { %v2319_v41 = vadd.f32 %v2317_v30, %v2313_v18 }
0x1857   :  { %2661 = vtanh.f32 %v2319_v41 }
0x185d   :  { %v2662_v50 = vpop.eup %2661 }
0x185e   :  { %v2321_v39 = vmul.f32 %v2662_v50, %v2311_v46 }
0x1860   :  { %2323 = vrot.lane.b32.xlu1 %v2321_v39, %s2749_s0 }
0x18d2   :  { %v2324_v51 = vpop.permute.xlu1 %2323 }
0x18d3   :  { %2326 = vst.msk [vmem:[#allocation3 + $0x38] sm:$0xff] %vm132_vm0, %v2324_v51 }
0x18d4   :  { %2327 = vst.msk [vmem:[#allocation3] sm:$0xff] %vm376_vm12, %v2324_v51 }
0x18da   :  { %v2328_v54 = vld [vmem:[#allocation3 + $0x38] sm:$0xff] }
0x18db   :  { %v2333_v28 = vmul.f32 %v2469_v15, %v2328_v54 }
0x18dd   :  { %v2334_v49 = vsel %vm277_vm11, %v2333_v28, 0.0 }
0x18de   :  { %2335 = vadd.xlane.f32.xlu2 %v2334_v49 }
0x1951   :  { %v2336_v31 = vpop.xlane.xlu2 %2335 }
0x1952   :  { %v2341_v59 = vadd.f32 %v2470_v27, %v2336_v31 }
0x1954   :  { %v2461_v57 = vmul.f32 -1.442695, %v2341_v59 }
0x1956   :  { %2663 = vpow2.f32 %v2461_v57 }
0x195c   :  { %v2664_v5 = vpop.eup %2663 }
0x195d   :  { %v2345_v16 = vadd.f32 1.0, %v2664_v5 }
0x195f   :  { %2665 = vrcp.f32 %v2345_v16  ;;  %v2357_v52 = vand.u32 2147483648, %v2345_v16  ;;  %v2355_v1 = vand.u32 2147483647, %v2345_v16  ;;  %vm2351_vm12 = vweird.f32 %v2345_v16 }
0x1961   :  { %v2358_v33 = vor.u32 1.1754944e-38, %v2357_v52  ;;  %vm2356_vm9 = vcmp.eq.f32.partialorder %v2355_v1, 8.507059e+37 }
0x1965   :  { %v2666_v19 = vpop.eup %2665 }
0x1966   :  { %v2347_v20 = vmul.f32 %v2666_v19, %v2345_v16  ;;  %vm2352_vm0 = vweird.f32 %v2666_v19 }
0x1967   :  { %vm2353_vm11 = vmor %vm2351_vm12, %vm2352_vm0 }
0x1968   :  { %v2348_v62 = vsub.f32 1.0, %v2347_v20 }
0x196a   :  { %v2349_v60 = vmul.f32 %v2666_v19, %v2348_v62 }
0x196c   :  { %v2350_v45 = vadd.f32 %v2666_v19, %v2349_v60 }
0x196e   :  { %v2354_v11 = vsel %vm2353_vm11, %v2666_v19, %v2350_v45 }
0x196f   :  { %v2359_v23 = vsel %vm2356_vm9, %v2358_v33, %v2354_v11 }
0x1970   :  { %2362 = vst.msk [vmem:[%s3648_s9] sm:$0xff] %vm2361_vm8, %v2359_v23 }
0x1971   :  { %2367 = vsyncpa [#allocation6], 1 }
0x1972   :  { %2368 = vsyncpa [#allocation8], 1 }

</bundles_post_ra>
